<compile_context>
chip_gen: v6e
topology: v6e:2x2x1
jax: 0.10.0
libtpu: 0.0.40
codegen_flags: <defaults>
</compile_context>

<pallas_src>
import functools

import jax
import jax.numpy as jnp
from jax.experimental import pallas as pl
from jax.experimental.pallas import tpu as pltpu

EPS = 1e-5
OUT_PAD = 128          # lane-dense width for the final (4-wide) layer
SUBLANE = 8            # f32 sublane size


def _bn_train(h, gamma, beta, mask, inv_n):
    """Training-mode BatchNorm1d with the affine fused into one scale/shift.

    mask is None on the fast path (no padded batch rows); otherwise it zeroes
    padded rows out of the batch statistics (mean/var over the real rows)."""
    if mask is None:
        mean = jnp.mean(h, axis=0, keepdims=True)
        var = jnp.mean((h - mean) ** 2, axis=0, keepdims=True)   # biased, as torch
    else:
        mean = jnp.sum(h * mask, axis=0, keepdims=True) * inv_n
        d = (h - mean) * mask
        var = jnp.sum(d * d, axis=0, keepdims=True) * inv_n
    scale = gamma * jax.lax.rsqrt(var + EPS)                      # rsqrt -> EUP slot
    shift = beta - mean * scale
    return h * scale + shift                                      # one mul + add


def mlp_kernel(x_ref, w1x_ref, emb1b_ref,
               w2_ref, b2_ref, w3_ref, b3_ref, w4_ref, b4_ref,
               g1_ref, be1_ref, g2_ref, be2_ref, g3_ref, be3_ref,
               out_ref, *, n_valid):
    x = x_ref[...]                                       # (Bp, 1+input_size) bf16
    bp = x.shape[0]

    # one-hot of the label stored in column 0 (small non-negative ints,
    # exact in bf16)
    label = x[:, 0:1].astype(jnp.int32)                  # (Bp, 1)
    class_ids = jax.lax.broadcasted_iota(jnp.int32, (1, emb1b_ref.shape[0]), 1)
    onehot = (label == class_ids).astype(jnp.float32)    # (Bp, classes)

    if n_valid == bp:                                    # fast path: no padding
        mask, inv_n = None, None
    else:
        rows = jax.lax.broadcasted_iota(jnp.int32, (bp, 1), 0)
        mask = (rows < n_valid).astype(jnp.float32)
        inv_n = jnp.float32(1.0 / n_valid)

    # fc1 with the embedding + fc1 bias folded in:
    #   row 0 of w1x is zero, so the raw input (label column included) goes
    #   straight to the MXU -- no slice, no concat.  The embedding/bias term
    #   is an exact row-select: onehot @ (emb @ w1_emb + b1), kept in f32.
    h = (jnp.dot(x, w1x_ref[...], preferred_element_type=jnp.float32)
         + jnp.dot(onehot, emb1b_ref[...], preferred_element_type=jnp.float32))
    h = jnp.maximum(h, 0.0)
    h = _bn_train(h, g1_ref[...], be1_ref[...], mask, inv_n)

    h = jnp.maximum(jnp.dot(h.astype(jnp.bfloat16), w2_ref[...],
                            preferred_element_type=jnp.float32) + b2_ref[...], 0.0)
    h = _bn_train(h, g2_ref[...], be2_ref[...], mask, inv_n)

    h = jnp.maximum(jnp.dot(h.astype(jnp.bfloat16), w3_ref[...],
                            preferred_element_type=jnp.float32) + b3_ref[...], 0.0)
    h = _bn_train(h, g3_ref[...], be3_ref[...], mask, inv_n)

    # fc4 is zero-padded to OUT_PAD columns -> lane-dense unmasked store.
    out_ref[...] = jnp.maximum(
        jnp.dot(h.astype(jnp.bfloat16), w4_ref[...],
                preferred_element_type=jnp.float32) + b4_ref[...], 0.0)


def fold_params(p):
    """Build kernel-side arrays: fold the embedding (and fc1 bias) into fc1,
    cast matmul weights to bf16, zero-pad fc4 to a lane-dense width."""
    embed = p["emb"].shape[1]
    in_feats = p["w1"].shape[0] - embed                  # input_size
    hidden = p["w1"].shape[1]

    w1_feats = p["w1"][:in_feats]                        # (input_size, H)
    w1_emb = p["w1"][in_feats:]                          # (embed, H)
    # zero row for the label column so the raw input needs no slicing
    w1x = jnp.concatenate([jnp.zeros((1, hidden), jnp.float32), w1_feats], 0)
    emb1b = p["emb"] @ w1_emb + p["b1"]                  # (classes, H), f32

    out_dim = p["w4"].shape[1]
    pad = OUT_PAD - out_dim
    w4p = jnp.pad(p["w4"], ((0, 0), (0, pad)))
    b4p = jnp.pad(p["b4"], ((0, 0), (0, pad)))

    bf16 = jnp.bfloat16
    return dict(
        w1x=w1x.astype(bf16), emb1b=emb1b,
        w2=p["w2"].astype(bf16), b2=p["b2"],
        w3=p["w3"].astype(bf16), b3=p["b3"],
        w4=w4p.astype(bf16), b4=b4p,
        g1=p["g1"], be1=p["be1"], g2=p["g2"], be2=p["be2"],
        g3=p["g3"], be3=p["be3"], out_dim=out_dim)


def mlp_forward(x, kp):
    B = x.shape[0]
    Bp = max(SUBLANE, ((B + SUBLANE - 1) // SUBLANE) * SUBLANE)
    xb = x.astype(jnp.bfloat16)                          # matmul operand dtype
    if Bp != B:
        xb = jnp.pad(xb, ((0, Bp - B), (0, 0)))          # padded rows masked in BN

    args = (xb, kp["w1x"], kp["emb1b"], kp["w2"], kp["b2"],
            kp["w3"], kp["b3"], kp["w4"], kp["b4"],
            kp["g1"], kp["be1"], kp["g2"], kp["be2"], kp["g3"], kp["be3"])
    vmem = pl.BlockSpec(memory_space=pltpu.MemorySpace.VMEM)
    out = pl.pallas_call(
        functools.partial(mlp_kernel, n_valid=B),
        out_shape=jax.ShapeDtypeStruct((Bp, OUT_PAD), jnp.float32),
        in_specs=[vmem] * len(args),
        out_specs=vmem,
        compiler_params=pltpu.CompilerParams(
            vmem_limit_bytes=32 * 1024 * 1024),   # fits v7x's 64 MiB VMEM too
    )(*args)
    return out[:B, :kp["out_dim"]]


def init_params(key, input_size=6, hidden=512, embed=6, classes=3):
    ks = jax.random.split(key, 5)

    def linear(k, fin, fout):
        kw, kb = jax.random.split(k)
        bound = 1.0 / jnp.sqrt(jnp.float32(fin))
        w = jax.random.uniform(kw, (fin, fout), jnp.float32, -bound, bound)
        b = jax.random.uniform(kb, (1, fout), jnp.float32, -bound, bound)
        return w, b

    emb = jax.random.normal(ks[0], (classes, embed), jnp.float32)
    w1, b1 = linear(ks[1], input_size + embed, hidden)
    w2, b2 = linear(ks[2], hidden, hidden * 2)
    w3, b3 = linear(ks[3], hidden * 2, hidden)
    w4, b4 = linear(ks[4], hidden, 4)
    return dict(emb=emb, w1=w1, b1=b1, w2=w2, b2=b2, w3=w3, b3=b3,
                w4=w4, b4=b4,
                g1=jnp.ones((1, hidden), jnp.float32),
                be1=jnp.zeros((1, hidden), jnp.float32),
                g2=jnp.ones((1, hidden * 2), jnp.float32),
                be2=jnp.zeros((1, hidden * 2), jnp.float32),
                g3=jnp.ones((1, hidden), jnp.float32),
                be3=jnp.zeros((1, hidden), jnp.float32))


def mlp_reference_f32(x, p):
    """Literal PyTorch forward (all-f32)."""
    label = x[:, 0].astype(jnp.int32)
    label_fea = p["emb"][label]
    feats = jnp.concatenate([x[:, 1:], label_fea], axis=1)

    def bn(h, g, b):
        m = jnp.mean(h, axis=0, keepdims=True)
        v = jnp.mean((h - m) ** 2, axis=0, keepdims=True)
        return (h - m) / jnp.sqrt(v + EPS) * g + b

    h = jax.nn.relu(feats @ p["w1"] + p["b1"]); h = bn(h, p["g1"], p["be1"])
    h = jax.nn.relu(h @ p["w2"] + p["b2"]);     h = bn(h, p["g2"], p["be2"])
    h = jax.nn.relu(h @ p["w3"] + p["b3"]);     h = bn(h, p["g3"], p["be3"])
    return jax.nn.relu(h @ p["w4"] + p["b4"])


def mlp_reference_matched(x, p):
    """Same math as the kernel, with matmul operands rounded to bf16 exactly
    like the kernel does (tight check of the Pallas mechanics)."""
    bf = lambda a: a.astype(jnp.bfloat16).astype(jnp.float32)
    label = x[:, 0].astype(jnp.int32)
    in_feats = p["w1"].shape[0] - p["emb"].shape[1]
    emb1b = p["emb"] @ p["w1"][in_feats:] + p["b1"]

    def bn(h, g, b):
        return _bn_train(h, g, b, mask=None, inv_n=None)

    h = bf(x[:, 1:]) @ bf(p["w1"][:in_feats]) + emb1b[label]
    h = bn(jax.nn.relu(h), p["g1"], p["be1"])
    h = bn(jax.nn.relu(bf(h) @ bf(p["w2"]) + p["b2"]), p["g2"], p["be2"])
    h = bn(jax.nn.relu(bf(h) @ bf(p["w3"]) + p["b3"]), p["g3"], p["be3"])
    return jax.nn.relu(bf(h) @ bf(p["w4"]) + p["b4"])


if __name__ == "__main__":
    input_size, hidden, embed, classes = 6, 512, 6, 3   # module defaults

    key = jax.random.PRNGKey(0)
    kp, kl, kf = jax.random.split(key, 3)
    params = init_params(kp, input_size, hidden, embed, classes)
    kparams = fold_params(params)

    ok = True
    for B in (8, 5):   # aligned batch (fast path) + unaligned batch (masked BN)
        klb, kfb = jax.random.split(jax.random.fold_in(kl, B))
        # column 0 holds the integer-valued energy-class label; columns 1..6
        # are continuous features -- matches the PyTorch forward's slicing.
        labels = jax.random.randint(klb, (B, 1), 0, classes).astype(jnp.float32)
        feats = jax.random.normal(kfb, (B, input_size), jnp.float32)
        x = jnp.concatenate([labels, feats], axis=1)      # (B, 1 + input_size)

        out = jax.block_until_ready(mlp_forward(x, kparams))
        assert out.shape == (B, 4)

        # Tight check against a reference that mirrors the kernel's bf16
        # matmul operands (validates the Pallas mechanics end-to-end)...
        ref_matched = mlp_reference_matched(x, params)
        ok &= bool(jnp.allclose(out, ref_matched, atol=5e-3, rtol=5e-3))

        # ...plus a loose check against the pure-f32 PyTorch-faithful
        # reference (only deviation is bf16 rounding of matmul operands).
        ref_f32 = mlp_reference_f32(x, params)
        ok &= bool(jnp.allclose(out, ref_f32, atol=2e-1, rtol=2e-1))

    assert ok
    print("KERNEL_OK")
</pallas_src>

<mosaic_0001>
module attributes {stable_mosaic.version = 11 : i64} {
  func.func @mlp_kernel(%arg0: memref<8x7xbf16, #tpu.memory_space<vmem>>, %arg1: memref<7x512xbf16, #tpu.memory_space<vmem>>, %arg2: memref<3x512xf32, #tpu.memory_space<vmem>>, %arg3: memref<512x1024xbf16, #tpu.memory_space<vmem>>, %arg4: memref<1x1024xf32, #tpu.memory_space<vmem>>, %arg5: memref<1024x512xbf16, #tpu.memory_space<vmem>>, %arg6: memref<1x512xf32, #tpu.memory_space<vmem>>, %arg7: memref<512x128xbf16, #tpu.memory_space<vmem>>, %arg8: memref<1x128xf32, #tpu.memory_space<vmem>>, %arg9: memref<1x512xf32, #tpu.memory_space<vmem>>, %arg10: memref<1x512xf32, #tpu.memory_space<vmem>>, %arg11: memref<1x1024xf32, #tpu.memory_space<vmem>>, %arg12: memref<1x1024xf32, #tpu.memory_space<vmem>>, %arg13: memref<1x512xf32, #tpu.memory_space<vmem>>, %arg14: memref<1x512xf32, #tpu.memory_space<vmem>>, %arg15: memref<8x128xf32, #tpu.memory_space<vmem>>) attributes {dimension_semantics = [], scalar_prefetch = 0 : i64, scratch_operands = 0 : i64, tpu.core_type = #tpu.core_type<tc>} {
    %c0 = arith.constant 0 : index
    %c0_0 = arith.constant 0 : index
    %0 = vector.load %arg0[%c0, %c0_0] : memref<8x7xbf16, #tpu.memory_space<vmem>>, vector<8x7xbf16>
    %1 = vector.extract_strided_slice %0 {offsets = [0, 0], sizes = [8, 1], strides = [1, 1]} : vector<8x7xbf16> to vector<8x1xbf16>
    %2 = arith.fptosi %1 : vector<8x1xbf16> to vector<8x1xi32>
    %3 = tpu.iota {dimensions = array<i32: 1>} : vector<1x3xi32>
    %4 = vector.broadcast %2 : vector<8x1xi32> to vector<8x3xi32>
    %5 = vector.broadcast %3 : vector<1x3xi32> to vector<8x3xi32>
    %6 = arith.cmpi eq, %4, %5 : vector<8x3xi32>
    %7 = arith.extui %6 : vector<8x3xi1> to vector<8x3xi32>
    %8 = arith.sitofp %7 : vector<8x3xi32> to vector<8x3xf32>
    %c0_1 = arith.constant 0 : index
    %c0_2 = arith.constant 0 : index
    %9 = vector.load %arg1[%c0_1, %c0_2] : memref<7x512xbf16, #tpu.memory_space<vmem>>, vector<7x512xbf16>
    %cst = arith.constant dense<0.000000e+00> : vector<8x512xf32>
    %10 = tpu.matmul %0, %9, %cst {dimension_numbers = #tpu.dot_dimension_numbers<[1], [0], [0], [1], [0, 0, 1, 1], [], []>} : vector<8x7xbf16>, vector<7x512xbf16>, vector<8x512xf32> -> vector<8x512xf32>
    %c0_3 = arith.constant 0 : index
    %c0_4 = arith.constant 0 : index
    %11 = vector.load %arg2[%c0_3, %c0_4] : memref<3x512xf32, #tpu.memory_space<vmem>>, vector<3x512xf32>
    %cst_5 = arith.constant dense<0.000000e+00> : vector<8x512xf32>
    %12 = tpu.matmul %8, %11, %cst_5 {dimension_numbers = #tpu.dot_dimension_numbers<[1], [0], [0], [1], [0, 0, 1, 1], [], []>} : vector<8x3xf32>, vector<3x512xf32>, vector<8x512xf32> -> vector<8x512xf32>
    %13 = arith.addf %10, %12 : vector<8x512xf32>
    %cst_6 = arith.constant 0.000000e+00 : f32
    %14 = vector.broadcast %cst_6 : f32 to vector<8x512xf32>
    %15 = arith.maximumf %13, %14 : vector<8x512xf32>
    %c0_7 = arith.constant 0 : index
    %c0_8 = arith.constant 0 : index
    %16 = vector.load %arg9[%c0_7, %c0_8] : memref<1x512xf32, #tpu.memory_space<vmem>>, vector<1x512xf32>
    %c0_9 = arith.constant 0 : index
    %c0_10 = arith.constant 0 : index
    %17 = vector.load %arg10[%c0_9, %c0_10] : memref<1x512xf32, #tpu.memory_space<vmem>>, vector<1x512xf32>
    %cst_11 = arith.constant dense<0.000000e+00> : vector<512xf32>
    %18 = vector.multi_reduction <add>, %15, %cst_11 [0] : vector<8x512xf32> to vector<512xf32>
    %19 = vector.shape_cast %18 : vector<512xf32> to vector<1x512xf32>
    %cst_12 = arith.constant 8.000000e+00 : f32
    %20 = vector.broadcast %cst_12 : f32 to vector<1x512xf32>
    %21 = arith.divf %19, %20 : vector<1x512xf32>
    %22 = vector.broadcast %21 : vector<1x512xf32> to vector<8x512xf32>
    %23 = arith.subf %15, %22 : vector<8x512xf32>
    %24 = arith.mulf %23, %23 : vector<8x512xf32>
    %cst_13 = arith.constant dense<0.000000e+00> : vector<512xf32>
    %25 = vector.multi_reduction <add>, %24, %cst_13 [0] : vector<8x512xf32> to vector<512xf32>
    %26 = vector.shape_cast %25 : vector<512xf32> to vector<1x512xf32>
    %cst_14 = arith.constant 8.000000e+00 : f32
    %27 = vector.broadcast %cst_14 : f32 to vector<1x512xf32>
    %28 = arith.divf %26, %27 : vector<1x512xf32>
    %cst_15 = arith.constant 9.99999974E-6 : f32
    %29 = vector.broadcast %cst_15 : f32 to vector<1x512xf32>
    %30 = arith.addf %28, %29 : vector<1x512xf32>
    %31 = math.rsqrt %30 : vector<1x512xf32>
    %32 = arith.mulf %16, %31 : vector<1x512xf32>
    %33 = arith.mulf %21, %32 : vector<1x512xf32>
    %34 = arith.subf %17, %33 : vector<1x512xf32>
    %35 = vector.broadcast %32 : vector<1x512xf32> to vector<8x512xf32>
    %36 = arith.mulf %15, %35 : vector<8x512xf32>
    %37 = vector.broadcast %34 : vector<1x512xf32> to vector<8x512xf32>
    %38 = arith.addf %36, %37 : vector<8x512xf32>
    %39 = arith.truncf %38 : vector<8x512xf32> to vector<8x512xbf16>
    %c0_16 = arith.constant 0 : index
    %c0_17 = arith.constant 0 : index
    %40 = vector.load %arg3[%c0_16, %c0_17] : memref<512x1024xbf16, #tpu.memory_space<vmem>>, vector<512x1024xbf16>
    %cst_18 = arith.constant dense<0.000000e+00> : vector<8x1024xf32>
    %41 = tpu.matmul %39, %40, %cst_18 {dimension_numbers = #tpu.dot_dimension_numbers<[1], [0], [0], [1], [0, 0, 1, 1], [], []>} : vector<8x512xbf16>, vector<512x1024xbf16>, vector<8x1024xf32> -> vector<8x1024xf32>
    %c0_19 = arith.constant 0 : index
    %c0_20 = arith.constant 0 : index
    %42 = vector.load %arg4[%c0_19, %c0_20] : memref<1x1024xf32, #tpu.memory_space<vmem>>, vector<1x1024xf32>
    %43 = vector.broadcast %42 : vector<1x1024xf32> to vector<8x1024xf32>
    %44 = arith.addf %41, %43 : vector<8x1024xf32>
    %cst_21 = arith.constant 0.000000e+00 : f32
    %45 = vector.broadcast %cst_21 : f32 to vector<8x1024xf32>
    %46 = arith.maximumf %44, %45 : vector<8x1024xf32>
    %c0_22 = arith.constant 0 : index
    %c0_23 = arith.constant 0 : index
    %47 = vector.load %arg11[%c0_22, %c0_23] : memref<1x1024xf32, #tpu.memory_space<vmem>>, vector<1x1024xf32>
    %c0_24 = arith.constant 0 : index
    %c0_25 = arith.constant 0 : index
    %48 = vector.load %arg12[%c0_24, %c0_25] : memref<1x1024xf32, #tpu.memory_space<vmem>>, vector<1x1024xf32>
    %cst_26 = arith.constant dense<0.000000e+00> : vector<1024xf32>
    %49 = vector.multi_reduction <add>, %46, %cst_26 [0] : vector<8x1024xf32> to vector<1024xf32>
    %50 = vector.shape_cast %49 : vector<1024xf32> to vector<1x1024xf32>
    %cst_27 = arith.constant 8.000000e+00 : f32
    %51 = vector.broadcast %cst_27 : f32 to vector<1x1024xf32>
    %52 = arith.divf %50, %51 : vector<1x1024xf32>
    %53 = vector.broadcast %52 : vector<1x1024xf32> to vector<8x1024xf32>
    %54 = arith.subf %46, %53 : vector<8x1024xf32>
    %55 = arith.mulf %54, %54 : vector<8x1024xf32>
    %cst_28 = arith.constant dense<0.000000e+00> : vector<1024xf32>
    %56 = vector.multi_reduction <add>, %55, %cst_28 [0] : vector<8x1024xf32> to vector<1024xf32>
    %57 = vector.shape_cast %56 : vector<1024xf32> to vector<1x1024xf32>
    %cst_29 = arith.constant 8.000000e+00 : f32
    %58 = vector.broadcast %cst_29 : f32 to vector<1x1024xf32>
    %59 = arith.divf %57, %58 : vector<1x1024xf32>
    %cst_30 = arith.constant 9.99999974E-6 : f32
    %60 = vector.broadcast %cst_30 : f32 to vector<1x1024xf32>
    %61 = arith.addf %59, %60 : vector<1x1024xf32>
    %62 = math.rsqrt %61 : vector<1x1024xf32>
    %63 = arith.mulf %47, %62 : vector<1x1024xf32>
    %64 = arith.mulf %52, %63 : vector<1x1024xf32>
    %65 = arith.subf %48, %64 : vector<1x1024xf32>
    %66 = vector.broadcast %63 : vector<1x1024xf32> to vector<8x1024xf32>
    %67 = arith.mulf %46, %66 : vector<8x1024xf32>
    %68 = vector.broadcast %65 : vector<1x1024xf32> to vector<8x1024xf32>
    %69 = arith.addf %67, %68 : vector<8x1024xf32>
    %70 = arith.truncf %69 : vector<8x1024xf32> to vector<8x1024xbf16>
    %c0_31 = arith.constant 0 : index
    %c0_32 = arith.constant 0 : index
    %71 = vector.load %arg5[%c0_31, %c0_32] : memref<1024x512xbf16, #tpu.memory_space<vmem>>, vector<1024x512xbf16>
    %cst_33 = arith.constant dense<0.000000e+00> : vector<8x512xf32>
    %72 = tpu.matmul %70, %71, %cst_33 {dimension_numbers = #tpu.dot_dimension_numbers<[1], [0], [0], [1], [0, 0, 1, 1], [], []>} : vector<8x1024xbf16>, vector<1024x512xbf16>, vector<8x512xf32> -> vector<8x512xf32>
    %c0_34 = arith.constant 0 : index
    %c0_35 = arith.constant 0 : index
    %73 = vector.load %arg6[%c0_34, %c0_35] : memref<1x512xf32, #tpu.memory_space<vmem>>, vector<1x512xf32>
    %74 = vector.broadcast %73 : vector<1x512xf32> to vector<8x512xf32>
    %75 = arith.addf %72, %74 : vector<8x512xf32>
    %cst_36 = arith.constant 0.000000e+00 : f32
    %76 = vector.broadcast %cst_36 : f32 to vector<8x512xf32>
    %77 = arith.maximumf %75, %76 : vector<8x512xf32>
    %c0_37 = arith.constant 0 : index
    %c0_38 = arith.constant 0 : index
    %78 = vector.load %arg13[%c0_37, %c0_38] : memref<1x512xf32, #tpu.memory_space<vmem>>, vector<1x512xf32>
    %c0_39 = arith.constant 0 : index
    %c0_40 = arith.constant 0 : index
    %79 = vector.load %arg14[%c0_39, %c0_40] : memref<1x512xf32, #tpu.memory_space<vmem>>, vector<1x512xf32>
    %cst_41 = arith.constant dense<0.000000e+00> : vector<512xf32>
    %80 = vector.multi_reduction <add>, %77, %cst_41 [0] : vector<8x512xf32> to vector<512xf32>
    %81 = vector.shape_cast %80 : vector<512xf32> to vector<1x512xf32>
    %cst_42 = arith.constant 8.000000e+00 : f32
    %82 = vector.broadcast %cst_42 : f32 to vector<1x512xf32>
    %83 = arith.divf %81, %82 : vector<1x512xf32>
    %84 = vector.broadcast %83 : vector<1x512xf32> to vector<8x512xf32>
    %85 = arith.subf %77, %84 : vector<8x512xf32>
    %86 = arith.mulf %85, %85 : vector<8x512xf32>
    %cst_43 = arith.constant dense<0.000000e+00> : vector<512xf32>
    %87 = vector.multi_reduction <add>, %86, %cst_43 [0] : vector<8x512xf32> to vector<512xf32>
    %88 = vector.shape_cast %87 : vector<512xf32> to vector<1x512xf32>
    %cst_44 = arith.constant 8.000000e+00 : f32
    %89 = vector.broadcast %cst_44 : f32 to vector<1x512xf32>
    %90 = arith.divf %88, %89 : vector<1x512xf32>
    %cst_45 = arith.constant 9.99999974E-6 : f32
    %91 = vector.broadcast %cst_45 : f32 to vector<1x512xf32>
    %92 = arith.addf %90, %91 : vector<1x512xf32>
    %93 = math.rsqrt %92 : vector<1x512xf32>
    %94 = arith.mulf %78, %93 : vector<1x512xf32>
    %95 = arith.mulf %83, %94 : vector<1x512xf32>
    %96 = arith.subf %79, %95 : vector<1x512xf32>
    %97 = vector.broadcast %94 : vector<1x512xf32> to vector<8x512xf32>
    %98 = arith.mulf %77, %97 : vector<8x512xf32>
    %99 = vector.broadcast %96 : vector<1x512xf32> to vector<8x512xf32>
    %100 = arith.addf %98, %99 : vector<8x512xf32>
    %101 = arith.truncf %100 : vector<8x512xf32> to vector<8x512xbf16>
    %c0_46 = arith.constant 0 : index
    %c0_47 = arith.constant 0 : index
    %102 = vector.load %arg7[%c0_46, %c0_47] : memref<512x128xbf16, #tpu.memory_space<vmem>>, vector<512x128xbf16>
    %cst_48 = arith.constant dense<0.000000e+00> : vector<8x128xf32>
    %103 = tpu.matmul %101, %102, %cst_48 {dimension_numbers = #tpu.dot_dimension_numbers<[1], [0], [0], [1], [0, 0, 1, 1], [], []>} : vector<8x512xbf16>, vector<512x128xbf16>, vector<8x128xf32> -> vector<8x128xf32>
    %c0_49 = arith.constant 0 : index
    %c0_50 = arith.constant 0 : index
    %104 = vector.load %arg8[%c0_49, %c0_50] : memref<1x128xf32, #tpu.memory_space<vmem>>, vector<1x128xf32>
    %105 = vector.broadcast %104 : vector<1x128xf32> to vector<8x128xf32>
    %106 = arith.addf %103, %105 : vector<8x128xf32>
    %cst_51 = arith.constant 0.000000e+00 : f32
    %107 = vector.broadcast %cst_51 : f32 to vector<8x128xf32>
    %108 = arith.maximumf %106, %107 : vector<8x128xf32>
    %c0_52 = arith.constant 0 : index
    %c0_53 = arith.constant 0 : index
    %109 = vector.load %arg15[%c0_52, %c0_53] : memref<8x128xf32, #tpu.memory_space<vmem>>, vector<8x128xf32>
    tpu.vector_store %arg15[%c0_52, %c0_53], %108 {strides = array<i32>} : memref<8x128xf32, #tpu.memory_space<vmem>>, vector<8x128xf32>,
    return
  }
}

</mosaic_0001>

<bundles_post_ra>
// kernel: tpu_custom_call.1
= control target key start
LH: loop header
LB: loop body
LE: loop exit
PB: predicated region body
PF: predicated region fallthrough
CT: control target
= control target key end

     0   :  { %20 = vsyncpa [#allocation3], 0  ;;  %s7282_s0 = inlined_call_operand.hbm [shape: bf16[8,7], index: 0, kind: input, shape index: {}]   ;;  %s7283_s1 = inlined_call_operand.hbm [shape: bf16[7,512], index: 1, kind: input, shape index: {}]   ;;  %s7284_s2 = inlined_call_operand.hbm [shape: f32[3,512], index: 2, kind: input, shape index: {}]   ;;  %s7285_s3 = inlined_call_operand.hbm [shape: bf16[512,1024], index: 3, kind: input, shape index: {}]   ;;  %s7286_s4 = inlined_call_operand.hbm [shape: f32[1,1024], index: 4, kind: input, shape index: {}]   ;;  %s7287_s5 = inlined_call_operand.hbm [shape: bf16[1024,512], index: 5, kind: input, shape index: {}]   ;;  %s7288_s6 = inlined_call_operand.hbm [shape: f32[1,512], index: 6, kind: input, shape index: {}]   ;;  %s7289_s7 = inlined_call_operand.hbm [shape: bf16[512,128], index: 7, kind: input, shape index: {}]   ;;  %s7290_s8 = inlined_call_operand.hbm [shape: f32[1,128], index: 8, kind: input, shape index: {}]   ;;  %s7291_s9 = inlined_call_operand.hbm [shape: f32[1,512], index: 9, kind: input, shape index: {}]   ;;  %s7292_s10 = inlined_call_operand.hbm [shape: f32[1,512], index: 10, kind: input, shape index: {}]   ;;  %s7293_s11 = inlined_call_operand.vmem [shape: f32[1,1024], index: 11, kind: input, shape index: {}]   ;;  %s7294_s12 = inlined_call_operand.vmem [shape: f32[1,1024], index: 12, kind: input, shape index: {}]   ;;  %s7295_s13 = inlined_call_operand.vmem [shape: f32[1,512], index: 13, kind: input, shape index: {}]   ;;  %s7296_s14 = inlined_call_operand.vmem [shape: f32[1,512], index: 14, kind: input, shape index: {}]   ;;  %s7297_s15 = inlined_call_operand.hbm [shape: f32[8,128], index: 15, kind: output, shape index: {}]  }
   0x1   :  { %21 = vsyncpa [#allocation6], 0 }
   0x2   :  { %22 = vsyncpa [#allocation9], 0 }
   0x3   :  { %23 = vsyncpa [#allocation12], 0 }
   0x4   :  { %24 = vsyncpa [#allocation15], 0 }
   0x5   :  { %25 = vsyncpa [#allocation18], 0 }
   0x6   :  { %26 = vsyncpa [#allocation4], 0  ;;  %s6741_s18 = smov [#allocation5]   ;;  %s6742_s20 = smov [#allocation8]  }
   0x7   :  { %s43_s19 = sshll.u32 %s6741_s18, 4  ;;  %s62_s21 = sshll.u32 %s6742_s20, 4  ;;  %s44_s19 = int_to_ptr.vmem [resolvable:$true] %s43_s19  ;;  %s63_s21 = int_to_ptr.vmem [resolvable:$true] %s62_s21 }
   0x8   :  { %s6495_s22 = scalar_lea.vmem %s44_s19, 256  ;;  %p6500_p1 = scmp.lt.s32.totalorder %s44_s19, %s44_s19 }
   0x9   :  { %p6496_p0 = scmp.ne.s32.totalorder %s44_s19, %s6495_s22  ;;  %p6501_p2 = scmp.lt.s32.totalorder %s6495_s22, %s6495_s22 }
   0xb   :  { %p6502_p3 = por %p6501_p2, %p6500_p1 }
   0xd   :  { %p6503_p4 = pnand %p6502_p3, %p6496_p0 }
   0xf   :  { %6506 = shalt.err (!%p6503_p4)
}
  0x10   :  { %46 = dma.hbm_to_vmem [thread:$0]  %s7283_s1, 256, %s44_s19, [#allocation6]  }
  0x11   :  { %s6515_s25 = scalar_lea.vmem %s63_s21, 32768  ;;  %p6520_p6 = scmp.lt.s32.totalorder %s63_s21, %s63_s21 }
  0x12   :  { %p6516_p5 = scmp.ne.s32.totalorder %s63_s21, %s6515_s25  ;;  %p6521_p7 = scmp.lt.s32.totalorder %s6515_s25, %s6515_s25 }
  0x14   :  { %p6522_p8 = por %p6521_p7, %p6520_p6 }
  0x16   :  { %p6523_p9 = pnand %p6522_p8, %p6516_p5 }
  0x18   :  { %6526 = shalt.err (!%p6523_p9)
}
  0x19   :  { %s6743_s26 = smov 512   ;;  %s6744_s27 = smov 32  }
  0x1a   :  { %68 = dma.hbm_to_vmem [thread:$0]  %s7285_s3, 32768, %s63_s21, [#allocation9], %s6743_s26, %s6743_s26, %s6744_s27  }
  0x1b   :  { %s6745_s30 = smov [#allocation11]  }
  0x1c   :  { %s84_s16 = sshll.u32 %s6745_s30, 4  ;;  %s85_s16 = int_to_ptr.vmem [resolvable:$true] %s84_s16 }
  0x1d   :  { %s6535_s17 = scalar_lea.vmem %s85_s16, 32768  ;;  %p6540_p11 = scmp.lt.s32.totalorder %s85_s16, %s85_s16 }
  0x1e   :  { %p6536_p10 = scmp.ne.s32.totalorder %s85_s16, %s6535_s17  ;;  %p6541_p12 = scmp.lt.s32.totalorder %s6535_s17, %s6535_s17 }
  0x20   :  { %p6542_p13 = por %p6541_p12, %p6540_p11 }
  0x22   :  { %p6543_p0 = pnand %p6542_p13, %p6536_p10 }
  0x24   :  { %6546 = shalt.err (!%p6543_p0)
}
  0x25   :  { %s6746_s1 = smov 256   ;;  %s6747_s18 = smov 16  }
  0x26   :  { %90 = dma.hbm_to_vmem [thread:$0]  %s7287_s5, 32768, %s85_s16, [#allocation12], %s6746_s1, %s6746_s1, %s6747_s18  }
  0x27   :  { %s6748_s22 = smov [#allocation14]  }
  0x28   :  { %s106_s23 = sshll.u32 %s6748_s22, 4  ;;  %s107_s23 = int_to_ptr.vmem [resolvable:$true] %s106_s23 }
  0x29   :  { %s6555_s3 = scalar_lea.vmem %s107_s23, 4096  ;;  %p6560_p2 = scmp.lt.s32.totalorder %s107_s23, %s107_s23 }
  0x2a   :  { %p6556_p1 = scmp.ne.s32.totalorder %s107_s23, %s6555_s3  ;;  %p6561_p3 = scmp.lt.s32.totalorder %s6555_s3, %s6555_s3 }
  0x2c   :  { %p6562_p4 = por %p6561_p3, %p6560_p2 }
  0x2e   :  { %p6563_p5 = pnand %p6562_p4, %p6556_p1 }
  0x30   :  { %6566 = shalt.err (!%p6563_p5)
}
  0x31   :  { %s6749_s21 = smov 64   ;;  %s6750_s24 = smov 4  }
  0x32   :  { %112 = dma.hbm_to_vmem [thread:$0]  %s7289_s7, 4096, %s107_s23, [#allocation15], %s6749_s21, %s6749_s21, %s6750_s24  }
  0x33   :  { %s6751_s27 = smov [#allocation17]   ;;  %s6752_s29 = smov [#allocation2]  }
  0x34   :  { %s129_s28 = sshll.u32 %s6751_s27, 4  ;;  %s33_s5 = sshll.u32 %s6752_s29, 4  ;;  %s130_s28 = int_to_ptr.vmem [resolvable:$true] %s129_s28  ;;  %s34_s5 = int_to_ptr.vmem [resolvable:$true] %s33_s5 }
  0x35   :  { %s6575_s30 = scalar_lea.vmem %s130_s28, 64  ;;  %p6580_p7 = scmp.lt.s32.totalorder %s130_s28, %s130_s28 }
  0x36   :  { %p6576_p6 = scmp.ne.s32.totalorder %s130_s28, %s6575_s30  ;;  %p6581_p8 = scmp.lt.s32.totalorder %s6575_s30, %s6575_s30 }
  0x38   :  { %p6582_p9 = por %p6581_p8, %p6580_p7 }
  0x3a   :  { %p6583_p10 = pnand %p6582_p9, %p6576_p6 }
  0x3c   :  { %6586 = shalt.err (!%p6583_p10)
}
  0x3d   :  { %132 = dma.hbm_to_vmem [thread:$0]  %s7291_s9, 64, %s130_s28, [#allocation18]  }
  0x3e   :  { %s6595_s1 = scalar_lea.vmem %s34_s5, 64  ;;  %p6600_p12 = scmp.lt.s32.totalorder %s34_s5, %s34_s5 }
  0x3f   :  { %p6596_p11 = scmp.ne.s32.totalorder %s34_s5, %s6595_s1  ;;  %p6601_p13 = scmp.lt.s32.totalorder %s6595_s1, %s6595_s1 }
  0x41   :  { %p6602_p0 = por %p6601_p13, %p6600_p12 }
  0x43   :  { %p6603_p1 = pnand %p6602_p0, %p6596_p11 }
  0x45   :  { %6606 = shalt.err (!%p6603_p1)
}
  0x46   :  { %36 = dma.hbm_to_vmem [thread:$0]  %s7282_s0, 64, %s34_s5, [#allocation3]  }
  0x47   :  { %s6753_s19 = smov [#allocation7]   ;;  %s6754_s22 = smov [#allocation10]  }
  0x48   :  { %s53_s20 = sshll.u32 %s6753_s19, 4  ;;  %s75_s23 = sshll.u32 %s6754_s22, 4  ;;  %s54_s20 = int_to_ptr.vmem [resolvable:$true] %s53_s20  ;;  %s76_s23 = int_to_ptr.vmem [resolvable:$true] %s75_s23 }
  0x49   :  { %s6615_s3 = scalar_lea.vmem %s54_s20, 256  ;;  %p6620_p3 = scmp.lt.s32.totalorder %s54_s20, %s54_s20 }
  0x4a   :  { %p6616_p2 = scmp.ne.s32.totalorder %s54_s20, %s6615_s3  ;;  %p6621_p4 = scmp.lt.s32.totalorder %s6615_s3, %s6615_s3 }
  0x4c   :  { %p6622_p5 = por %p6621_p4, %p6620_p3 }
  0x4e   :  { %p6623_p6 = pnand %p6622_p5, %p6616_p2 }
  0x50   :  { %6626 = shalt.err (!%p6623_p6)
}
  0x51   :  { %56 = dma.hbm_to_vmem [thread:$0]  %s7284_s2, 256, %s54_s20, [#allocation6]  }
  0x52   :  { %s6635_s24 = scalar_lea.vmem %s76_s23, 128  ;;  %p6640_p8 = scmp.lt.s32.totalorder %s76_s23, %s76_s23 }
  0x53   :  { %p6636_p7 = scmp.ne.s32.totalorder %s76_s23, %s6635_s24  ;;  %p6641_p9 = scmp.lt.s32.totalorder %s6635_s24, %s6635_s24 }
  0x55   :  { %p6642_p10 = por %p6641_p9, %p6640_p8 }
  0x57   :  { %p6643_p11 = pnand %p6642_p10, %p6636_p7 }
  0x59   :  { %6646 = shalt.err (!%p6643_p11)
}
  0x5a   :  { %78 = dma.hbm_to_vmem [thread:$0]  %s7286_s4, 128, %s76_s23, [#allocation9]  }
  0x5b   :  { %s6755_s26 = smov [#allocation13]   ;;  %s6756_s28 = smov [#allocation16]  }
  0x5c   :  { %s97_s27 = sshll.u32 %s6755_s26, 4  ;;  %s119_s29 = sshll.u32 %s6756_s28, 4  ;;  %s98_s27 = int_to_ptr.vmem [resolvable:$true] %s97_s27  ;;  %s120_s29 = int_to_ptr.vmem [resolvable:$true] %s119_s29 }
  0x5d   :  { %s6655_s5 = scalar_lea.vmem %s98_s27, 64  ;;  %p6660_p13 = scmp.lt.s32.totalorder %s98_s27, %s98_s27 }
  0x5e   :  { %p6656_p12 = scmp.ne.s32.totalorder %s98_s27, %s6655_s5  ;;  %p6661_p0 = scmp.lt.s32.totalorder %s6655_s5, %s6655_s5 }
  0x60   :  { %p6662_p1 = por %p6661_p0, %p6660_p13 }
  0x62   :  { %p6663_p2 = pnand %p6662_p1, %p6656_p12 }
  0x64   :  { %6666 = shalt.err (!%p6663_p2)
}
  0x65   :  { %100 = dma.hbm_to_vmem [thread:$0]  %s7288_s6, 64, %s98_s27, [#allocation12]  }
  0x66   :  { %s6675_s16 = scalar_lea.vmem %s120_s29, 16  ;;  %s6679_s4 = scalar_lea.vmem %s120_s29, 32 }
  0x67   :  { %p6676_p3 = scmp.ne.s32.totalorder %s120_s29, %s6675_s16  ;;  %p6680_p4 = scmp.lt.s32.totalorder %s120_s29, %s120_s29 }
  0x68   :  { %p6681_p5 = scmp.lt.s32.totalorder %s6679_s4, %s6675_s16 }
  0x6a   :  { %p6682_p6 = por %p6681_p5, %p6680_p4 }
  0x6c   :  { %p6683_p7 = pnand %p6682_p6, %p6676_p3 }
  0x6e   :  { %6686 = shalt.err (!%p6683_p7)
}
  0x6f   :  { %122 = dma.hbm_to_vmem [thread:$0]  %s7290_s8, 16, %s120_s29, [#allocation15]  }
  0x70   :  { %s6757_s7 = smov [#allocation19]  }
  0x71   :  { %s139_s18 = sshll.u32 %s6757_s7, 4  ;;  %s140_s18 = int_to_ptr.vmem [resolvable:$true] %s139_s18 }
  0x72   :  { %s6695_s19 = scalar_lea.vmem %s140_s18, 64  ;;  %p6700_p9 = scmp.lt.s32.totalorder %s140_s18, %s140_s18 }
  0x73   :  { %p6696_p8 = scmp.ne.s32.totalorder %s140_s18, %s6695_s19  ;;  %p6701_p10 = scmp.lt.s32.totalorder %s6695_s19, %s6695_s19 }
  0x75   :  { %p6702_p11 = por %p6701_p10, %p6700_p9 }
  0x77   :  { %p6703_p12 = pnand %p6702_p11, %p6696_p8 }
  0x79   :  { %6706 = shalt.err (!%p6703_p12)
}
  0x7a   :  { %142 = dma.hbm_to_vmem [thread:$0]  %s7292_s10, 64, %s140_s18, [#allocation18]  }
  0x7b   :  { %6727 = dma.done.wait [#allocation3], 64  }
  0x7c   :  { %6728 = vsyncadd [#allocation3], 4294967232 }
  0x7d   :  { %6729 = dma.done.wait [#allocation6], 512  }
  0x7e   :  { %6730 = vsyncadd [#allocation6], 4294966784 }
  0x7f   :  { %6731 = dma.done.wait [#allocation9], 32896  }
  0x80   :  { %6732 = vsyncadd [#allocation9], 4294934400 }
  0x81   :  { %6733 = dma.done.wait [#allocation12], 32832  }
  0x82   :  { %6734 = vsyncadd [#allocation12], 4294934464 }
  0x83   :  { %6735 = dma.done.wait [#allocation15], 4112  }
  0x84   :  { %6736 = vsyncadd [#allocation15], 4294963184 }
  0x85   :  { %6737 = dma.done.wait [#allocation18], 128  }
  0x86   :  { %6738 = vsyncadd [#allocation18], 4294967168  ;;  %v6758_v0 = vmov 0   ;;  %v6759_v1 = vmov 0.0   ;;  %vm208_vm0 = vcmask 1042432   ;;  %v196_v8 = vld [vmem:[#allocation5] sm:$0xff]  ;;  %v188_v23 = vlaneseq }
  0x87   :  { %6032 = vset.pattern.permute.xlu0 %v6758_v0  ;;  %281 = vmatprep.mubr.f32.mxu0 %v6759_v1  ;;  %v185_v2 = vld [vmem:[#allocation2] sm:$0xf]  ;;  %v198_v3 = vld [vmem:[#allocation7] sm:$0x77]  ;;  %vm373_vm1 = vcmask 1043456   ;;  %v197_v9 = vld [vmem:[#allocation5 + $0x8] sm:$0xff]  ;;  %v5413_v10 = vcombine.low %v196_v8, %v196_v8  ;;  %v5414_v11 = vcombine.high %v196_v8, %v196_v8 }
  0x88   :  { %352 = vmatprep.mubr.f32.mxu1 %v6759_v1  ;;  %v199_v4 = vld [vmem:[#allocation7 + $0x8] sm:$0x77]  ;;  %v186_v5 = vunpack.c.l.bf16 %v185_v2  ;;  %v202_v6 = vcombine.high %v198_v3, %v198_v3  ;;  %v5415_v12 = vcombine.low %v197_v9, %v197_v9  ;;  %v6760_v14 = vmov 65535   ;;  %v723_v27 = vld [vmem:[#allocation8 + $0x1c0] sm:$0xff] }
  0x89   :  { %v203_v7 = vcombine.high %v199_v4, %v199_v4  ;;  %v374_v15 = vsel %vm208_vm0, 4294967295, %v6760_v14  ;;  %v5416_v16 = vcombine.high %v197_v9, %v197_v9  ;;  %v189_v24 = vand.u32 127, %v188_v23  ;;  %v727_v28 = vld [vmem:[#allocation8 + $0x1e0] sm:$0xff] }
  0x8a   :  { %v6008_v13 = vtrunc.f32 %v186_v5  ;;  %5407 = vmatprep.subr.msk.mxu0 %vm208_vm0, %v202_v6  ;;  %v375_v17 = vsel %vm373_vm1, %v374_v15, 0  ;;  %vm204_vm2 = vcmask 23552   ;;  %vm369_vm4 = vcmask 56320   ;;  %v851_v29 = vld [vmem:[#allocation8 + $0x5c0] sm:$0xff] }
  0x8b   :  { %5410 = vmatprep.subr.msk.mxu1 %vm208_vm0, %v203_v7  ;;  %5408 = vmatpush1.msk.msra.mxu0 %vm208_vm0, %v198_v3  ;;  %v380_v19 = vand.u32 %v5414_v11, %v375_v17  ;;  %v386_v20 = vand.u32 %v5416_v16, %v375_v17  ;;  %v377_v21 = vand.u32 %v5413_v10, %v375_v17  ;;  %v855_v31 = vld [vmem:[#allocation8 + $0x5e0] sm:$0xff] }
  0x8c   :  { %5411 = vmatpush1.msk.msra.mxu1 %vm208_vm0, %v199_v4  ;;  %v6009_v18 = vcvt.f32.s32 %v6008_v13  ;;  %v383_v22 = vand.u32 %v5415_v12, %v375_v17  ;;  %v5476_v30 = vcombine.high %v723_v27, %v727_v28  ;;  %v5475_v32 = vcombine.low %v723_v27, %v727_v28  ;;  %v715_v35 = vld [vmem:[#allocation8 + $0x180] sm:$0xff] }
  0x8d   :  { %402 = vmatprep.subr.bf16.mxu0 %v380_v19  ;;  %443 = vmatprep.subr.bf16.mxu1 %v386_v20  ;;  %v5603_v33 = vcombine.low %v851_v29, %v855_v31  ;;  %v5604_v34 = vcombine.high %v851_v29, %v855_v31  ;;  %v719_v36 = vld [vmem:[#allocation8 + $0x1a0] sm:$0xff] }
  0x8e   :  { %191 = vperm.xlu0 %6032, %v6009_v18   ;;  %v843_v37 = vld [vmem:[#allocation8 + $0x580] sm:$0xff]  ;;  %v5468_v38 = vcombine.high %v715_v35, %v719_v36  ;;  %v5467_v40 = vcombine.low %v715_v35, %v719_v36 }
  0x8f   :  { %v847_v39 = vld [vmem:[#allocation8 + $0x5a0] sm:$0xff] }
  0x90   :  { %v5595_v41 = vcombine.low %v843_v37, %v847_v39  ;;  %v5596_v42 = vcombine.high %v843_v37, %v847_v39  ;;  %v707_v43 = vld [vmem:[#allocation8 + $0x140] sm:$0xff] }
  0x91   :  { %v711_v44 = vld [vmem:[#allocation8 + $0x160] sm:$0xff] }
  0x92   :  { %v835_v45 = vld [vmem:[#allocation8 + $0x540] sm:$0xff]  ;;  %v5460_v46 = vcombine.high %v707_v43, %v711_v44  ;;  %v5459_v48 = vcombine.low %v707_v43, %v711_v44 }
  0x93   :  { %v839_v47 = vld [vmem:[#allocation8 + $0x560] sm:$0xff] }
  0x94   :  { %v5587_v49 = vcombine.low %v835_v45, %v839_v47  ;;  %v5588_v50 = vcombine.high %v835_v45, %v839_v47  ;;  %v699_v51 = vld [vmem:[#allocation8 + $0x100] sm:$0xff] }
  0x95   :  { %v703_v52 = vld [vmem:[#allocation8 + $0x120] sm:$0xff] }
  0x96   :  { %v827_v53 = vld [vmem:[#allocation8 + $0x500] sm:$0xff]  ;;  %v5452_v54 = vcombine.high %v699_v51, %v703_v52  ;;  %v5451_v56 = vcombine.low %v699_v51, %v703_v52 }
  0x97   :  { %v831_v55 = vld [vmem:[#allocation8 + $0x520] sm:$0xff] }
  0x98   :  { %v5579_v57 = vcombine.low %v827_v53, %v831_v55  ;;  %v5580_v58 = vcombine.high %v827_v53, %v831_v55  ;;  %v691_v59 = vld [vmem:[#allocation8 + $0xc0] sm:$0xff] }
  0x99   :  { %v695_v60 = vld [vmem:[#allocation8 + $0xe0] sm:$0xff] }
  0x9a   :  { %v819_v61 = vld [vmem:[#allocation8 + $0x4c0] sm:$0xff]  ;;  %v5444_v62 = vcombine.high %v691_v59, %v695_v60 }
  0x9b   :  { %v823_v63 = vld [vmem:[#allocation8 + $0x4e0] sm:$0xff] }
  0x9c   :  { %v683_v3 = vld [vmem:[#allocation8 + $0x80] sm:$0xff] }
  0x9d   :  { %v687_v4 = vld [vmem:[#allocation8 + $0xa0] sm:$0xff] }
  0x9e   :  { %v811_v5 = vld [vmem:[#allocation8 + $0x480] sm:$0xff]  ;;  %v5436_v6 = vcombine.high %v683_v3, %v687_v4  ;;  %v5435_v8 = vcombine.low %v683_v3, %v687_v4 }
  0x9f   :  { %v815_v7 = vld [vmem:[#allocation8 + $0x4a0] sm:$0xff] }
  0xa0   :  { %v5563_v9 = vcombine.low %v811_v5, %v815_v7  ;;  %v5564_v10 = vcombine.high %v811_v5, %v815_v7  ;;  %v675_v11 = vld [vmem:[#allocation8 + $0x40] sm:$0xff] }
  0xa1   :  { %v679_v12 = vld [vmem:[#allocation8 + $0x60] sm:$0xff] }
  0xa2   :  { %v803_v13 = vld [vmem:[#allocation8 + $0x440] sm:$0xff]  ;;  %v5428_v14 = vcombine.high %v675_v11, %v679_v12  ;;  %v5427_v16 = vcombine.low %v675_v11, %v679_v12 }
  0xa3   :  { %v807_v15 = vld [vmem:[#allocation8 + $0x460] sm:$0xff] }
  0xa4   :  { %v5555_v17 = vcombine.low %v803_v13, %v807_v15  ;;  %v5556_v18 = vcombine.high %v803_v13, %v807_v15  ;;  %v667_v19 = vld [vmem:[#allocation8] sm:$0xff] }
  0xa5   :  { %v671_v20 = vld [vmem:[#allocation8 + $0x20] sm:$0xff] }
  0xa6   :  { %v787_v28 = vld [vmem:[#allocation8 + $0x3c0] sm:$0xff] }
  0xa7   :  { %v791_v29 = vld [vmem:[#allocation8 + $0x3e0] sm:$0xff] }
  0xa8   :  { %v5540_v31 = vcombine.high %v787_v28, %v791_v29  ;;  %v779_v36 = vld [vmem:[#allocation8 + $0x380] sm:$0xff] }
  0xa9   :  { %v783_v37 = vld [vmem:[#allocation8 + $0x3a0] sm:$0xff] }
  0xaa   :  { %v5532_v39 = vcombine.high %v779_v36, %v783_v37  ;;  %v771_v44 = vld [vmem:[#allocation8 + $0x340] sm:$0xff] }
  0xab   :  { %v775_v45 = vld [vmem:[#allocation8 + $0x360] sm:$0xff] }
  0xac   :  { %v5524_v47 = vcombine.high %v771_v44, %v775_v45  ;;  %v763_v52 = vld [vmem:[#allocation8 + $0x300] sm:$0xff] }
  0xad   :  { %v767_v53 = vld [vmem:[#allocation8 + $0x320] sm:$0xff] }
  0xae   :  { %v5516_v55 = vcombine.high %v763_v52, %v767_v53  ;;  %v747_v4 = vld [vmem:[#allocation8 + $0x280] sm:$0xff] }
  0xaf   :  { %v751_v5 = vld [vmem:[#allocation8 + $0x2a0] sm:$0xff] }
  0xb0   :  { %v5499_v7 = vcombine.low %v747_v4, %v751_v5  ;;  %v743_v11 = vld [vmem:[#allocation8 + $0x260] sm:$0xff] }
  0xb1   :  { %v867_v15 = vld [vmem:[#allocation8 + $0x640] sm:$0xff] }
 0x109   :  { %v192_v25 = vpop.permute.xlu0 %191 }
 0x10a   :  { %vm193_vm3 = vcmp.eq.s32.totalorder %v192_v25, %v189_v24  ;;  %v799_v24 = vld [vmem:[#allocation8 + $0x420] sm:$0xff]  ;;  %v5419_v25 = vcombine.low %v667_v19, %v671_v20 }
 0x10b   :  { %v5406_v26 = vsel %vm193_vm3, 1.0, %v6759_v1  ;;  %v5571_v1 = vcombine.low %v819_v61, %v823_v63 }
 0x10c   :  { %5409 = vmatmul.mubr.msk.f32.vlgmr.msra.gmra.mxu0 %vm204_vm2, %v5406_v26  ;;  %5412 = vmatmul.mubr.msk.f32.vlgmr.msra.gmra.mxu1 %vm204_vm2, %v5406_v26 }
 0x10d   :  { %403 = vmatpush1.bf16.msra.mxu0 %v377_v21  ;;  %444 = vmatpush1.bf16.msra.mxu1 %v383_v22  ;;  %v795_v21 = vld [vmem:[#allocation8 + $0x400] sm:$0xff]  ;;  %v5420_v22 = vcombine.high %v667_v19, %v671_v20 }
 0x10e   :  { %420 = vmatprep.mubr.bf16.mxu0 %v6758_v0  ;;  %461 = vmatprep.mubr.bf16.mxu1 %v6758_v0  ;;  %v5443_v0 = vcombine.low %v691_v59, %v695_v60  ;;  %v5547_v26 = vcombine.low %v795_v21, %v799_v24  ;;  %v5548_v27 = vcombine.high %v795_v21, %v799_v24  ;;  %v755_v60 = vld [vmem:[#allocation8 + $0x2c0] sm:$0xff] }
 0x10f   :  { %2245 = vmatprep.subr.bf16.mxu0 %v5476_v30  ;;  %2286 = vmatprep.subr.bf16.mxu1 %v5604_v34  ;;  %v915_v30 = vld [vmem:[#allocation8 + $0x7c0] sm:$0xff] }
 0x110   :  { %5417 = vmatmul.mubr.msk.bf16.vlgmr.msra.gmra.mxu0 %vm369_vm4, %v185_v2  ;;  %5418 = vmatmul.mubr.msk.bf16.vlgmr.msra.gmra.mxu1 %vm369_vm4, %v185_v2  ;;  %v5572_v2 = vcombine.high %v819_v61, %v823_v63  ;;  %v759_v61 = vld [vmem:[#allocation8 + $0x2e0] sm:$0xff] }
 0x111   :  { %2246 = vmatpush1.bf16.msra.mxu0 %v5475_v32  ;;  %2287 = vmatpush1.bf16.msra.mxu1 %v5603_v33  ;;  %v919_v32 = vld [vmem:[#allocation8 + $0x7e0] sm:$0xff]  ;;  %v5539_v33 = vcombine.low %v787_v28, %v791_v29  ;;  %v5508_v63 = vcombine.high %v755_v60, %v759_v61  ;;  %v6882_v29 = vld [vmem:[#allocation8 + $0x1c8] sm:$0xff] }
 0x112   :  { %2247 = vmatprep.subr.bf16.mxu0 %v5468_v38  ;;  %2288 = vmatprep.subr.bf16.mxu1 %v5596_v42  ;;  %v5667_v34 = vcombine.low %v915_v30, %v919_v32  ;;  %v5668_v35 = vcombine.high %v915_v30, %v919_v32  ;;  %v907_v38 = vld [vmem:[#allocation8 + $0x780] sm:$0xff]  ;;  %v6884_v30 = vld [vmem:[#allocation8 + $0x1e8] sm:$0xff] }
 0x113   :  { %v735_v19 = vld [vmem:[#allocation8 + $0x220] sm:$0xff]  ;;  %v5478_v32 = vcombine.high %v6882_v29, %v6884_v30 }
 0x114   :  { %v859_v20 = vld [vmem:[#allocation8 + $0x600] sm:$0xff] }
 0x115   :  { %2248 = vmatpush1.bf16.msra.mxu0 %v5467_v40  ;;  %2289 = vmatpush1.bf16.msra.mxu1 %v5595_v41  ;;  %v911_v40 = vld [vmem:[#allocation8 + $0x7a0] sm:$0xff]  ;;  %v5531_v41 = vcombine.low %v779_v36, %v783_v37 }
 0x116   :  { %2249 = vmatprep.subr.bf16.mxu0 %v5460_v46  ;;  %2290 = vmatprep.subr.bf16.mxu1 %v5588_v50  ;;  %v5659_v42 = vcombine.low %v907_v38, %v911_v40  ;;  %v5660_v43 = vcombine.high %v907_v38, %v911_v40  ;;  %v899_v46 = vld [vmem:[#allocation8 + $0x740] sm:$0xff] }
 0x117   :  { %v863_v21 = vld [vmem:[#allocation8 + $0x620] sm:$0xff] }
 0x118   :  { %v5611_v28 = vcombine.low %v859_v20, %v863_v21 }
 0x119   :  { %2250 = vmatpush1.bf16.msra.mxu0 %v5459_v48  ;;  %2291 = vmatpush1.bf16.msra.mxu1 %v5587_v49  ;;  %v903_v48 = vld [vmem:[#allocation8 + $0x760] sm:$0xff]  ;;  %v5523_v49 = vcombine.low %v771_v44, %v775_v45 }
 0x11a   :  { %2251 = vmatprep.subr.bf16.mxu0 %v5452_v54  ;;  %2292 = vmatprep.subr.bf16.mxu1 %v5580_v58  ;;  %v5651_v50 = vcombine.low %v899_v46, %v903_v48  ;;  %v5652_v51 = vcombine.high %v899_v46, %v903_v48  ;;  %v891_v54 = vld [vmem:[#allocation8 + $0x700] sm:$0xff] }
 0x11d   :  { %2252 = vmatpush1.bf16.msra.mxu0 %v5451_v56  ;;  %2293 = vmatpush1.bf16.msra.mxu1 %v5579_v57  ;;  %v895_v56 = vld [vmem:[#allocation8 + $0x720] sm:$0xff]  ;;  %v5515_v57 = vcombine.low %v763_v52, %v767_v53 }
 0x11e   :  { %2253 = vmatprep.subr.bf16.mxu0 %v5444_v62  ;;  %2294 = vmatprep.subr.bf16.mxu1 %v5572_v2  ;;  %v5643_v58 = vcombine.low %v891_v54, %v895_v56  ;;  %v5644_v59 = vcombine.high %v891_v54, %v895_v56  ;;  %v883_v62 = vld [vmem:[#allocation8 + $0x6c0] sm:$0xff] }
 0x121   :  { %2254 = vmatpush1.bf16.msra.mxu0 %v5443_v0  ;;  %2295 = vmatpush1.bf16.msra.mxu1 %v5571_v1  ;;  %v887_v0 = vld [vmem:[#allocation8 + $0x6e0] sm:$0xff]  ;;  %v5507_v1 = vcombine.low %v755_v60, %v759_v61 }
 0x122   :  { %2255 = vmatprep.subr.bf16.mxu0 %v5436_v6  ;;  %2296 = vmatprep.subr.bf16.mxu1 %v5564_v10  ;;  %v5635_v2 = vcombine.low %v883_v62, %v887_v0  ;;  %v5636_v3 = vcombine.high %v883_v62, %v887_v0  ;;  %v875_v6 = vld [vmem:[#allocation8 + $0x680] sm:$0xff] }
 0x123   :  { %v739_v10 = vld [vmem:[#allocation8 + $0x240] sm:$0xff] }
 0x125   :  { %2256 = vmatpush1.bf16.msra.mxu0 %v5435_v8  ;;  %2297 = vmatpush1.bf16.msra.mxu1 %v5563_v9  ;;  %v5500_v8 = vcombine.high %v747_v4, %v751_v5  ;;  %v879_v9 = vld [vmem:[#allocation8 + $0x6a0] sm:$0xff] }
 0x126   :  { %2257 = vmatprep.subr.bf16.mxu0 %v5428_v14  ;;  %2298 = vmatprep.subr.bf16.mxu1 %v5556_v18  ;;  %v5627_v12 = vcombine.low %v875_v6, %v879_v9  ;;  %v5628_v13 = vcombine.high %v875_v6, %v879_v9  ;;  %v5492_v14 = vcombine.high %v739_v10, %v743_v11 }
 0x129   :  { %2258 = vmatpush1.bf16.msra.mxu0 %v5427_v16  ;;  %2299 = vmatpush1.bf16.msra.mxu1 %v5555_v17  ;;  %v871_v16 = vld [vmem:[#allocation8 + $0x660] sm:$0xff] }
 0x12a   :  { %2259 = vmatprep.subr.bf16.mxu0 %v5420_v22  ;;  %2300 = vmatprep.subr.bf16.mxu1 %v5548_v27  ;;  %v731_v17 = vld [vmem:[#allocation8 + $0x200] sm:$0xff]  ;;  %v5620_v18 = vcombine.high %v867_v15, %v871_v16  ;;  %v5491_v22 = vcombine.low %v739_v10, %v743_v11  ;;  %v5619_v24 = vcombine.low %v867_v15, %v871_v16 }
 0x12b   :  { %v5483_v27 = vcombine.low %v731_v17, %v735_v19 }
 0x12d   :  { %2260 = vmatpush1.bf16.msra.mxu0 %v5419_v25  ;;  %2301 = vmatpush1.bf16.msra.mxu1 %v5547_v26  ;;  %v5484_v25 = vcombine.high %v731_v17, %v735_v19  ;;  %v5612_v26 = vcombine.high %v859_v20, %v863_v21 }
 0x12e   :  { %2261 = vmatprep.subr.bf16.mxu0 %v5540_v31  ;;  %2302 = vmatprep.subr.bf16.mxu1 %v5668_v35  ;;  %v6886_v31 = vld [vmem:[#allocation8 + $0x5c8] sm:$0xff] }
 0x131   :  { %2262 = vmatpush2.bf16.msra.mxu0 %v5539_v33  ;;  %2303 = vmatpush2.bf16.msra.mxu1 %v5667_v34  ;;  %v6890_v33 = vld [vmem:[#allocation8 + $0x5e8] sm:$0xff]  ;;  %v5477_v34 = vcombine.low %v6882_v29, %v6884_v30 }
 0x132   :  { %2263 = vmatprep.subr.bf16.mxu0 %v5532_v39  ;;  %2304 = vmatprep.subr.bf16.mxu1 %v5660_v43  ;;  %v5605_v35 = vcombine.low %v6886_v31, %v6890_v33  ;;  %v5606_v36 = vcombine.high %v6886_v31, %v6890_v33 }
 0x135   :  { %2264 = vmatpush2.bf16.msra.mxu0 %v5531_v41  ;;  %2305 = vmatpush2.bf16.msra.mxu1 %v5659_v42 }
 0x136   :  { %2265 = vmatprep.subr.bf16.mxu0 %v5524_v47  ;;  %2306 = vmatprep.subr.bf16.mxu1 %v5652_v51 }
 0x139   :  { %2266 = vmatpush2.bf16.msra.mxu0 %v5523_v49  ;;  %2307 = vmatpush2.bf16.msra.mxu1 %v5651_v50 }
 0x13a   :  { %2267 = vmatprep.subr.bf16.mxu0 %v5516_v55  ;;  %2308 = vmatprep.subr.bf16.mxu1 %v5644_v59 }
 0x13d   :  { %2268 = vmatpush2.bf16.msra.mxu0 %v5515_v57  ;;  %2309 = vmatpush2.bf16.msra.mxu1 %v5643_v58 }
 0x13e   :  { %2269 = vmatprep.subr.bf16.mxu0 %v5508_v63  ;;  %2310 = vmatprep.subr.bf16.mxu1 %v5636_v3 }
 0x141   :  { %2270 = vmatpush2.bf16.msra.mxu0 %v5507_v1  ;;  %2311 = vmatpush2.bf16.msra.mxu1 %v5635_v2 }
 0x142   :  { %2271 = vmatprep.subr.bf16.mxu0 %v5500_v8  ;;  %2312 = vmatprep.subr.bf16.mxu1 %v5628_v13 }
 0x145   :  { %2272 = vmatpush2.bf16.msra.mxu0 %v5499_v7  ;;  %2313 = vmatpush2.bf16.msra.mxu1 %v5627_v12 }
 0x146   :  { %2273 = vmatprep.subr.bf16.mxu0 %v5492_v14  ;;  %2314 = vmatprep.subr.bf16.mxu1 %v5620_v18 }
 0x149   :  { %2274 = vmatpush2.bf16.msra.mxu0 %v5491_v22  ;;  %2315 = vmatpush2.bf16.msra.mxu1 %v5619_v24 }
 0x14a   :  { %2275 = vmatprep.subr.bf16.mxu0 %v5484_v25  ;;  %2316 = vmatprep.subr.bf16.mxu1 %v5612_v26 }
 0x14d   :  { %2276 = vmatpush2.bf16.msra.mxu0 %v5483_v27  ;;  %2317 = vmatpush2.bf16.msra.mxu1 %v5611_v28 }
 0x14e   :  { %2327 = vmatprep.subr.bf16.mxu0 %v5478_v32  ;;  %2368 = vmatprep.subr.bf16.mxu1 %v5606_v36 }
 0x1cc   :  { %v283_v37 = vpop.f32.mrf.mxu0  ;;  %v354_v38 = vpop.f32.mrf.mxu1 }
 0x1ce   :  { %v285_v39 = vpop.f32.mrf.mxu0  ;;  %v356_v40 = vpop.f32.mrf.mxu1 }
 0x1d0   :  { %v422_v41 = vpop.f32.mrf.mxu0  ;;  %v463_v42 = vpop.f32.mrf.mxu1 }
 0x1d1   :  { %v423_v43 = vadd.f32 %v422_v41, %v283_v37  ;;  %v464_v44 = vadd.f32 %v463_v42, %v354_v38 }
 0x1d2   :  { %v424_v45 = vpop.f32.mrf.mxu0  ;;  %v465_v46 = vpop.f32.mrf.mxu1 }
 0x1d3   :  { %v6898_v47 = vmax.f32 %v423_v43, 0.0  ;;  %v6900_v48 = vmax.f32 %v464_v44, 0.0  ;;  %v425_v49 = vadd.f32 %v424_v45, %v285_v39  ;;  %v466_v50 = vadd.f32 %v465_v46, %v356_v40 }
 0x1d4   :  { %v426_v51 = vpop.f32.mrf.mxu0  ;;  %v467_v52 = vpop.f32.mrf.mxu1 }
 0x1d5   :  { %v476_v53 = vrot.slane %v6898_v47, 4  ;;  %v488_v54 = vrot.slane %v6900_v48, 4  ;;  %v6904_v55 = vmax.f32 %v425_v49, 0.0  ;;  %v6906_v56 = vmax.f32 %v466_v50, 0.0 }
 0x1d6   :  { %v427_v57 = vpop.f32.mrf.mxu0  ;;  %v468_v58 = vpop.f32.mrf.mxu1 }
 0x1d7   :  { %v477_v59 = vadd.f32 %v476_v53, %v6898_v47  ;;  %v489_v60 = vadd.f32 %v488_v54, %v6900_v48  ;;  %v482_v61 = vrot.slane %v6904_v55, 4  ;;  %v494_v62 = vrot.slane %v6906_v56, 4 }
 0x1d9   :  { %v478_v63 = vrot.slane %v477_v59, 2  ;;  %v490_v0 = vrot.slane %v489_v60, 2  ;;  %v483_v1 = vadd.f32 %v482_v61, %v6904_v55  ;;  %v495_v2 = vadd.f32 %v494_v62, %v6906_v56 }
 0x1db   :  { %v479_v3 = vadd.f32 %v478_v63, %v477_v59  ;;  %v491_v4 = vadd.f32 %v490_v0, %v489_v60  ;;  %v484_v5 = vrot.slane %v483_v1, 2  ;;  %v496_v6 = vrot.slane %v495_v2, 2 }
 0x1dd   :  { %v480_v7 = vrot.slane %v479_v3, 1  ;;  %v492_v8 = vrot.slane %v491_v4, 1  ;;  %v485_v9 = vadd.f32 %v484_v5, %v483_v1  ;;  %v497_v10 = vadd.f32 %v496_v6, %v495_v2 }
 0x1df   :  { %v481_v11 = vadd.f32 %v480_v7, %v479_v3  ;;  %v493_v12 = vadd.f32 %v492_v8, %v491_v4  ;;  %v486_v13 = vrot.slane %v485_v9, 1  ;;  %v498_v14 = vrot.slane %v497_v10, 1 }
 0x1e0   :  { %v6761_v8 = vmov 1966171168  }
 0x1e1   :  { %v6914_v15 = vmul.f32 0.125, %v481_v11  ;;  %v6916_v16 = vmul.f32 0.125, %v493_v12  ;;  %v487_v17 = vadd.f32 %v486_v13, %v485_v9  ;;  %v499_v18 = vadd.f32 %v498_v14, %v497_v10 }
 0x1e2   :  { %v556_v9 = vunpack.c.l.s4 %v6761_v8  ;;  %v6931_v11 = vshrl.u32 %v188_v23, 7 }
 0x1e3   :  { %v505_v19 = vsub.f32 %v6898_v47, %v6914_v15  ;;  %v507_v20 = vsub.f32 %v6900_v48, %v6916_v16  ;;  %v6922_v21 = vmul.f32 0.125, %v487_v17  ;;  %v6924_v22 = vmul.f32 0.125, %v499_v18 }
 0x1e4   :  { %v557_v10 = vunpack.c.0.s8 %v556_v9  ;;  %v6942_v23 = vsub.s32 2, %v6931_v11 }
 0x1e5   :  { %v509_v24 = vmul.f32 %v505_v19, %v505_v19  ;;  %v511_v25 = vmul.f32 %v507_v20, %v507_v20  ;;  %v506_v26 = vsub.f32 %v6904_v55, %v6922_v21  ;;  %v508_v27 = vsub.f32 %v6906_v56, %v6924_v22 }
 0x1e6   :  { %v6934_v14 = vsub.s32 %v557_v10, %v6931_v11  ;;  %v712_v10 = vld [vmem:[#allocation8 + $0x168] sm:$0xff] }
 0x1e7   :  { %v513_v28 = vrot.slane %v509_v24, 4  ;;  %v525_v32 = vrot.slane %v511_v25, 4  ;;  %v510_v36 = vmul.f32 %v506_v26, %v506_v26  ;;  %v512_v37 = vmul.f32 %v508_v27, %v508_v27 }
 0x1e8   :  { %v6939_v27 = vsub.s32 0, %v6931_v11 }
 0x1e9   :  { %v514_v38 = vadd.f32 %v513_v28, %v509_v24  ;;  %v526_v39 = vadd.f32 %v525_v32, %v511_v25  ;;  %v519_v40 = vrot.slane %v510_v36, 4  ;;  %v531_v41 = vrot.slane %v512_v37, 4  ;;  %v474_v28 = vld [vmem:[#allocation17] sm:$0xf] }
 0x1eb   :  { %v515_v42 = vrot.slane %v514_v38, 2  ;;  %v527_v43 = vrot.slane %v526_v39, 2  ;;  %v520_v44 = vadd.f32 %v519_v40, %v510_v36  ;;  %v532_v45 = vadd.f32 %v531_v41, %v512_v37 }
 0x1ec   :  { %v6946_v36 = vsub.s32 3, %v6931_v11  ;;  %v6949_v37 = vsub.s32 1, %v6931_v11 }
 0x1ed   :  { %v516_v46 = vadd.f32 %v515_v42, %v514_v38  ;;  %v528_v49 = vadd.f32 %v527_v43, %v526_v39  ;;  %v521_v50 = vrot.slane %v520_v44, 2  ;;  %v533_v51 = vrot.slane %v532_v45, 2 }
 0x1ef   :  { %v517_v52 = vrot.slane %v516_v46, 1  ;;  %v529_v53 = vrot.slane %v528_v49, 1  ;;  %v522_v54 = vadd.f32 %v521_v50, %v520_v44  ;;  %v534_v57 = vadd.f32 %v533_v51, %v532_v45 }
 0x1f1   :  { %v518_v58 = vadd.f32 %v517_v52, %v516_v46  ;;  %v530_v59 = vadd.f32 %v529_v53, %v528_v49  ;;  %v523_v60 = vrot.slane %v522_v54, 1  ;;  %v535_v61 = vrot.slane %v534_v57, 1 }
 0x1f3   :  { %v537_v62 = vmul.f32 0.125, %v518_v58  ;;  %v539_v63 = vmul.f32 0.125, %v530_v59  ;;  %v524_v0 = vadd.f32 %v523_v60, %v522_v54  ;;  %v536_v1 = vadd.f32 %v535_v61, %v534_v57  ;;  %v475_v54 = vld [vmem:[#allocation19] sm:$0xf] }
 0x1f5   :  { %v541_v2 = vadd.f32 1e-05, %v537_v62  ;;  %v543_v3 = vadd.f32 1e-05, %v539_v63  ;;  %v538_v4 = vmul.f32 0.125, %v524_v0  ;;  %v540_v5 = vmul.f32 0.125, %v536_v1 }
 0x1f7   :  { %6455 = vrsqrt.f32 %v541_v2  ;;  %v542_v6 = vadd.f32 1e-05, %v538_v4  ;;  %v544_v7 = vadd.f32 1e-05, %v540_v5  ;;  %v844_v4 = vld [vmem:[#allocation8 + $0x588] sm:$0xff] }
 0x1f8   :  { %6457 = vrsqrt.f32 %v543_v3  ;;  %v716_v3 = vld [vmem:[#allocation8 + $0x188] sm:$0xff] }
 0x1f9   :  { %6459 = vrsqrt.f32 %v542_v6 }
 0x1fa   :  { %6461 = vrsqrt.f32 %v544_v7  ;;  %v708_v7 = vld [vmem:[#allocation8 + $0x148] sm:$0xff] }
 0x1fb   :  { %v5461_v29 = vcombine.low %v708_v7, %v712_v10 }
 0x204   :  { %v6456_v12 = vpop.eup %6455 }
 0x205   :  { %v6458_v13 = vpop.eup %6457 }
 0x206   :  { %v6460_v17 = vpop.eup %6459 }
 0x207   :  { %v6462_v18 = vpop.eup %6461  ;;  %v553_v19 = vcombine.low %v6456_v12, %v6460_v17  ;;  %v836_v12 = vld [vmem:[#allocation8 + $0x548] sm:$0xff] }
 0x208   :  { %v554_v20 = vcombine.low %v6458_v13, %v6462_v18  ;;  %v840_v13 = vld [vmem:[#allocation8 + $0x568] sm:$0xff] }
 0x209   :  { %v561_v24 = vrot.slane %v553_v19, %v6934_v14  ;;  %v5462_v19 = vcombine.high %v708_v7, %v712_v10  ;;  %v5589_v30 = vcombine.low %v836_v12, %v840_v13 }
 0x20a   :  { %v568_v25 = vrot.slane %v554_v20, %v6934_v14  ;;  %v5590_v20 = vcombine.high %v836_v12, %v840_v13  ;;  %v780_v12 = vld [vmem:[#allocation8 + $0x388] sm:$0xff] }
 0x20b   :  { %v784_v13 = vld [vmem:[#allocation8 + $0x3a8] sm:$0xff] }
 0x20c   :  { %v569_v26 = vcombine.low %v561_v24, %v568_v25  ;;  %v700_v24 = vld [vmem:[#allocation8 + $0x108] sm:$0xff] }
 0x20d   :  { %v704_v25 = vld [vmem:[#allocation8 + $0x128] sm:$0xff] }
 0x20e   :  { %v576_v32 = vrot.slane %v569_v26, %v6934_v14  ;;  %v828_v26 = vld [vmem:[#allocation8 + $0x508] sm:$0xff]  ;;  %v5454_v31 = vcombine.high %v700_v24, %v704_v25 }
 0x210   :  { %v578_v38 = vmul.f32 %v576_v32, %v474_v28  ;;  %v832_v28 = vld [vmem:[#allocation8 + $0x528] sm:$0xff] }
 0x211   :  { %v5582_v33 = vcombine.high %v828_v26, %v832_v28  ;;  %v820_v32 = vld [vmem:[#allocation8 + $0x4c8] sm:$0xff] }
 0x212   :  { %v591_v39 = vrot.slane %v578_v38, %v6942_v23  ;;  %v595_v40 = vrot.slane %v578_v38, %v6946_v36  ;;  %v583_v41 = vrot.slane %v578_v38, %v6939_v27  ;;  %v587_v42 = vrot.slane %v578_v38, %v6949_v37  ;;  %v824_v38 = vld [vmem:[#allocation8 + $0x4e8] sm:$0xff] }
 0x214   :  { %v602_v43 = vmul.f32 %v591_v39, %v6916_v16  ;;  %v603_v44 = vmul.f32 %v595_v40, %v6924_v22  ;;  %v600_v45 = vmul.f32 %v583_v41, %v6914_v15  ;;  %v601_v46 = vmul.f32 %v587_v42, %v6922_v21 }
 0x215   :  { %v637_v59 = vmul.f32 %v595_v40, %v6906_v56  ;;  %v635_v16 = vmul.f32 %v587_v42, %v6904_v55  ;;  %v634_v22 = vmul.f32 %v583_v41, %v6898_v47  ;;  %v636_v15 = vmul.f32 %v591_v39, %v6900_v48  ;;  %v720_v56 = vld [vmem:[#allocation8 + $0x1a8] sm:$0xff] }
 0x216   :  { %v609_v49 = vcombine.low %v602_v43, %v603_v44  ;;  %v608_v50 = vcombine.low %v600_v45, %v601_v46  ;;  %v848_v55 = vld [vmem:[#allocation8 + $0x5a8] sm:$0xff]  ;;  %v5470_v8 = vcombine.high %v716_v3, %v720_v56  ;;  %v5469_v17 = vcombine.low %v716_v3, %v720_v56 }
 0x217   :  { %v5598_v9 = vcombine.high %v844_v4, %v848_v55  ;;  %v5597_v18 = vcombine.low %v844_v4, %v848_v55  ;;  %v5453_v39 = vcombine.low %v700_v24, %v704_v25  ;;  %v5581_v40 = vcombine.low %v828_v26, %v832_v28  ;;  %v684_v43 = vld [vmem:[#allocation8 + $0x88] sm:$0xff] }
 0x218   :  { %v623_v51 = vrot.slane %v609_v49, %v6934_v14  ;;  %v616_v52 = vrot.slane %v608_v50, %v6934_v14  ;;  %v5574_v42 = vcombine.high %v820_v32, %v824_v38  ;;  %v688_v44 = vld [vmem:[#allocation8 + $0xa8] sm:$0xff]  ;;  %v5573_v50 = vcombine.low %v820_v32, %v824_v38 }
 0x219   :  { %v812_v45 = vld [vmem:[#allocation8 + $0x488] sm:$0xff]  ;;  %v5534_v24 = vcombine.high %v780_v12, %v784_v13 }
 0x21a   :  { %v624_v53 = vcombine.low %v616_v52, %v623_v51  ;;  %v816_v46 = vld [vmem:[#allocation8 + $0x4a8] sm:$0xff]  ;;  %v5438_v51 = vcombine.high %v684_v43, %v688_v44 }
 0x21b   :  { %v5566_v52 = vcombine.high %v812_v45, %v816_v46  ;;  %v788_v3 = vld [vmem:[#allocation8 + $0x3c8] sm:$0xff] }
 0x21c   :  { %v631_v57 = vrot.slane %v624_v53, %v6934_v14  ;;  %v676_v53 = vld [vmem:[#allocation8 + $0x48] sm:$0xff] }
 0x21d   :  { %v792_v56 = vld [vmem:[#allocation8 + $0x3e8] sm:$0xff] }
 0x21e   :  { %v633_v58 = vsub.f32 %v475_v54, %v631_v57  ;;  %v680_v54 = vld [vmem:[#allocation8 + $0x68] sm:$0xff] }
 0x21f   :  { %v804_v57 = vld [vmem:[#allocation8 + $0x448] sm:$0xff] }
 0x220   :  { %v646_v21 = vrot.slane %v633_v58, %v6949_v37  ;;  %v654_v60 = vrot.slane %v633_v58, %v6946_v36  ;;  %v642_v61 = vrot.slane %v633_v58, %v6939_v27  ;;  %v650_v62 = vrot.slane %v633_v58, %v6942_v23  ;;  %v808_v58 = vld [vmem:[#allocation8 + $0x468] sm:$0xff] }
 0x221   :  { %v916_v4 = vld [vmem:[#allocation8 + $0x7c8] sm:$0xff] }
 0x222   :  { %v660_v63 = vadd.f32 %v646_v21, %v635_v16  ;;  %v662_v0 = vadd.f32 %v654_v60, %v637_v59  ;;  %v659_v1 = vadd.f32 %v642_v61, %v634_v22  ;;  %v661_v2 = vadd.f32 %v650_v62, %v636_v15  ;;  %v668_v21 = vld [vmem:[#allocation8 + $0x8] sm:$0xff] }
 0x223   :  { %v5437_v59 = vcombine.low %v684_v43, %v688_v44  ;;  %v5565_v16 = vcombine.low %v812_v45, %v816_v46  ;;  %v5430_v22 = vcombine.high %v676_v53, %v680_v54  ;;  %v5558_v15 = vcombine.high %v804_v57, %v808_v58  ;;  %v672_v60 = vld [vmem:[#allocation8 + $0x28] sm:$0xff] }
 0x224   :  { %v6970_v5 = vpack.c.bf16 %v660_v63, %v660_v63  ;;  %v6972_v47 = vpack.c.bf16 %v662_v0, %v662_v0  ;;  %v6974_v48 = vpack.c.bf16 %v659_v1, %v659_v1  ;;  %v6976_v6 = vpack.c.bf16 %v661_v2, %v661_v2  ;;  %v796_v61 = vld [vmem:[#allocation8 + $0x408] sm:$0xff] }
 0x225   :  { %v800_v62 = vld [vmem:[#allocation8 + $0x428] sm:$0xff]  ;;  %v5429_v63 = vcombine.low %v676_v53, %v680_v54  ;;  %v5557_v0 = vcombine.low %v804_v57, %v808_v58  ;;  %v5422_v1 = vcombine.high %v668_v21, %v672_v60  ;;  %v5421_v7 = vcombine.low %v668_v21, %v672_v60 }
 0x226   :  { %2277 = vmatprep.mubr.bf16.mxu0 %v6970_v5  ;;  %2318 = vmatprep.mubr.bf16.mxu1 %v6972_v47  ;;  %v5550_v2 = vcombine.high %v796_v61, %v800_v62  ;;  %v920_v55 = vld [vmem:[#allocation8 + $0x7e8] sm:$0xff] }
 0x227   :  { %2278 = vmatmul.mubr.bf16.vlgmr.msra.gmra.mxu0 %v6974_v48  ;;  %2319 = vmatmul.mubr.bf16.vlgmr.msra.gmra.mxu1 %v6976_v6  ;;  %v5670_v10 = vcombine.high %v916_v4, %v920_v55  ;;  %v772_v26 = vld [vmem:[#allocation8 + $0x348] sm:$0xff] }
 0x228   :  { %2328 = vmatpush1.bf16.msra.mxu0 %v5477_v34  ;;  %2369 = vmatpush1.bf16.msra.mxu1 %v5605_v35  ;;  %v692_v34 = vld [vmem:[#allocation8 + $0xc8] sm:$0xff] }
 0x229   :  { %2359 = vmatprep.mubr.bf16.mxu0 %v6970_v5  ;;  %2400 = vmatprep.mubr.bf16.mxu1 %v6972_v47  ;;  %v696_v35 = vld [vmem:[#allocation8 + $0xe8] sm:$0xff] }
 0x22a   :  { %2329 = vmatprep.subr.bf16.mxu0 %v5470_v8  ;;  %2370 = vmatprep.subr.bf16.mxu1 %v5598_v9  ;;  %v5446_v41 = vcombine.high %v692_v34, %v696_v35  ;;  %v5445_v49 = vcombine.low %v692_v34, %v696_v35  ;;  %v5549_v8 = vcombine.low %v796_v61, %v800_v62  ;;  %v776_v28 = vld [vmem:[#allocation8 + $0x368] sm:$0xff] }
 0x22b   :  { %v5542_v9 = vcombine.high %v788_v3, %v792_v56  ;;  %v5526_v34 = vcombine.high %v772_v26, %v776_v28  ;;  %v764_v32 = vld [vmem:[#allocation8 + $0x308] sm:$0xff] }
 0x22c   :  { %2330 = vmatpush1.bf16.msra.mxu0 %v5469_v17  ;;  %2371 = vmatpush1.bf16.msra.mxu1 %v5597_v18  ;;  %v908_v17 = vld [vmem:[#allocation8 + $0x788] sm:$0xff] }
 0x22d   :  { %2331 = vmatprep.subr.bf16.mxu0 %v5462_v19  ;;  %2372 = vmatprep.subr.bf16.mxu1 %v5590_v20  ;;  %v912_v18 = vld [vmem:[#allocation8 + $0x7a8] sm:$0xff]  ;;  %v5541_v19 = vcombine.low %v788_v3, %v792_v56  ;;  %v5669_v20 = vcombine.low %v916_v4, %v920_v55 }
 0x22e   :  { %v5662_v25 = vcombine.high %v908_v17, %v912_v18  ;;  %v768_v38 = vld [vmem:[#allocation8 + $0x328] sm:$0xff] }
 0x22f   :  { %v5518_v43 = vcombine.high %v764_v32, %v768_v38  ;;  %v756_v45 = vld [vmem:[#allocation8 + $0x2c8] sm:$0xff] }
 0x230   :  { %2332 = vmatpush1.bf16.msra.mxu0 %v5461_v29  ;;  %2373 = vmatpush1.bf16.msra.mxu1 %v5589_v30  ;;  %v900_v29 = vld [vmem:[#allocation8 + $0x748] sm:$0xff] }
 0x231   :  { %2333 = vmatprep.subr.bf16.mxu0 %v5454_v31  ;;  %2374 = vmatprep.subr.bf16.mxu1 %v5582_v33  ;;  %v904_v30 = vld [vmem:[#allocation8 + $0x768] sm:$0xff]  ;;  %v5533_v31 = vcombine.low %v780_v12, %v784_v13  ;;  %v5661_v33 = vcombine.low %v908_v17, %v912_v18  ;;  %v725_v17 = vld [vmem:[#allocation8 + $0x1d0] sm:$0xff] }
 0x232   :  { %v5654_v35 = vcombine.high %v900_v29, %v904_v30  ;;  %v760_v46 = vld [vmem:[#allocation8 + $0x2e8] sm:$0xff]  ;;  %v729_v18 = vld [vmem:[#allocation8 + $0x1f0] sm:$0xff] }
 0x233   :  { %v5510_v53 = vcombine.high %v756_v45, %v760_v46  ;;  %v748_v57 = vld [vmem:[#allocation8 + $0x288] sm:$0xff] }
 0x234   :  { %2334 = vmatpush1.bf16.msra.mxu0 %v5453_v39  ;;  %2375 = vmatpush1.bf16.msra.mxu1 %v5581_v40  ;;  %v892_v39 = vld [vmem:[#allocation8 + $0x708] sm:$0xff] }
 0x235   :  { %2335 = vmatprep.subr.bf16.mxu0 %v5446_v41  ;;  %2376 = vmatprep.subr.bf16.mxu1 %v5574_v42  ;;  %v896_v40 = vld [vmem:[#allocation8 + $0x728] sm:$0xff]  ;;  %v5525_v41 = vcombine.low %v772_v26, %v776_v28  ;;  %v5653_v42 = vcombine.low %v900_v29, %v904_v30  ;;  %v5480_v26 = vcombine.high %v725_v17, %v729_v18  ;;  %v717_v29 = vld [vmem:[#allocation8 + $0x190] sm:$0xff] }
 0x236   :  { %v5646_v44 = vcombine.high %v892_v39, %v896_v40  ;;  %v752_v58 = vld [vmem:[#allocation8 + $0x2a8] sm:$0xff]  ;;  %v721_v30 = vld [vmem:[#allocation8 + $0x1b0] sm:$0xff] }
 0x237   :  { %v5502_v21 = vcombine.high %v748_v57, %v752_v58  ;;  %v740_v61 = vld [vmem:[#allocation8 + $0x248] sm:$0xff] }
 0x238   :  { %2336 = vmatpush1.bf16.msra.mxu0 %v5445_v49  ;;  %2377 = vmatpush1.bf16.msra.mxu1 %v5573_v50  ;;  %v884_v49 = vld [vmem:[#allocation8 + $0x6c8] sm:$0xff] }
 0x239   :  { %2337 = vmatprep.subr.bf16.mxu0 %v5438_v51  ;;  %2378 = vmatprep.subr.bf16.mxu1 %v5566_v52  ;;  %v888_v50 = vld [vmem:[#allocation8 + $0x6e8] sm:$0xff]  ;;  %v5517_v51 = vcombine.low %v764_v32, %v768_v38  ;;  %v5645_v52 = vcombine.low %v892_v39, %v896_v40  ;;  %v5472_v32 = vcombine.high %v717_v29, %v721_v30  ;;  %v709_v39 = vld [vmem:[#allocation8 + $0x150] sm:$0xff] }
 0x23a   :  { %v5638_v54 = vcombine.high %v884_v49, %v888_v50  ;;  %v744_v62 = vld [vmem:[#allocation8 + $0x268] sm:$0xff]  ;;  %v713_v40 = vld [vmem:[#allocation8 + $0x170] sm:$0xff] }
 0x23b   :  { %v5494_v3 = vcombine.high %v740_v61, %v744_v62  ;;  %v732_v4 = vld [vmem:[#allocation8 + $0x208] sm:$0xff] }
 0x23c   :  { %2338 = vmatpush1.bf16.msra.mxu0 %v5437_v59  ;;  %2379 = vmatpush1.bf16.msra.mxu1 %v5565_v16  ;;  %v876_v59 = vld [vmem:[#allocation8 + $0x688] sm:$0xff] }
 0x23d   :  { %2339 = vmatprep.subr.bf16.mxu0 %v5430_v22  ;;  %2380 = vmatprep.subr.bf16.mxu1 %v5558_v15  ;;  %v880_v16 = vld [vmem:[#allocation8 + $0x6a8] sm:$0xff]  ;;  %v5509_v22 = vcombine.low %v756_v45, %v760_v46  ;;  %v5637_v15 = vcombine.low %v884_v49, %v888_v50  ;;  %v5464_v45 = vcombine.high %v709_v39, %v713_v40  ;;  %v701_v49 = vld [vmem:[#allocation8 + $0x110] sm:$0xff] }
 0x23e   :  { %v5630_v60 = vcombine.high %v876_v59, %v880_v16  ;;  %v736_v55 = vld [vmem:[#allocation8 + $0x228] sm:$0xff]  ;;  %v705_v50 = vld [vmem:[#allocation8 + $0x130] sm:$0xff] }
 0x23f   :  { %v5486_v12 = vcombine.high %v732_v4, %v736_v55 }
 0x240   :  { %2340 = vmatpush1.bf16.msra.mxu0 %v5429_v63  ;;  %2381 = vmatpush1.bf16.msra.mxu1 %v5557_v0  ;;  %v868_v63 = vld [vmem:[#allocation8 + $0x648] sm:$0xff] }
 0x241   :  { %2341 = vmatprep.subr.bf16.mxu0 %v5422_v1  ;;  %2382 = vmatprep.subr.bf16.mxu1 %v5550_v2  ;;  %v872_v0 = vld [vmem:[#allocation8 + $0x668] sm:$0xff]  ;;  %v5501_v1 = vcombine.low %v748_v57, %v752_v58  ;;  %v5629_v2 = vcombine.low %v876_v59, %v880_v16  ;;  %v5456_v57 = vcombine.high %v701_v49, %v705_v50  ;;  %v693_v59 = vld [vmem:[#allocation8 + $0xd0] sm:$0xff] }
 0x242   :  { %v5622_v56 = vcombine.high %v868_v63, %v872_v0  ;;  %v697_v16 = vld [vmem:[#allocation8 + $0xf0] sm:$0xff] }
 0x244   :  { %2342 = vmatpush1.bf16.msra.mxu0 %v5421_v7  ;;  %2383 = vmatpush1.bf16.msra.mxu1 %v5549_v8  ;;  %v860_v7 = vld [vmem:[#allocation8 + $0x608] sm:$0xff] }
 0x245   :  { %2343 = vmatprep.subr.bf16.mxu0 %v5542_v9  ;;  %2384 = vmatprep.subr.bf16.mxu1 %v5670_v10  ;;  %v864_v8 = vld [vmem:[#allocation8 + $0x628] sm:$0xff]  ;;  %v5493_v9 = vcombine.low %v740_v61, %v744_v62  ;;  %v5621_v10 = vcombine.low %v868_v63, %v872_v0  ;;  %v5448_v61 = vcombine.high %v693_v59, %v697_v16  ;;  %v685_v63 = vld [vmem:[#allocation8 + $0x90] sm:$0xff] }
 0x246   :  { %v5614_v13 = vcombine.high %v860_v7, %v864_v8  ;;  %v689_v0 = vld [vmem:[#allocation8 + $0xb0] sm:$0xff] }
 0x248   :  { %2344 = vmatpush2.bf16.msra.mxu0 %v5541_v19  ;;  %2385 = vmatpush2.bf16.msra.mxu1 %v5669_v20  ;;  %v853_v19 = vld [vmem:[#allocation8 + $0x5d0] sm:$0xff] }
 0x249   :  { %2345 = vmatprep.subr.bf16.mxu0 %v5534_v24  ;;  %2386 = vmatprep.subr.bf16.mxu1 %v5662_v25  ;;  %v857_v20 = vld [vmem:[#allocation8 + $0x5f0] sm:$0xff]  ;;  %v5485_v24 = vcombine.low %v732_v4, %v736_v55  ;;  %v5613_v25 = vcombine.low %v860_v7, %v864_v8  ;;  %v5440_v4 = vcombine.high %v685_v63, %v689_v0 }
 0x24a   :  { %v5608_v28 = vcombine.high %v853_v19, %v857_v20  ;;  %v677_v7 = vld [vmem:[#allocation8 + $0x50] sm:$0xff] }
 0x24b   :  { %v681_v8 = vld [vmem:[#allocation8 + $0x70] sm:$0xff] }
 0x24c   :  { %2346 = vmatpush2.bf16.msra.mxu0 %v5533_v31  ;;  %2387 = vmatpush2.bf16.msra.mxu1 %v5661_v33  ;;  %v845_v31 = vld [vmem:[#allocation8 + $0x590] sm:$0xff] }
 0x24d   :  { %2347 = vmatprep.subr.bf16.mxu0 %v5526_v34  ;;  %2388 = vmatprep.subr.bf16.mxu1 %v5654_v35  ;;  %v849_v33 = vld [vmem:[#allocation8 + $0x5b0] sm:$0xff]  ;;  %v5479_v34 = vcombine.low %v725_v17, %v729_v18  ;;  %v5607_v35 = vcombine.low %v853_v19, %v857_v20  ;;  %v5432_v17 = vcombine.high %v677_v7, %v681_v8 }
 0x24e   :  { %v5600_v38 = vcombine.high %v845_v31, %v849_v33  ;;  %v669_v19 = vld [vmem:[#allocation8 + $0x10] sm:$0xff] }
 0x24f   :  { %v673_v20 = vld [vmem:[#allocation8 + $0x30] sm:$0xff] }
 0x250   :  { %2348 = vmatpush2.bf16.msra.mxu0 %v5525_v41  ;;  %2389 = vmatpush2.bf16.msra.mxu1 %v5653_v42  ;;  %v837_v41 = vld [vmem:[#allocation8 + $0x550] sm:$0xff] }
 0x251   :  { %2349 = vmatprep.subr.bf16.mxu0 %v5518_v43  ;;  %2390 = vmatprep.subr.bf16.mxu1 %v5646_v44  ;;  %v841_v42 = vld [vmem:[#allocation8 + $0x570] sm:$0xff]  ;;  %v5471_v43 = vcombine.low %v717_v29, %v721_v30  ;;  %v5599_v44 = vcombine.low %v845_v31, %v849_v33  ;;  %v5424_v29 = vcombine.high %v669_v19, %v673_v20 }
 0x252   :  { %v5592_v46 = vcombine.high %v837_v41, %v841_v42  ;;  %v789_v31 = vld [vmem:[#allocation8 + $0x3d0] sm:$0xff] }
 0x253   :  { %v793_v33 = vld [vmem:[#allocation8 + $0x3f0] sm:$0xff] }
 0x254   :  { %2350 = vmatpush2.bf16.msra.mxu0 %v5517_v51  ;;  %2391 = vmatpush2.bf16.msra.mxu1 %v5645_v52  ;;  %v829_v51 = vld [vmem:[#allocation8 + $0x510] sm:$0xff] }
 0x255   :  { %2351 = vmatprep.subr.bf16.mxu0 %v5510_v53  ;;  %2392 = vmatprep.subr.bf16.mxu1 %v5638_v54  ;;  %v833_v52 = vld [vmem:[#allocation8 + $0x530] sm:$0xff]  ;;  %v5463_v53 = vcombine.low %v709_v39, %v713_v40  ;;  %v5591_v54 = vcombine.low %v837_v41, %v841_v42  ;;  %v5544_v39 = vcombine.high %v789_v31, %v793_v33 }
 0x256   :  { %v5584_v58 = vcombine.high %v829_v51, %v833_v52  ;;  %v781_v41 = vld [vmem:[#allocation8 + $0x390] sm:$0xff] }
 0x257   :  { %v785_v42 = vld [vmem:[#allocation8 + $0x3b0] sm:$0xff] }
 0x258   :  { %2352 = vmatpush2.bf16.msra.mxu0 %v5509_v22  ;;  %2393 = vmatpush2.bf16.msra.mxu1 %v5637_v15  ;;  %v821_v22 = vld [vmem:[#allocation8 + $0x4d0] sm:$0xff] }
 0x259   :  { %2353 = vmatprep.subr.bf16.mxu0 %v5502_v21  ;;  %2394 = vmatprep.subr.bf16.mxu1 %v5630_v60  ;;  %v825_v15 = vld [vmem:[#allocation8 + $0x4f0] sm:$0xff]  ;;  %v5455_v21 = vcombine.low %v701_v49, %v705_v50  ;;  %v5583_v60 = vcombine.low %v829_v51, %v833_v52  ;;  %v5536_v49 = vcombine.high %v781_v41, %v785_v42 }
 0x25a   :  { %v5576_v62 = vcombine.high %v821_v22, %v825_v15  ;;  %v773_v51 = vld [vmem:[#allocation8 + $0x350] sm:$0xff] }
 0x25b   :  { %v777_v52 = vld [vmem:[#allocation8 + $0x370] sm:$0xff] }
 0x25c   :  { %2354 = vmatpush2.bf16.msra.mxu0 %v5501_v1  ;;  %2395 = vmatpush2.bf16.msra.mxu1 %v5629_v2  ;;  %v813_v1 = vld [vmem:[#allocation8 + $0x490] sm:$0xff] }
 0x25d   :  { %2355 = vmatprep.subr.bf16.mxu0 %v5494_v3  ;;  %2396 = vmatprep.subr.bf16.mxu1 %v5622_v56  ;;  %v817_v2 = vld [vmem:[#allocation8 + $0x4b0] sm:$0xff]  ;;  %v5447_v3 = vcombine.low %v693_v59, %v697_v16  ;;  %v5575_v56 = vcombine.low %v821_v22, %v825_v15  ;;  %v5528_v59 = vcombine.high %v773_v51, %v777_v52 }
 0x25e   :  { %v5568_v55 = vcombine.high %v813_v1, %v817_v2  ;;  %v765_v22 = vld [vmem:[#allocation8 + $0x310] sm:$0xff] }
 0x25f   :  { %v769_v15 = vld [vmem:[#allocation8 + $0x330] sm:$0xff] }
 0x260   :  { %2356 = vmatpush2.bf16.msra.mxu0 %v5493_v9  ;;  %2397 = vmatpush2.bf16.msra.mxu1 %v5621_v10  ;;  %v805_v9 = vld [vmem:[#allocation8 + $0x450] sm:$0xff] }
 0x261   :  { %2357 = vmatprep.subr.bf16.mxu0 %v5486_v12  ;;  %2398 = vmatprep.subr.bf16.mxu1 %v5614_v13  ;;  %v809_v10 = vld [vmem:[#allocation8 + $0x470] sm:$0xff]  ;;  %v5439_v12 = vcombine.low %v685_v63, %v689_v0  ;;  %v5567_v13 = vcombine.low %v813_v1, %v817_v2  ;;  %v5520_v63 = vcombine.high %v765_v22, %v769_v15 }
 0x262   :  { %v5560_v18 = vcombine.high %v805_v9, %v809_v10  ;;  %v757_v1 = vld [vmem:[#allocation8 + $0x2d0] sm:$0xff] }
 0x263   :  { %v761_v2 = vld [vmem:[#allocation8 + $0x2f0] sm:$0xff] }
 0x264   :  { %2358 = vmatpush2.bf16.msra.mxu0 %v5485_v24  ;;  %2399 = vmatpush2.bf16.msra.mxu1 %v5613_v25  ;;  %v797_v24 = vld [vmem:[#allocation8 + $0x410] sm:$0xff] }
 0x265   :  { %2409 = vmatprep.subr.bf16.mxu0 %v5480_v26  ;;  %2450 = vmatprep.subr.bf16.mxu1 %v5608_v28  ;;  %v801_v25 = vld [vmem:[#allocation8 + $0x430] sm:$0xff]  ;;  %v5431_v26 = vcombine.low %v677_v7, %v681_v8  ;;  %v5559_v28 = vcombine.low %v805_v9, %v809_v10  ;;  %v5512_v7 = vcombine.high %v757_v1, %v761_v2 }
 0x266   :  { %v5552_v30 = vcombine.high %v797_v24, %v801_v25  ;;  %v749_v9 = vld [vmem:[#allocation8 + $0x290] sm:$0xff] }
 0x267   :  { %2360 = vmatmul.mubr.bf16.vlgmr.msra.gmra.mxu0 %v6974_v48  ;;  %2401 = vmatmul.mubr.bf16.vlgmr.msra.gmra.mxu1 %v6976_v6  ;;  %v753_v10 = vld [vmem:[#allocation8 + $0x2b0] sm:$0xff] }
 0x268   :  { %2410 = vmatpush1.bf16.msra.mxu0 %v5479_v34  ;;  %2441 = vmatprep.mubr.bf16.mxu0 %v6970_v5  ;;  %v917_v34 = vld [vmem:[#allocation8 + $0x7d0] sm:$0xff] }
 0x269   :  { %2451 = vmatpush1.bf16.msra.mxu1 %v5607_v35  ;;  %2482 = vmatprep.mubr.bf16.mxu1 %v6972_v47  ;;  %v921_v35 = vld [vmem:[#allocation8 + $0x7f0] sm:$0xff] }
 0x26a   :  { %2411 = vmatprep.subr.bf16.mxu0 %v5472_v32  ;;  %2452 = vmatprep.subr.bf16.mxu1 %v5600_v38  ;;  %v5423_v32 = vcombine.low %v669_v19, %v673_v20  ;;  %v5551_v38 = vcombine.low %v797_v24, %v801_v25  ;;  %v5672_v40 = vcombine.high %v917_v34, %v921_v35  ;;  %v741_v24 = vld [vmem:[#allocation8 + $0x250] sm:$0xff] }
 0x26b   :  { %v5504_v19 = vcombine.high %v749_v9, %v753_v10  ;;  %v745_v25 = vld [vmem:[#allocation8 + $0x270] sm:$0xff] }
 0x26c   :  { %2412 = vmatpush1.bf16.msra.mxu0 %v5471_v43  ;;  %v909_v43 = vld [vmem:[#allocation8 + $0x790] sm:$0xff] }
 0x26d   :  { %2453 = vmatpush1.bf16.msra.mxu1 %v5599_v44  ;;  %2413 = vmatprep.subr.bf16.mxu0 %v5464_v45  ;;  %v913_v44 = vld [vmem:[#allocation8 + $0x7b0] sm:$0xff]  ;;  %v5543_v45 = vcombine.low %v789_v31, %v793_v33  ;;  %v5496_v31 = vcombine.high %v741_v24, %v745_v25 }
 0x26e   :  { %2454 = vmatprep.subr.bf16.mxu1 %v5592_v46  ;;  %v5671_v46 = vcombine.low %v917_v34, %v921_v35  ;;  %v5664_v50 = vcombine.high %v909_v43, %v913_v44  ;;  %v733_v34 = vld [vmem:[#allocation8 + $0x210] sm:$0xff] }
 0x26f   :  { %v737_v35 = vld [vmem:[#allocation8 + $0x230] sm:$0xff] }
 0x270   :  { %2414 = vmatpush1.bf16.msra.mxu0 %v5463_v53  ;;  %v901_v53 = vld [vmem:[#allocation8 + $0x750] sm:$0xff] }
 0x271   :  { %2455 = vmatpush1.bf16.msra.mxu1 %v5591_v54  ;;  %2415 = vmatprep.subr.bf16.mxu0 %v5456_v57  ;;  %v905_v54 = vld [vmem:[#allocation8 + $0x770] sm:$0xff]  ;;  %v5535_v57 = vcombine.low %v781_v41, %v785_v42  ;;  %v5488_v41 = vcombine.high %v733_v34, %v737_v35 }
 0x272   :  { %2456 = vmatprep.subr.bf16.mxu1 %v5584_v58  ;;  %v5663_v58 = vcombine.low %v909_v43, %v913_v44  ;;  %v5656_v16 = vcombine.high %v901_v53, %v905_v54  ;;  %v726_v43 = vld [vmem:[#allocation8 + $0x1d8] sm:$0xff] }
 0x273   :  { %v730_v44 = vld [vmem:[#allocation8 + $0x1f8] sm:$0xff] }
 0x274   :  { %2416 = vmatpush1.bf16.msra.mxu0 %v5455_v21  ;;  %v893_v21 = vld [vmem:[#allocation8 + $0x710] sm:$0xff] }
 0x275   :  { %2457 = vmatpush1.bf16.msra.mxu1 %v5583_v60  ;;  %2417 = vmatprep.subr.bf16.mxu0 %v5448_v61  ;;  %v897_v60 = vld [vmem:[#allocation8 + $0x730] sm:$0xff]  ;;  %v5527_v61 = vcombine.low %v773_v51, %v777_v52  ;;  %v5482_v51 = vcombine.high %v726_v43, %v730_v44 }
 0x276   :  { %2458 = vmatprep.subr.bf16.mxu1 %v5576_v62  ;;  %v5655_v62 = vcombine.low %v901_v53, %v905_v54  ;;  %v5648_v0 = vcombine.high %v893_v21, %v897_v60  ;;  %v718_v53 = vld [vmem:[#allocation8 + $0x198] sm:$0xff] }
 0x277   :  { %v722_v54 = vld [vmem:[#allocation8 + $0x1b8] sm:$0xff] }
 0x278   :  { %2418 = vmatpush1.bf16.msra.mxu0 %v5447_v3  ;;  %v885_v3 = vld [vmem:[#allocation8 + $0x6d0] sm:$0xff] }
 0x279   :  { %2459 = vmatpush1.bf16.msra.mxu1 %v5575_v56  ;;  %2419 = vmatprep.subr.bf16.mxu0 %v5440_v4  ;;  %v889_v56 = vld [vmem:[#allocation8 + $0x6f0] sm:$0xff]  ;;  %v5519_v4 = vcombine.low %v765_v22, %v769_v15  ;;  %v5474_v22 = vcombine.high %v718_v53, %v722_v54  ;;  %v710_v15 = vld [vmem:[#allocation8 + $0x158] sm:$0xff] }
 0x27a   :  { %2460 = vmatprep.subr.bf16.mxu1 %v5568_v55  ;;  %v5647_v55 = vcombine.low %v893_v21, %v897_v60  ;;  %v5640_v8 = vcombine.high %v885_v3, %v889_v56  ;;  %v714_v21 = vld [vmem:[#allocation8 + $0x178] sm:$0xff] }
 0x27c   :  { %2420 = vmatpush1.bf16.msra.mxu0 %v5439_v12  ;;  %v877_v12 = vld [vmem:[#allocation8 + $0x690] sm:$0xff] }
 0x27d   :  { %2461 = vmatpush1.bf16.msra.mxu1 %v5567_v13  ;;  %2421 = vmatprep.subr.bf16.mxu0 %v5432_v17  ;;  %v881_v13 = vld [vmem:[#allocation8 + $0x6b0] sm:$0xff]  ;;  %v5511_v17 = vcombine.low %v757_v1, %v761_v2  ;;  %v5466_v1 = vcombine.high %v710_v15, %v714_v21 }
 0x27e   :  { %2462 = vmatprep.subr.bf16.mxu1 %v5560_v18  ;;  %v5639_v18 = vcombine.low %v885_v3, %v889_v56  ;;  %v5632_v20 = vcombine.high %v877_v12, %v881_v13  ;;  %v702_v3 = vld [vmem:[#allocation8 + $0x118] sm:$0xff] }
 0x27f   :  { %v706_v56 = vld [vmem:[#allocation8 + $0x138] sm:$0xff] }
 0x280   :  { %2422 = vmatpush1.bf16.msra.mxu0 %v5431_v26  ;;  %v869_v26 = vld [vmem:[#allocation8 + $0x650] sm:$0xff] }
 0x281   :  { %2463 = vmatpush1.bf16.msra.mxu1 %v5559_v28  ;;  %2423 = vmatprep.subr.bf16.mxu0 %v5424_v29  ;;  %v873_v28 = vld [vmem:[#allocation8 + $0x670] sm:$0xff]  ;;  %v5503_v29 = vcombine.low %v749_v9, %v753_v10  ;;  %v5458_v9 = vcombine.high %v702_v3, %v706_v56  ;;  %v694_v10 = vld [vmem:[#allocation8 + $0xd8] sm:$0xff] }
 0x282   :  { %2464 = vmatprep.subr.bf16.mxu1 %v5552_v30  ;;  %v5631_v30 = vcombine.low %v877_v12, %v881_v13  ;;  %v5624_v33 = vcombine.high %v869_v26, %v873_v28  ;;  %v698_v12 = vld [vmem:[#allocation8 + $0xf8] sm:$0xff] }
 0x283   :  { %v822_v13 = vld [vmem:[#allocation8 + $0x4d8] sm:$0xff] }
 0x284   :  { %2424 = vmatpush1.bf16.msra.mxu0 %v5423_v32  ;;  %v861_v32 = vld [vmem:[#allocation8 + $0x610] sm:$0xff] }
 0x285   :  { %2465 = vmatpush1.bf16.msra.mxu1 %v5551_v38  ;;  %2425 = vmatprep.subr.bf16.mxu0 %v5544_v39  ;;  %v865_v38 = vld [vmem:[#allocation8 + $0x630] sm:$0xff]  ;;  %v5495_v39 = vcombine.low %v741_v24, %v745_v25  ;;  %v686_v24 = vld [vmem:[#allocation8 + $0x98] sm:$0xff] }
 0x286   :  { %2466 = vmatprep.subr.bf16.mxu1 %v5672_v40  ;;  %v5623_v40 = vcombine.low %v869_v26, %v873_v28  ;;  %v5616_v42 = vcombine.high %v861_v32, %v865_v38  ;;  %v690_v25 = vld [vmem:[#allocation8 + $0xb8] sm:$0xff] }
 0x287   :  { %v814_v26 = vld [vmem:[#allocation8 + $0x498] sm:$0xff] }
 0x288   :  { %2426 = vmatpush2.bf16.msra.mxu0 %v5543_v45  ;;  %v854_v45 = vld [vmem:[#allocation8 + $0x5d8] sm:$0xff] }
 0x289   :  { %2467 = vmatpush2.bf16.msra.mxu1 %v5671_v46  ;;  %2427 = vmatprep.subr.bf16.mxu0 %v5536_v49  ;;  %v858_v46 = vld [vmem:[#allocation8 + $0x5f8] sm:$0xff]  ;;  %v5487_v49 = vcombine.low %v733_v34, %v737_v35 }
 0x28a   :  { %2468 = vmatprep.subr.bf16.mxu1 %v5664_v50  ;;  %v5615_v50 = vcombine.low %v861_v32, %v865_v38  ;;  %v5610_v52 = vcombine.high %v854_v45, %v858_v46  ;;  %v818_v28 = vld [vmem:[#allocation8 + $0x4b8] sm:$0xff] }
 0x28b   :  { %v678_v34 = vld [vmem:[#allocation8 + $0x58] sm:$0xff] }
 0x28c   :  { %2428 = vmatpush2.bf16.msra.mxu0 %v5535_v57  ;;  %v5481_v57 = vcombine.low %v726_v43, %v730_v44  ;;  %v682_v35 = vld [vmem:[#allocation8 + $0x78] sm:$0xff] }
 0x28d   :  { %2469 = vmatpush2.bf16.msra.mxu1 %v5663_v58  ;;  %2429 = vmatprep.subr.bf16.mxu0 %v5528_v59  ;;  %v846_v58 = vld [vmem:[#allocation8 + $0x598] sm:$0xff] }
 0x28e   :  { %2470 = vmatprep.subr.bf16.mxu1 %v5656_v16  ;;  %v850_v59 = vld [vmem:[#allocation8 + $0x5b8] sm:$0xff]  ;;  %v5609_v16 = vcombine.low %v854_v45, %v858_v46 }
 0x28f   :  { %v5602_v60 = vcombine.high %v846_v58, %v850_v59  ;;  %v806_v32 = vld [vmem:[#allocation8 + $0x458] sm:$0xff] }
 0x290   :  { %2430 = vmatpush2.bf16.msra.mxu0 %v5527_v61  ;;  %v838_v61 = vld [vmem:[#allocation8 + $0x558] sm:$0xff] }
 0x291   :  { %2471 = vmatpush2.bf16.msra.mxu1 %v5655_v62  ;;  %2431 = vmatprep.subr.bf16.mxu0 %v5520_v63  ;;  %v842_v62 = vld [vmem:[#allocation8 + $0x578] sm:$0xff]  ;;  %v5473_v63 = vcombine.low %v718_v53, %v722_v54 }
 0x292   :  { %2472 = vmatprep.subr.bf16.mxu1 %v5648_v0  ;;  %v5601_v0 = vcombine.low %v846_v58, %v850_v59  ;;  %v5594_v2 = vcombine.high %v838_v61, %v842_v62  ;;  %v810_v38 = vld [vmem:[#allocation8 + $0x478] sm:$0xff] }
 0x293   :  { %v670_v43 = vld [vmem:[#allocation8 + $0x18] sm:$0xff] }
 0x294   :  { %2432 = vmatpush2.bf16.msra.mxu0 %v5519_v4  ;;  %v830_v4 = vld [vmem:[#allocation8 + $0x518] sm:$0xff] }
 0x295   :  { %2473 = vmatpush2.bf16.msra.mxu1 %v5647_v55  ;;  %2433 = vmatprep.subr.bf16.mxu0 %v5512_v7  ;;  %v834_v55 = vld [vmem:[#allocation8 + $0x538] sm:$0xff]  ;;  %v5465_v7 = vcombine.low %v710_v15, %v714_v21 }
 0x296   :  { %2474 = vmatprep.subr.bf16.mxu1 %v5640_v8  ;;  %v5593_v8 = vcombine.low %v838_v61, %v842_v62  ;;  %v674_v44 = vld [vmem:[#allocation8 + $0x38] sm:$0xff] }
 0x297   :  { %v798_v45 = vld [vmem:[#allocation8 + $0x418] sm:$0xff]  ;;  %v5425_v59 = vcombine.low %v670_v43, %v674_v44 }
 0x298   :  { %2434 = vmatpush2.bf16.msra.mxu0 %v5511_v17  ;;  %v826_v17 = vld [vmem:[#allocation8 + $0x4f8] sm:$0xff] }
 0x299   :  { %2475 = vmatpush2.bf16.msra.mxu1 %v5639_v18  ;;  %2435 = vmatprep.subr.bf16.mxu0 %v5504_v19  ;;  %v5585_v18 = vcombine.low %v830_v4, %v834_v55  ;;  %v5450_v19 = vcombine.high %v694_v10, %v698_v12  ;;  %v802_v46 = vld [vmem:[#allocation8 + $0x438] sm:$0xff] }
 0x29a   :  { %2476 = vmatprep.subr.bf16.mxu1 %v5632_v20  ;;  %v5578_v20 = vcombine.high %v822_v13, %v826_v17  ;;  %v790_v53 = vld [vmem:[#allocation8 + $0x3d8] sm:$0xff] }
 0x29b   :  { %v794_v54 = vld [vmem:[#allocation8 + $0x3f8] sm:$0xff] }
 0x29c   :  { %2436 = vmatpush2.bf16.msra.mxu0 %v5503_v29  ;;  %v5449_v29 = vcombine.low %v694_v10, %v698_v12  ;;  %v922_v58 = vld [vmem:[#allocation8 + $0x7f8] sm:$0xff] }
 0x29d   :  { %2477 = vmatpush2.bf16.msra.mxu1 %v5631_v30  ;;  %2437 = vmatprep.subr.bf16.mxu0 %v5496_v31  ;;  %v5577_v30 = vcombine.low %v822_v13, %v826_v17  ;;  %v5442_v31 = vcombine.high %v686_v24, %v690_v25  ;;  %v782_v21 = vld [vmem:[#allocation8 + $0x398] sm:$0xff] }
 0x29e   :  { %2478 = vmatprep.subr.bf16.mxu1 %v5624_v33  ;;  %v5570_v33 = vcombine.high %v814_v26, %v818_v28  ;;  %v910_v61 = vld [vmem:[#allocation8 + $0x798] sm:$0xff] }
 0x29f   :  { %v914_v62 = vld [vmem:[#allocation8 + $0x7b8] sm:$0xff] }
 0x2a0   :  { %2438 = vmatpush2.bf16.msra.mxu0 %v5495_v39  ;;  %v5441_v39 = vcombine.low %v686_v24, %v690_v25  ;;  %v766_v10 = vld [vmem:[#allocation8 + $0x318] sm:$0xff] }
 0x2a1   :  { %2479 = vmatpush2.bf16.msra.mxu1 %v5623_v40  ;;  %2439 = vmatprep.subr.bf16.mxu0 %v5488_v41  ;;  %v5569_v40 = vcombine.low %v814_v26, %v818_v28  ;;  %v5434_v41 = vcombine.high %v678_v34, %v682_v35  ;;  %v770_v12 = vld [vmem:[#allocation8 + $0x338] sm:$0xff] }
 0x2a2   :  { %2480 = vmatprep.subr.bf16.mxu1 %v5616_v42  ;;  %v5562_v42 = vcombine.high %v806_v32, %v810_v38  ;;  %v894_v13 = vld [vmem:[#allocation8 + $0x718] sm:$0xff] }
 0x2a3   :  { %v898_v17 = vld [vmem:[#allocation8 + $0x738] sm:$0xff] }
 0x2a4   :  { %2440 = vmatpush2.bf16.msra.mxu0 %v5487_v49  ;;  %v5433_v49 = vcombine.low %v678_v34, %v682_v35  ;;  %v758_v24 = vld [vmem:[#allocation8 + $0x2d8] sm:$0xff] }
 0x2a5   :  { %2481 = vmatpush2.bf16.msra.mxu1 %v5615_v50  ;;  %2491 = vmatprep.subr.bf16.mxu0 %v5482_v51  ;;  %v5561_v50 = vcombine.low %v806_v32, %v810_v38  ;;  %v5426_v51 = vcombine.high %v670_v43, %v674_v44  ;;  %v762_v25 = vld [vmem:[#allocation8 + $0x2f8] sm:$0xff] }
 0x2a6   :  { %2532 = vmatprep.subr.bf16.mxu1 %v5610_v52  ;;  %v5554_v52 = vcombine.high %v798_v45, %v802_v46  ;;  %v886_v26 = vld [vmem:[#allocation8 + $0x6d8] sm:$0xff] }
 0x2a7   :  { %2442 = vmatmul.mubr.bf16.vlgmr.msra.gmra.mxu0 %v6974_v48  ;;  %v890_v28 = vld [vmem:[#allocation8 + $0x6f8] sm:$0xff] }
 0x2a8   :  { %2483 = vmatmul.mubr.bf16.vlgmr.msra.gmra.mxu1 %v6976_v6  ;;  %2492 = vmatpush1.bf16.msra.mxu0 %v5481_v57  ;;  %v918_v57 = vld [vmem:[#allocation8 + $0x7d8] sm:$0xff] }
 0x2a9   :  { %2523 = vmatprep.mubr.bf16.mxu0 %v6970_v5  ;;  %2533 = vmatpush1.bf16.msra.mxu1 %v5609_v16  ;;  %v5586_v5 = vcombine.high %v830_v4, %v834_v55  ;;  %v5553_v16 = vcombine.low %v798_v45, %v802_v46  ;;  %v5674_v15 = vcombine.high %v918_v57, %v922_v58  ;;  %v902_v4 = vld [vmem:[#allocation8 + $0x758] sm:$0xff] }
 0x2aa   :  { %2564 = vmatprep.mubr.bf16.mxu1 %v6972_v47  ;;  %2493 = vmatprep.subr.bf16.mxu0 %v5474_v22  ;;  %v5457_v47 = vcombine.low %v702_v3, %v706_v56  ;;  %v5546_v22 = vcombine.high %v790_v53, %v794_v54  ;;  %v774_v3 = vld [vmem:[#allocation8 + $0x358] sm:$0xff] }
 0x2ab   :  { %2534 = vmatprep.subr.bf16.mxu1 %v5602_v60  ;;  %v786_v60 = vld [vmem:[#allocation8 + $0x3b8] sm:$0xff] }
 0x2ac   :  { %2494 = vmatpush1.bf16.msra.mxu0 %v5473_v63  ;;  %v5545_v63 = vcombine.low %v790_v53, %v794_v54  ;;  %v778_v56 = vld [vmem:[#allocation8 + $0x378] sm:$0xff] }
 0x2ad   :  { %2535 = vmatpush1.bf16.msra.mxu1 %v5601_v0  ;;  %2495 = vmatprep.subr.bf16.mxu0 %v5466_v1  ;;  %v5673_v0 = vcombine.low %v918_v57, %v922_v58  ;;  %v5538_v1 = vcombine.high %v782_v21, %v786_v60  ;;  %v906_v55 = vld [vmem:[#allocation8 + $0x778] sm:$0xff] }
 0x2ae   :  { %2536 = vmatprep.subr.bf16.mxu1 %v5594_v2  ;;  %v5666_v2 = vcombine.high %v910_v61, %v914_v62  ;;  %v750_v34 = vld [vmem:[#allocation8 + $0x298] sm:$0xff] }
 0x2af   :  { %v754_v35 = vld [vmem:[#allocation8 + $0x2b8] sm:$0xff] }
 0x2b0   :  { %2496 = vmatpush1.bf16.msra.mxu0 %v5465_v7  ;;  %v5537_v7 = vcombine.low %v782_v21, %v786_v60  ;;  %v878_v32 = vld [vmem:[#allocation8 + $0x698] sm:$0xff] }
 0x2b1   :  { %2537 = vmatpush1.bf16.msra.mxu1 %v5593_v8  ;;  %2497 = vmatprep.subr.bf16.mxu0 %v5458_v9  ;;  %v5665_v8 = vcombine.low %v910_v61, %v914_v62  ;;  %v5530_v9 = vcombine.high %v774_v3, %v778_v56  ;;  %v882_v38 = vld [vmem:[#allocation8 + $0x6b8] sm:$0xff]  ;;  %v6998_v61 = vld [vmem:[#allocation10] sm:$0xff] }
 0x2b2   :  { %2538 = vmatprep.subr.bf16.mxu1 %v5586_v5  ;;  %v5658_v5 = vcombine.high %v902_v4, %v906_v55  ;;  %v742_v43 = vld [vmem:[#allocation8 + $0x258] sm:$0xff]  ;;  %v928_v62 = vrot.slane %v6998_v61, %v6939_v27 }
 0x2b3   :  { %v746_v44 = vld [vmem:[#allocation8 + $0x278] sm:$0xff] }
 0x2b4   :  { %2498 = vmatpush1.bf16.msra.mxu0 %v5457_v47  ;;  %v5529_v47 = vcombine.low %v774_v3, %v778_v56  ;;  %v870_v45 = vld [vmem:[#allocation8 + $0x658] sm:$0xff] }
 0x2b5   :  { %2539 = vmatpush1.bf16.msra.mxu1 %v5585_v18  ;;  %2499 = vmatprep.subr.bf16.mxu0 %v5450_v19  ;;  %v5657_v18 = vcombine.low %v902_v4, %v906_v55  ;;  %v5522_v19 = vcombine.high %v766_v10, %v770_v12  ;;  %v874_v46 = vld [vmem:[#allocation8 + $0x678] sm:$0xff] }
 0x2b6   :  { %2540 = vmatprep.subr.bf16.mxu1 %v5578_v20  ;;  %v5650_v20 = vcombine.high %v894_v13, %v898_v17  ;;  %v734_v53 = vld [vmem:[#allocation8 + $0x218] sm:$0xff] }
 0x2b7   :  { %v738_v54 = vld [vmem:[#allocation8 + $0x238] sm:$0xff] }
 0x2b8   :  { %2500 = vmatpush1.bf16.msra.mxu0 %v5449_v29  ;;  %v5521_v29 = vcombine.low %v766_v10, %v770_v12  ;;  %v862_v57 = vld [vmem:[#allocation8 + $0x618] sm:$0xff]  ;;  %v5489_v21 = vcombine.low %v734_v53, %v738_v54  ;;  %v936_v12 = vrot.slane %v6998_v61, %v6942_v23 }
 0x2b9   :  { %2541 = vmatpush1.bf16.msra.mxu1 %v5577_v30  ;;  %2501 = vmatprep.subr.bf16.mxu0 %v5442_v31  ;;  %v5649_v30 = vcombine.low %v894_v13, %v898_v17  ;;  %v5514_v31 = vcombine.high %v758_v24, %v762_v25  ;;  %v866_v58 = vld [vmem:[#allocation8 + $0x638] sm:$0xff] }
 0x2ba   :  { %2542 = vmatprep.subr.bf16.mxu1 %v5570_v33  ;;  %v5642_v33 = vcombine.high %v886_v26, %v890_v28  ;;  %v5617_v60 = vcombine.low %v862_v57, %v866_v58 }
 0x2bc   :  { %2502 = vmatpush1.bf16.msra.mxu0 %v5441_v39  ;;  %v5513_v39 = vcombine.low %v758_v24, %v762_v25 }
 0x2bd   :  { %2543 = vmatpush1.bf16.msra.mxu1 %v5569_v40  ;;  %2503 = vmatprep.subr.bf16.mxu0 %v5434_v41  ;;  %v5641_v40 = vcombine.low %v886_v26, %v890_v28  ;;  %v5506_v41 = vcombine.high %v750_v34, %v754_v35 }
 0x2be   :  { %2544 = vmatprep.subr.bf16.mxu1 %v5562_v42  ;;  %v5634_v42 = vcombine.high %v878_v32, %v882_v38 }
 0x2c0   :  { %2504 = vmatpush1.bf16.msra.mxu0 %v5433_v49  ;;  %v5505_v49 = vcombine.low %v750_v34, %v754_v35  ;;  %v6042_v34 = vld [vmem:[#allocation11 + $0x2e0] ss:$16 sps:$4 sm:$0xff]   ;;  %v6047_v35 = vld [vmem:[#allocation11 + $0xc4] ss:$16 sps:$4 sm:$0xff]  }
 0x2c1   :  { %2545 = vmatpush1.bf16.msra.mxu1 %v5561_v50  ;;  %2505 = vmatprep.subr.bf16.mxu0 %v5426_v51  ;;  %v5633_v50 = vcombine.low %v878_v32, %v882_v38  ;;  %v5498_v51 = vcombine.high %v742_v43, %v746_v44  ;;  %v6050_v32 = vld [vmem:[#allocation11 + $0x2c4] ss:$16 sps:$4 sm:$0xff]   ;;  %v6045_v38 = vld [vmem:[#allocation11 + $0xc0] ss:$16 sps:$4 sm:$0xff]  }
 0x2c2   :  { %2546 = vmatprep.subr.bf16.mxu1 %v5554_v52  ;;  %v5626_v52 = vcombine.high %v870_v45, %v874_v46 }
 0x2c4   :  { %2506 = vmatpush1.bf16.msra.mxu0 %v5425_v59  ;;  %v5497_v59 = vcombine.low %v742_v43, %v746_v44  ;;  %v6054_v43 = vld [vmem:[#allocation11 + $0x2a0] ss:$16 sps:$4 sm:$0xff]   ;;  %v6059_v44 = vld [vmem:[#allocation11 + $0x84] ss:$16 sps:$4 sm:$0xff]  }
 0x2c5   :  { %2547 = vmatpush1.bf16.msra.mxu1 %v5553_v16  ;;  %2507 = vmatprep.subr.bf16.mxu0 %v5546_v22  ;;  %v5625_v16 = vcombine.low %v870_v45, %v874_v46  ;;  %v5490_v22 = vcombine.high %v734_v53, %v738_v54  ;;  %v6057_v45 = vld [vmem:[#allocation11 + $0x80] ss:$16 sps:$4 sm:$0xff]   ;;  %v6071_v54 = vld [vmem:[#allocation11 + $0x44] ss:$16 sps:$4 sm:$0xff]  }
 0x2c6   :  { %2548 = vmatprep.subr.bf16.mxu1 %v5674_v15  ;;  %v5618_v15 = vcombine.high %v862_v57, %v866_v58  ;;  %v6060_v46 = vld [vmem:[#allocation11 + $0x280] ss:$16 sps:$4 sm:$0xff]   ;;  %v6074_v57 = vld [vmem:[#allocation11 + $0x244] ss:$16 sps:$4 sm:$0xff]  }
 0x2c7   :  { %v6066_v53 = vld [vmem:[#allocation11 + $0x260] ss:$16 sps:$4 sm:$0xff]  }
 0x2c8   :  { %2508 = vmatpush2.bf16.msra.mxu0 %v5545_v63  ;;  %v932_v63 = vrot.slane %v6998_v61, %v6949_v37  ;;  %v6069_v58 = vld [vmem:[#allocation11 + $0x40] ss:$16 sps:$4 sm:$0xff]  }
 0x2c9   :  { %2549 = vmatpush2.bf16.msra.mxu1 %v5673_v0  ;;  %2509 = vmatprep.subr.bf16.mxu0 %v5538_v1 }
 0x2ca   :  { %2550 = vmatprep.subr.bf16.mxu1 %v5666_v2 }
 0x2cc   :  { %2510 = vmatpush2.bf16.msra.mxu0 %v5537_v7 }
 0x2cd   :  { %2551 = vmatpush2.bf16.msra.mxu1 %v5665_v8  ;;  %2511 = vmatprep.subr.bf16.mxu0 %v5530_v9 }
 0x2ce   :  { %2552 = vmatprep.subr.bf16.mxu1 %v5658_v5 }
 0x2d0   :  { %2512 = vmatpush2.bf16.msra.mxu0 %v5529_v47 }
 0x2d1   :  { %2553 = vmatpush2.bf16.msra.mxu1 %v5657_v18  ;;  %2513 = vmatprep.subr.bf16.mxu0 %v5522_v19 }
 0x2d2   :  { %2554 = vmatprep.subr.bf16.mxu1 %v5650_v20 }
 0x2d4   :  { %2514 = vmatpush2.bf16.msra.mxu0 %v5521_v29 }
 0x2d5   :  { %2555 = vmatpush2.bf16.msra.mxu1 %v5649_v30  ;;  %2515 = vmatprep.subr.bf16.mxu0 %v5514_v31  ;;  %v6041_v30 = vld [vmem:[#allocation11 + $0xe4] ss:$16 sps:$4 sm:$0xff]  }
 0x2d6   :  { %2556 = vmatprep.subr.bf16.mxu1 %v5642_v33  ;;  %v6044_v31 = vld [vmem:[#allocation11 + $0x2e4] ss:$16 sps:$4 sm:$0xff]   ;;  %v6039_v33 = vld [vmem:[#allocation11 + $0xe0] ss:$16 sps:$4 sm:$0xff]  }
 0x2d8   :  { %2516 = vmatpush2.bf16.msra.mxu0 %v5513_v39  ;;  %v6048_v39 = vld [vmem:[#allocation11 + $0x2c0] ss:$16 sps:$4 sm:$0xff]  }
 0x2d9   :  { %2557 = vmatpush2.bf16.msra.mxu1 %v5641_v40  ;;  %2517 = vmatprep.subr.bf16.mxu0 %v5506_v41  ;;  %v6053_v40 = vld [vmem:[#allocation11 + $0xa4] ss:$16 sps:$4 sm:$0xff]  }
 0x2da   :  { %2558 = vmatprep.subr.bf16.mxu1 %v5634_v42  ;;  %v6056_v41 = vld [vmem:[#allocation11 + $0x2a4] ss:$16 sps:$4 sm:$0xff]   ;;  %v6051_v42 = vld [vmem:[#allocation11 + $0xa0] ss:$16 sps:$4 sm:$0xff]  }
 0x2dc   :  { %2518 = vmatpush2.bf16.msra.mxu0 %v5505_v49  ;;  %v6062_v49 = vld [vmem:[#allocation11 + $0x284] ss:$16 sps:$4 sm:$0xff]  }
 0x2dd   :  { %2559 = vmatpush2.bf16.msra.mxu1 %v5633_v50  ;;  %2519 = vmatprep.subr.bf16.mxu0 %v5498_v51  ;;  %v6065_v50 = vld [vmem:[#allocation11 + $0x64] ss:$16 sps:$4 sm:$0xff]  }
 0x2de   :  { %2560 = vmatprep.subr.bf16.mxu1 %v5626_v52  ;;  %v6068_v51 = vld [vmem:[#allocation11 + $0x264] ss:$16 sps:$4 sm:$0xff]   ;;  %v6063_v52 = vld [vmem:[#allocation11 + $0x60] ss:$16 sps:$4 sm:$0xff]  }
 0x2e0   :  { %2520 = vmatpush2.bf16.msra.mxu0 %v5497_v59  ;;  %v6072_v59 = vld [vmem:[#allocation11 + $0x240] ss:$16 sps:$4 sm:$0xff]  }
 0x2e1   :  { %2561 = vmatpush2.bf16.msra.mxu1 %v5625_v16  ;;  %2521 = vmatprep.subr.bf16.mxu0 %v5490_v22  ;;  %v6077_v16 = vld [vmem:[#allocation11 + $0x24] ss:$16 sps:$4 sm:$0xff]  }
 0x2e2   :  { %2562 = vmatprep.subr.bf16.mxu1 %v5618_v15  ;;  %v6080_v22 = vld [vmem:[#allocation11 + $0x224] ss:$16 sps:$4 sm:$0xff]   ;;  %v6075_v15 = vld [vmem:[#allocation11 + $0x20] ss:$16 sps:$4 sm:$0xff]  }
 0x2e4   :  { %2522 = vmatpush2.bf16.msra.mxu0 %v5489_v21  ;;  %v6078_v21 = vld [vmem:[#allocation11 + $0x220] ss:$16 sps:$4 sm:$0xff]  }
 0x2e5   :  { %2563 = vmatpush2.bf16.msra.mxu1 %v5617_v60  ;;  %4517 = vmatprep.subr.bf16.mxu0 %v6041_v30  ;;  %v6083_v60 = vld [vmem:[#allocation11 + $0x4] ss:$16 sps:$4 sm:$0xff]  }
 0x2e6   :  { %4558 = vmatprep.subr.bf16.mxu1 %v6044_v31  ;;  %v6099_v31 = vld [vmem:[#allocation11 + $0x1a0] ss:$16 sps:$4 sm:$0xff]  }
 0x2e7   :  { %2524 = vmatmul.mubr.bf16.vlgmr.msra.gmra.mxu0 %v6974_v48  ;;  %v2279_v0 = vpop.f32.mrf.mxu0  ;;  %v2320_v1 = vpop.f32.mrf.mxu1  ;;  %v940_v48 = vrot.slane %v6998_v61, %v6946_v36 }
 0x2e8   :  { %2565 = vmatmul.mubr.bf16.vlgmr.msra.gmra.mxu1 %v6976_v6  ;;  %v2280_v2 = vadd.f32 %v2279_v0, %v928_v62  ;;  %4518 = vmatpush1.bf16.msra.mxu0 %v6039_v33  ;;  %v6086_v62 = vld [vmem:[#allocation11 + $0x204] ss:$16 sps:$4 sm:$0xff]   ;;  %v6084_v0 = vld [vmem:[#allocation11 + $0x200] ss:$16 sps:$4 sm:$0xff]  }
 0x2e9   :  { %v2281_v3 = vpop.f32.mrf.mxu0  ;;  %v2322_v56 = vpop.f32.mrf.mxu1  ;;  %4559 = vmatpush1.bf16.msra.mxu1 %v6042_v34  ;;  %4519 = vmatprep.subr.bf16.mxu0 %v6047_v35  ;;  %v6102_v33 = vld [vmem:[#allocation11 + $0x3a0] ss:$16 sps:$4 sm:$0xff]  }
 0x2ea   :  { %v7006_v4 = vadd.f32 %v2320_v1, %v2280_v2  ;;  %v2282_v55 = vadd.f32 %v2281_v3, %v932_v63  ;;  %4560 = vmatprep.subr.bf16.mxu1 %v6050_v32  ;;  %v6081_v63 = vld [vmem:[#allocation11] ss:$16 sps:$4 sm:$0xff]   ;;  %v7019_v1 = vsub.s32 4, %v6931_v11  ;;  %v7022_v2 = vsub.s32 5, %v6931_v11  ;;  %v6089_v3 = vld [vmem:[#allocation11 + $0x1e4] ss:$16 sps:$4 sm:$0xff]  }
 0x2eb   :  { %v2283_v7 = vpop.f32.mrf.mxu0  ;;  %v2324_v8 = vpop.f32.mrf.mxu1 }
 0x2ec   :  { %v7008_v9 = vadd.f32 %v2322_v56, %v2282_v55  ;;  %4520 = vmatpush1.bf16.msra.mxu0 %v6045_v38  ;;  %v6092_v56 = vld [vmem:[#allocation11 + $0x3e4] ss:$16 sps:$4 sm:$0xff]   ;;  %v6087_v55 = vld [vmem:[#allocation11 + $0x1e0] ss:$16 sps:$4 sm:$0xff]   ;;  %v944_v8 = vrot.slane %v6998_v61, %v7019_v1 }
 0x2ed   :  { %v2284_v5 = vpop.f32.mrf.mxu0  ;;  %v2325_v10 = vpop.f32.mrf.mxu1  ;;  %4561 = vmatpush1.bf16.msra.mxu1 %v6048_v39  ;;  %4521 = vmatprep.subr.bf16.mxu0 %v6053_v40  ;;  %v6090_v7 = vld [vmem:[#allocation11 + $0x3e0] ss:$16 sps:$4 sm:$0xff]   ;;  %v6107_v39 = vld [vmem:[#allocation11 + $0x184] ss:$16 sps:$4 sm:$0xff]  }
 0x2ee   :  { %4562 = vmatprep.subr.bf16.mxu1 %v6056_v41  ;;  %v948_v5 = vrot.slane %v6998_v61, %v7022_v2  ;;  %v6095_v10 = vld [vmem:[#allocation11 + $0x1c4] ss:$16 sps:$4 sm:$0xff]   ;;  %v6105_v41 = vld [vmem:[#allocation11 + $0x180] ss:$16 sps:$4 sm:$0xff]  }
 0x2ef   :  { %v6110_v40 = vld [vmem:[#allocation11 + $0x384] ss:$16 sps:$4 sm:$0xff]  }
 0x2f0   :  { %4522 = vmatpush1.bf16.msra.mxu0 %v6051_v42  ;;  %v6108_v42 = vld [vmem:[#allocation11 + $0x380] ss:$16 sps:$4 sm:$0xff]  }
 0x2f1   :  { %4563 = vmatpush1.bf16.msra.mxu1 %v6054_v43  ;;  %4523 = vmatprep.subr.bf16.mxu0 %v6059_v44  ;;  %v6113_v43 = vld [vmem:[#allocation11 + $0x164] ss:$16 sps:$4 sm:$0xff]  }
 0x2f2   :  { %4564 = vmatprep.subr.bf16.mxu1 %v6062_v49  ;;  %v6116_v44 = vld [vmem:[#allocation11 + $0x364] ss:$16 sps:$4 sm:$0xff]   ;;  %v6117_v49 = vld [vmem:[#allocation11 + $0x140] ss:$16 sps:$4 sm:$0xff]  }
 0x2f4   :  { %4524 = vmatpush1.bf16.msra.mxu0 %v6057_v45  ;;  %v6111_v45 = vld [vmem:[#allocation11 + $0x160] ss:$16 sps:$4 sm:$0xff]  }
 0x2f5   :  { %4565 = vmatpush1.bf16.msra.mxu1 %v6060_v46  ;;  %4525 = vmatprep.subr.bf16.mxu0 %v6065_v50  ;;  %v6114_v46 = vld [vmem:[#allocation11 + $0x360] ss:$16 sps:$4 sm:$0xff]   ;;  %v6119_v50 = vld [vmem:[#allocation11 + $0x144] ss:$16 sps:$4 sm:$0xff]  }
 0x2f6   :  { %4566 = vmatprep.subr.bf16.mxu1 %v6068_v51  ;;  %v6120_v51 = vld [vmem:[#allocation11 + $0x340] ss:$16 sps:$4 sm:$0xff]  }
 0x2f8   :  { %4526 = vmatpush1.bf16.msra.mxu0 %v6063_v52  ;;  %v6122_v52 = vld [vmem:[#allocation11 + $0x344] ss:$16 sps:$4 sm:$0xff]  }
 0x2f9   :  { %4567 = vmatpush1.bf16.msra.mxu1 %v6066_v53  ;;  %4527 = vmatprep.subr.bf16.mxu0 %v6071_v54  ;;  %v6125_v53 = vld [vmem:[#allocation11 + $0x124] ss:$16 sps:$4 sm:$0xff]   ;;  %v6123_v54 = vld [vmem:[#allocation11 + $0x120] ss:$16 sps:$4 sm:$0xff]  }
 0x2fa   :  { %4568 = vmatprep.subr.bf16.mxu1 %v6074_v57  ;;  %v6128_v57 = vld [vmem:[#allocation11 + $0x324] ss:$16 sps:$4 sm:$0xff]  }
 0x2fc   :  { %4528 = vmatpush1.bf16.msra.mxu0 %v6069_v58  ;;  %v6126_v58 = vld [vmem:[#allocation11 + $0x320] ss:$16 sps:$4 sm:$0xff]  }
 0x2fd   :  { %4569 = vmatpush1.bf16.msra.mxu1 %v6072_v59  ;;  %4529 = vmatprep.subr.bf16.mxu0 %v6077_v16  ;;  %v6131_v59 = vld [vmem:[#allocation11 + $0x104] ss:$16 sps:$4 sm:$0xff]  }
 0x2fe   :  { %4570 = vmatprep.subr.bf16.mxu1 %v6080_v22  ;;  %v6134_v16 = vld [vmem:[#allocation11 + $0x304] ss:$16 sps:$4 sm:$0xff]   ;;  %v6129_v22 = vld [vmem:[#allocation11 + $0x100] ss:$16 sps:$4 sm:$0xff]  }
 0x300   :  { %4530 = vmatpush1.bf16.msra.mxu0 %v6075_v15  ;;  %v6132_v15 = vld [vmem:[#allocation11 + $0x300] ss:$16 sps:$4 sm:$0xff]  }
 0x301   :  { %4571 = vmatpush1.bf16.msra.mxu1 %v6078_v21  ;;  %4531 = vmatprep.subr.bf16.mxu0 %v6083_v60  ;;  %v6137_v60 = vld [vmem:[#allocation11 + $0x4e4] ss:$16 sps:$4 sm:$0xff]  }
 0x302   :  { %4572 = vmatprep.subr.bf16.mxu1 %v6086_v62  ;;  %v6140_v62 = vld [vmem:[#allocation11 + $0x6e4] ss:$16 sps:$4 sm:$0xff]  }
 0x304   :  { %4532 = vmatpush1.bf16.msra.mxu0 %v6081_v63  ;;  %v7034_v63 = vmax.f32 %v7008_v9, 0.0 }
 0x305   :  { %4573 = vmatpush1.bf16.msra.mxu1 %v6084_v0  ;;  %4533 = vmatprep.subr.bf16.mxu0 %v6089_v3  ;;  %v7040_v3 = vmax.f32 %v7006_v4, 0.0 }
 0x306   :  { %4574 = vmatprep.subr.bf16.mxu1 %v6092_v56 }
 0x307   :  { %v2583_v9 = vrot.slane %v7040_v3, 4 }
 0x308   :  { %4534 = vmatpush2.bf16.msra.mxu0 %v6087_v55 }
 0x309   :  { %4575 = vmatpush2.bf16.msra.mxu1 %v6090_v7  ;;  %4535 = vmatprep.subr.bf16.mxu0 %v6095_v10 }
 0x327   :  { %v2361_v13 = vpop.f32.mrf.mxu0  ;;  %v2402_v6 = vpop.f32.mrf.mxu1 }
 0x328   :  { %v2362_v17 = vadd.f32 %v2361_v13, %v936_v12  ;;  %v6098_v12 = vld [vmem:[#allocation11 + $0x3c4] ss:$16 sps:$4 sm:$0xff]   ;;  %v6093_v13 = vld [vmem:[#allocation11 + $0x1c0] ss:$16 sps:$4 sm:$0xff]  }
 0x329   :  { %v2363_v47 = vpop.f32.mrf.mxu0  ;;  %v2404_v18 = vpop.f32.mrf.mxu1  ;;  %4576 = vmatprep.subr.bf16.mxu1 %v6098_v12  ;;  %4536 = vmatpush2.bf16.msra.mxu0 %v6093_v13 }
 0x32a   :  { %v7014_v19 = vadd.f32 %v2402_v6, %v2362_v17  ;;  %v2364_v20 = vadd.f32 %v2363_v47, %v940_v48  ;;  %v6096_v6 = vld [vmem:[#allocation11 + $0x3c0] ss:$16 sps:$4 sm:$0xff]  }
 0x32b   :  { %v2365_v24 = vpop.f32.mrf.mxu0  ;;  %v2406_v25 = vpop.f32.mrf.mxu1  ;;  %4577 = vmatpush2.bf16.msra.mxu1 %v6096_v6 }
 0x32c   :  { %v7016_v26 = vadd.f32 %v2404_v18, %v2364_v20  ;;  %v7037_v0 = vmax.f32 %v7014_v19, 0.0 }
 0x32d   :  { %v2366_v28 = vpop.f32.mrf.mxu0  ;;  %v2407_v29 = vpop.f32.mrf.mxu1 }
 0x32e   :  { %v6101_v28 = vld [vmem:[#allocation11 + $0x1a4] ss:$16 sps:$4 sm:$0xff]   ;;  %v7031_v21 = vmax.f32 %v7016_v26, 0.0  ;;  %v2589_v26 = vrot.slane %v7034_v63, 4  ;;  %v2595_v7 = vrot.slane %v7037_v0, 4 }
 0x32f   :  { %v6104_v29 = vld [vmem:[#allocation11 + $0x3a4] ss:$16 sps:$4 sm:$0xff]   ;;  %4537 = vmatprep.subr.bf16.mxu0 %v6101_v28 }
 0x330   :  { %4578 = vmatprep.subr.bf16.mxu1 %v6104_v29  ;;  %4538 = vmatpush2.bf16.msra.mxu0 %v6099_v31  ;;  %v2601_v56 = vrot.slane %v7031_v21, 4  ;;  %v2590_v4 = vadd.f32 %v2589_v26, %v7034_v63  ;;  %v2596_v10 = vadd.f32 %v2595_v7, %v7037_v0 }
 0x331   :  { %4579 = vmatpush2.bf16.msra.mxu1 %v6102_v33  ;;  %4539 = vmatprep.subr.bf16.mxu0 %v6107_v39 }
 0x332   :  { %4580 = vmatprep.subr.bf16.mxu1 %v6110_v40  ;;  %v2602_v19 = vadd.f32 %v2601_v56, %v7031_v21 }
 0x334   :  { %4540 = vmatpush2.bf16.msra.mxu0 %v6105_v41  ;;  %v2603_v13 = vrot.slane %v2602_v19, 2 }
 0x335   :  { %4581 = vmatpush2.bf16.msra.mxu1 %v6108_v42  ;;  %4541 = vmatprep.subr.bf16.mxu0 %v6113_v43 }
 0x336   :  { %4582 = vmatprep.subr.bf16.mxu1 %v6116_v44 }
 0x338   :  { %4542 = vmatpush2.bf16.msra.mxu0 %v6111_v45 }
 0x339   :  { %4583 = vmatpush2.bf16.msra.mxu1 %v6114_v46  ;;  %4543 = vmatprep.subr.bf16.mxu0 %v6119_v50 }
 0x33a   :  { %4584 = vmatprep.subr.bf16.mxu1 %v6122_v52 }
 0x33c   :  { %4544 = vmatpush2.bf16.msra.mxu0 %v6117_v49 }
 0x33d   :  { %4585 = vmatpush2.bf16.msra.mxu1 %v6120_v51  ;;  %4545 = vmatprep.subr.bf16.mxu0 %v6125_v53  ;;  %v7066_v53 = vsub.s32 6, %v6931_v11 }
 0x33e   :  { %4586 = vmatprep.subr.bf16.mxu1 %v6128_v57 }
 0x340   :  { %4546 = vmatpush2.bf16.msra.mxu0 %v6123_v54 }
 0x341   :  { %4587 = vmatpush2.bf16.msra.mxu1 %v6126_v58  ;;  %4547 = vmatprep.subr.bf16.mxu0 %v6131_v59  ;;  %v7075_v59 = vsub.s32 7, %v6931_v11 }
 0x342   :  { %4588 = vmatprep.subr.bf16.mxu1 %v6134_v16 }
 0x343   :  { %v956_v11 = vrot.slane %v6998_v61, %v7075_v59 }
 0x344   :  { %4548 = vmatpush2.bf16.msra.mxu0 %v6129_v22 }
 0x345   :  { %4589 = vmatpush2.bf16.msra.mxu1 %v6132_v15  ;;  %4599 = vmatprep.subr.bf16.mxu0 %v6137_v60  ;;  %v952_v60 = vrot.slane %v6998_v61, %v7066_v53 }
 0x346   :  { %4640 = vmatprep.subr.bf16.mxu1 %v6140_v62 }
 0x367   :  { %v2443_v48 = vpop.f32.mrf.mxu0 }
 0x368   :  { %v2444_v17 = vadd.f32 %v2443_v48, %v944_v8  ;;  %v2484_v47 = vpop.f32.mrf.mxu1  ;;  %v2584_v48 = vadd.f32 %v2583_v9, %v7040_v3 }
 0x369   :  { %v2445_v18 = vpop.f32.mrf.mxu0 }
 0x36a   :  { %v7028_v20 = vadd.f32 %v2484_v47, %v2444_v17  ;;  %v2446_v24 = vadd.f32 %v2445_v18, %v948_v5  ;;  %v2486_v25 = vpop.f32.mrf.mxu1  ;;  %v2591_v17 = vrot.slane %v2590_v4, 2  ;;  %v2597_v47 = vrot.slane %v2596_v10, 2 }
 0x36b   :  { %v2447_v30 = vpop.f32.mrf.mxu0 }
 0x36c   :  { %v2487_v34 = vadd.f32 %v2486_v25, %v2446_v24  ;;  %v2488_v35 = vpop.f32.mrf.mxu1  ;;  %v7048_v8 = vmax.f32 %v7028_v20, 0.0  ;;  %v2585_v20 = vrot.slane %v2584_v48, 2  ;;  %v2604_v24 = vadd.f32 %v2603_v13, %v2602_v19 }
 0x36d   :  { %v2448_v32 = vpop.f32.mrf.mxu0  ;;  %v2592_v28 = vadd.f32 %v2591_v17, %v2590_v4  ;;  %v2598_v29 = vadd.f32 %v2597_v47, %v2596_v10 }
 0x36e   :  { %v2489_v38 = vpop.f32.mrf.mxu1  ;;  %v7043_v55 = vmax.f32 %v2487_v34, 0.0  ;;  %v2607_v12 = vrot.slane %v7048_v8, 4  ;;  %v2586_v31 = vadd.f32 %v2585_v20, %v2584_v48  ;;  %v2605_v33 = vrot.slane %v2604_v24, 1 }
 0x36f   :  { %v2593_v35 = vrot.slane %v2592_v28, 1  ;;  %v2599_v32 = vrot.slane %v2598_v29, 1 }
 0x370   :  { %v2613_v5 = vrot.slane %v7043_v55, 4  ;;  %v2608_v18 = vadd.f32 %v2607_v12, %v7048_v8  ;;  %v2587_v39 = vrot.slane %v2586_v31, 1  ;;  %v2606_v40 = vadd.f32 %v2605_v33, %v2604_v24 }
 0x371   :  { %v2594_v42 = vadd.f32 %v2593_v35, %v2592_v28  ;;  %v2600_v43 = vadd.f32 %v2599_v32, %v2598_v29 }
 0x372   :  { %v2614_v6 = vadd.f32 %v2613_v5, %v7043_v55  ;;  %v2609_v30 = vrot.slane %v2608_v18, 2  ;;  %v2588_v45 = vadd.f32 %v2587_v39, %v2586_v31  ;;  %v7059_v46 = vmul.f32 0.125, %v2606_v40 }
 0x373   :  { %v7061_v50 = vmul.f32 0.125, %v2594_v42  ;;  %v7063_v51 = vmul.f32 0.125, %v2600_v43 }
 0x374   :  { %v2615_v25 = vrot.slane %v2614_v6, 2  ;;  %v2610_v38 = vadd.f32 %v2609_v30, %v2608_v18  ;;  %v7068_v54 = vmul.f32 0.125, %v2588_v45  ;;  %v2642_v57 = vsub.f32 %v7031_v21, %v7059_v46 }
 0x375   :  { %v2640_v16 = vsub.f32 %v7034_v63, %v7061_v50  ;;  %v2641_v22 = vsub.f32 %v7037_v0, %v7063_v51 }
 0x376   :  { %v2616_v34 = vadd.f32 %v2615_v25, %v2614_v6  ;;  %v2611_v44 = vrot.slane %v2610_v38, 1  ;;  %v2639_v62 = vsub.f32 %v7040_v3, %v7068_v54  ;;  %v2650_v56 = vmul.f32 %v2642_v57, %v2642_v57 }
 0x377   :  { %v2648_v7 = vmul.f32 %v2640_v16, %v2640_v16  ;;  %v2649_v19 = vmul.f32 %v2641_v22, %v2641_v22 }
 0x378   :  { %v2617_v41 = vrot.slane %v2616_v34, 1  ;;  %v2612_v52 = vadd.f32 %v2611_v44, %v2610_v38  ;;  %v2647_v12 = vmul.f32 %v2639_v62, %v2639_v62  ;;  %v2673_v13 = vrot.slane %v2650_v56, 4 }
 0x379   :  { %v2661_v20 = vrot.slane %v2648_v7, 4  ;;  %v2667_v25 = vrot.slane %v2649_v19, 4 }
 0x37a   :  { %v2618_v49 = vadd.f32 %v2617_v41, %v2616_v34  ;;  %v7081_v15 = vmul.f32 0.125, %v2612_v52  ;;  %v2655_v31 = vrot.slane %v2647_v12, 4  ;;  %v2674_v34 = vadd.f32 %v2673_v13, %v2650_v56 }
 0x37b   :  { %v2662_v40 = vadd.f32 %v2661_v20, %v2648_v7  ;;  %v2668_v41 = vadd.f32 %v2667_v25, %v2649_v19 }
 0x37c   :  { %v7072_v58 = vmul.f32 0.125, %v2618_v49  ;;  %v2643_v5 = vsub.f32 %v7048_v8, %v7081_v15  ;;  %v2656_v45 = vadd.f32 %v2655_v31, %v2647_v12  ;;  %v2675_v49 = vrot.slane %v2674_v34, 2 }
 0x37d   :  { %v2663_v22 = vrot.slane %v2662_v40, 2 }
 0x37e   :  { %v2644_v26 = vsub.f32 %v7043_v55, %v7072_v58  ;;  %v2651_v28 = vmul.f32 %v2643_v5, %v2643_v5 }
 0x380   :  { %v2652_v6 = vmul.f32 %v2644_v26, %v2644_v26  ;;  %v2679_v42 = vrot.slane %v2651_v28, 4 }
 0x382   :  { %v2685_v35 = vrot.slane %v2652_v6, 4  ;;  %v2680_v62 = vadd.f32 %v2679_v42, %v2651_v28 }
 0x384   :  { %v2686_v52 = vadd.f32 %v2685_v35, %v2652_v6 }
 0x386   :  { %v2687_v7 = vrot.slane %v2686_v52, 2 }
 0x3a7   :  { %v2525_v9 = vpop.f32.mrf.mxu0 }
 0x3a8   :  { %v2526_v4 = vadd.f32 %v2525_v9, %v952_v60  ;;  %v2566_v10 = vpop.f32.mrf.mxu1  ;;  %v2669_v60 = vrot.slane %v2668_v41, 2  ;;  %v2676_v9 = vadd.f32 %v2675_v49, %v2674_v34 }
 0x3a9   :  { %v2527_v48 = vpop.f32.mrf.mxu0 }
 0x3aa   :  { %v2567_v17 = vadd.f32 %v2566_v10, %v2526_v4  ;;  %v2528_v47 = vadd.f32 %v2527_v48, %v956_v11  ;;  %v2568_v18 = vpop.f32.mrf.mxu1  ;;  %v2657_v11 = vrot.slane %v2656_v45, 2  ;;  %v2664_v4 = vadd.f32 %v2663_v22, %v2662_v40 }
 0x3ab   :  { %v2529_v24 = vpop.f32.mrf.mxu0  ;;  %v2670_v10 = vadd.f32 %v2669_v60, %v2668_v41  ;;  %v2681_v48 = vrot.slane %v2680_v62, 2  ;;  %v2677_v6 = vrot.slane %v2676_v9, 1 }
 0x3ac   :  { %v7093_v61 = vmax.f32 %v2567_v17, 0.0  ;;  %v2569_v29 = vadd.f32 %v2568_v18, %v2528_v47  ;;  %v2570_v30 = vpop.f32.mrf.mxu1  ;;  %v2658_v17 = vadd.f32 %v2657_v11, %v2656_v45  ;;  %v2688_v47 = vadd.f32 %v2687_v7, %v2686_v52 }
 0x3ad   :  { %v2530_v33 = vpop.f32.mrf.mxu0  ;;  %v2665_v24 = vrot.slane %v2664_v4, 1  ;;  %v2671_v25 = vrot.slane %v2670_v10, 1  ;;  %v2682_v28 = vadd.f32 %v2681_v48, %v2680_v62 }
 0x3ae   :  { %v2619_v32 = vrot.slane %v7093_v61, 4  ;;  %v7096_v38 = vmax.f32 %v2569_v29, 0.0  ;;  %v2571_v39 = vpop.f32.mrf.mxu1  ;;  %v2659_v31 = vrot.slane %v2658_v17, 1  ;;  %v2678_v33 = vadd.f32 %v2677_v6, %v2676_v9 }
 0x3af   :  { %v2689_v34 = vrot.slane %v2688_v47, 1  ;;  %v2666_v39 = vadd.f32 %v2665_v24, %v2664_v4  ;;  %v2672_v40 = vadd.f32 %v2671_v25, %v2670_v10  ;;  %v2683_v41 = vrot.slane %v2682_v28, 1 }
 0x3b0   :  { %v2620_v43 = vadd.f32 %v2619_v32, %v7093_v61  ;;  %v2625_v44 = vrot.slane %v7096_v38, 4  ;;  %v2706_v45 = vmul.f32 0.125, %v2678_v33 }
 0x3b1   :  { %v2690_v49 = vadd.f32 %v2689_v34, %v2688_v47  ;;  %v2705_v22 = vmul.f32 0.125, %v2672_v40  ;;  %v2684_v60 = vadd.f32 %v2683_v41, %v2682_v28 }
 0x3b2   :  { %v2621_v57 = vrot.slane %v2620_v43, 2  ;;  %v2626_v16 = vadd.f32 %v2625_v44, %v7096_v38  ;;  %v2660_v44 = vadd.f32 %v2659_v31, %v2658_v17  ;;  %v2714_v11 = vadd.f32 1e-05, %v2706_v45 }
 0x3b3   :  { %v2708_v9 = vmul.f32 0.125, %v2690_v49  ;;  %v2713_v4 = vadd.f32 1e-05, %v2705_v22  ;;  %v2707_v10 = vmul.f32 0.125, %v2684_v60 }
 0x3b4   :  { %v2622_v56 = vadd.f32 %v2621_v57, %v2620_v43  ;;  %v2627_v26 = vrot.slane %v2626_v16, 2  ;;  %6463 = vrsqrt.f32 %v2714_v11  ;;  %v2581_v11 = vld [vmem:[%s7293_s11] sm:$0xff] }
 0x3b5   :  { %v2716_v17 = vadd.f32 1e-05, %v2708_v9 }
 0x3b6   :  { %v2623_v19 = vrot.slane %v2622_v56, 1  ;;  %v2628_v5 = vadd.f32 %v2627_v26, %v2626_v16  ;;  %v2704_v16 = vmul.f32 0.125, %v2666_v39  ;;  %v2703_v26 = vmul.f32 0.125, %v2660_v44 }
 0x3b8   :  { %v2624_v13 = vadd.f32 %v2623_v19, %v2622_v56  ;;  %v2629_v12 = vrot.slane %v2628_v5, 1 }
 0x3ba   :  { %v7101_v18 = vmul.f32 0.125, %v2624_v13  ;;  %v2630_v20 = vadd.f32 %v2629_v12, %v2628_v5  ;;  %v2712_v5 = vadd.f32 1e-05, %v2704_v16  ;;  %v2711_v12 = vadd.f32 1e-05, %v2703_v26 }
 0x3bc   :  { %v2645_v29 = vsub.f32 %v7093_v61, %v7101_v18  ;;  %v7105_v30 = vmul.f32 0.125, %v2630_v20  ;;  %6465 = vrsqrt.f32 %v2712_v5  ;;  %v2715_v20 = vadd.f32 1e-05, %v2707_v10 }
 0x3bd   :  { %6467 = vrsqrt.f32 %v2713_v4 }
 0x3be   :  { %v2653_v35 = vmul.f32 %v2645_v29, %v2645_v29  ;;  %v2646_v32 = vsub.f32 %v7096_v38, %v7105_v30  ;;  %6469 = vrsqrt.f32 %v2711_v12 }
 0x3bf   :  { %6471 = vrsqrt.f32 %v2716_v17 }
 0x3c0   :  { %v2691_v42 = vrot.slane %v2653_v35, 4  ;;  %v2654_v43 = vmul.f32 %v2646_v32, %v2646_v32  ;;  %6473 = vrsqrt.f32 %v2715_v20 }
 0x3c1   :  { %v6464_v33 = vpop.eup %6463 }
 0x3c2   :  { %v2692_v52 = vadd.f32 %v2691_v42, %v2653_v35  ;;  %v2697_v57 = vrot.slane %v2654_v43, 4 }
 0x3c4   :  { %v2693_v62 = vrot.slane %v2692_v52, 2  ;;  %v2698_v56 = vadd.f32 %v2697_v57, %v2654_v43 }
 0x3c6   :  { %v2694_v7 = vadd.f32 %v2693_v62, %v2692_v52  ;;  %v2699_v19 = vrot.slane %v2698_v56, 2 }
 0x3c8   :  { %v2695_v48 = vrot.slane %v2694_v7, 1  ;;  %v2700_v13 = vadd.f32 %v2699_v19, %v2698_v56 }
 0x3c9   :  { %v6466_v34 = vpop.eup %6465 }
 0x3ca   :  { %v2696_v6 = vadd.f32 %v2695_v48, %v2694_v7  ;;  %v2701_v47 = vrot.slane %v2700_v13, 1  ;;  %v6468_v35 = vpop.eup %6467 }
 0x3cb   :  { %v6470_v32 = vpop.eup %6469  ;;  %v2736_v39 = vcombine.low %v6468_v35, %v6464_v33 }
 0x3cc   :  { %v2709_v24 = vmul.f32 0.125, %v2696_v6  ;;  %v2702_v25 = vadd.f32 %v2701_v47, %v2700_v13  ;;  %v6472_v40 = vpop.eup %6471  ;;  %v2735_v41 = vcombine.low %v6470_v32, %v6466_v34 }
 0x3cd   :  { %v6474_v42 = vpop.eup %6473  ;;  %v2752_v44 = vrot.slane %v2736_v39, %v6934_v14 }
 0x3ce   :  { %v2717_v28 = vadd.f32 1e-05, %v2709_v24  ;;  %v2710_v29 = vmul.f32 0.125, %v2702_v25  ;;  %v2737_v45 = vcombine.low %v6474_v42, %v6472_v40  ;;  %v2745_v52 = vrot.slane %v2735_v41, %v6934_v14 }
 0x3d0   :  { %v2718_v31 = vadd.f32 1e-05, %v2710_v29  ;;  %6475 = vrsqrt.f32 %v2717_v28  ;;  %v2767_v16 = vcombine.low %v2745_v52, %v2752_v44  ;;  %v2759_v22 = vrot.slane %v2737_v45, %v6934_v14 }
 0x3d2   :  { %6477 = vrsqrt.f32 %v2718_v31  ;;  %v2775_v56 = vrot.slane %v2767_v16, %v6934_v14 }
 0x3dd   :  { %v6476_v43 = vpop.eup %6475 }
 0x3df   :  { %v6478_v49 = vpop.eup %6477 }
 0x3e0   :  { %v2738_v57 = vcombine.low %v6476_v43, %v6478_v49 }
 0x3e2   :  { %v2766_v60 = vrot.slane %v2738_v57, %v6934_v14 }
 0x3e4   :  { %v2768_v62 = vcombine.low %v2759_v22, %v2766_v60 }
 0x3e6   :  { %v2782_v26 = vrot.slane %v2768_v62, %v6934_v14 }
 0x3e8   :  { %v2783_v9 = vcombine.low %v2775_v56, %v2782_v26 }
 0x3ea   :  { %v2785_v7 = vmul.f32 %v2783_v9, %v2581_v11 }
 0x3ec   :  { %v2806_v19 = vrot.slane %v2785_v7, %v7019_v1  ;;  %v2810_v5 = vrot.slane %v2785_v7, %v7022_v2  ;;  %v2814_v4 = vrot.slane %v2785_v7, %v7066_v53  ;;  %v2818_v10 = vrot.slane %v2785_v7, %v7075_v59 }
 0x3ed   :  { %v2790_v48 = vrot.slane %v2785_v7, %v6939_v27  ;;  %v2794_v13 = vrot.slane %v2785_v7, %v6949_v37  ;;  %v2798_v12 = vrot.slane %v2785_v7, %v6942_v23  ;;  %v2802_v17 = vrot.slane %v2785_v7, %v6946_v36 }
 0x3ee   :  { %v2831_v6 = vmul.f32 %v2806_v19, %v7081_v15  ;;  %v2832_v47 = vmul.f32 %v2810_v5, %v7072_v58  ;;  %v2833_v20 = vmul.f32 %v2814_v4, %v7101_v18  ;;  %v2834_v24 = vmul.f32 %v2818_v10, %v7105_v30 }
 0x3ef   :  { %v2827_v25 = vmul.f32 %v2790_v48, %v7068_v54  ;;  %v2828_v28 = vmul.f32 %v2794_v13, %v7061_v50  ;;  %v2829_v29 = vmul.f32 %v2798_v12, %v7063_v51  ;;  %v2830_v31 = vmul.f32 %v2802_v17, %v7059_v46  ;;  %v2582_v46 = vld [vmem:[%s7294_s12] sm:$0xff] }
 0x3f0   :  { %v2845_v33 = vcombine.low %v2831_v6, %v2832_v47  ;;  %v2846_v34 = vcombine.low %v2833_v20, %v2834_v24  ;;  %v2895_v41 = vmul.f32 %v2794_v13, %v7034_v63  ;;  %v2897_v43 = vmul.f32 %v2802_v17, %v7031_v21  ;;  %v6144_v17 = vld [vmem:[#allocation11 + $0x6c0] ss:$16 sps:$4 sm:$0xff]   ;;  %v6149_v6 = vld [vmem:[#allocation11 + $0x4a4] ss:$16 sps:$4 sm:$0xff]  }
 0x3f1   :  { %v2843_v35 = vcombine.low %v2827_v25, %v2828_v28  ;;  %v2844_v32 = vcombine.low %v2829_v29, %v2830_v31  ;;  %v2894_v44 = vmul.f32 %v2790_v48, %v7040_v3  ;;  %v2896_v45 = vmul.f32 %v2798_v12, %v7037_v0  ;;  %v6141_v12 = vld [vmem:[#allocation11 + $0x4c0] ss:$16 sps:$4 sm:$0xff]   ;;  %v6152_v47 = vld [vmem:[#allocation11 + $0x6a4] ss:$16 sps:$4 sm:$0xff]  }
 0x3f2   :  { %v2867_v15 = vrot.slane %v2845_v33, %v6934_v14  ;;  %v2874_v58 = vrot.slane %v2846_v34, %v6934_v14  ;;  %v2899_v49 = vmul.f32 %v2810_v5, %v7043_v55  ;;  %v2901_v52 = vmul.f32 %v2818_v10, %v7096_v38  ;;  %v6146_v10 = vld [vmem:[#allocation11 + $0x6c4] ss:$16 sps:$4 sm:$0xff]   ;;  %v6147_v20 = vld [vmem:[#allocation11 + $0x4a0] ss:$16 sps:$4 sm:$0xff]  }
 0x3f3   :  { %v2853_v18 = vrot.slane %v2843_v35, %v6934_v14  ;;  %v2860_v30 = vrot.slane %v2844_v32, %v6934_v14  ;;  %v2898_v57 = vmul.f32 %v2806_v19, %v7048_v8  ;;  %v2900_v16 = vmul.f32 %v2814_v4, %v7093_v61  ;;  %v6150_v24 = vld [vmem:[#allocation11 + $0x6a0] ss:$16 sps:$4 sm:$0xff]   ;;  %v6155_v25 = vld [vmem:[#allocation11 + $0x484] ss:$16 sps:$4 sm:$0xff]  }
 0x3f4   :  { %v2876_v39 = vcombine.low %v2867_v15, %v2874_v58  ;;  %v6158_v28 = vld [vmem:[#allocation11 + $0x684] ss:$16 sps:$4 sm:$0xff]   ;;  %v6153_v29 = vld [vmem:[#allocation11 + $0x480] ss:$16 sps:$4 sm:$0xff]  }
 0x3f5   :  { %v2875_v54 = vcombine.low %v2853_v18, %v2860_v30  ;;  %v6156_v31 = vld [vmem:[#allocation11 + $0x680] ss:$16 sps:$4 sm:$0xff]   ;;  %v6161_v33 = vld [vmem:[#allocation11 + $0x464] ss:$16 sps:$4 sm:$0xff]  }
 0x3f6   :  { %v2890_v50 = vrot.slane %v2876_v39, %v6934_v14  ;;  %v6164_v34 = vld [vmem:[#allocation11 + $0x664] ss:$16 sps:$4 sm:$0xff]   ;;  %v6159_v35 = vld [vmem:[#allocation11 + $0x460] ss:$16 sps:$4 sm:$0xff]  }
 0x3f7   :  { %v2883_v51 = vrot.slane %v2875_v54, %v6934_v14  ;;  %v6162_v32 = vld [vmem:[#allocation11 + $0x660] ss:$16 sps:$4 sm:$0xff]   ;;  %v6167_v15 = vld [vmem:[#allocation11 + $0x444] ss:$16 sps:$4 sm:$0xff]  }
 0x3f8   :  { %v6170_v58 = vld [vmem:[#allocation11 + $0x644] ss:$16 sps:$4 sm:$0xff]   ;;  %v6165_v18 = vld [vmem:[#allocation11 + $0x440] ss:$16 sps:$4 sm:$0xff]  }
 0x3f9   :  { %v2891_v40 = vcombine.low %v2883_v51, %v2890_v50  ;;  %v6168_v30 = vld [vmem:[#allocation11 + $0x640] ss:$16 sps:$4 sm:$0xff]   ;;  %v6173_v39 = vld [vmem:[#allocation11 + $0x424] ss:$16 sps:$4 sm:$0xff]  }
 0x3fa   :  { %v6176_v54 = vld [vmem:[#allocation11 + $0x624] ss:$16 sps:$4 sm:$0xff]   ;;  %v6171_v50 = vld [vmem:[#allocation11 + $0x420] ss:$16 sps:$4 sm:$0xff]  }
 0x3fb   :  { %v2893_v42 = vsub.f32 %v2582_v46, %v2891_v40  ;;  %v6174_v51 = vld [vmem:[#allocation11 + $0x620] ss:$16 sps:$4 sm:$0xff]   ;;  %v6179_v46 = vld [vmem:[#allocation11 + $0x404] ss:$16 sps:$4 sm:$0xff]  }
 0x3fc   :  { %v6182_v40 = vld [vmem:[#allocation11 + $0x604] ss:$16 sps:$4 sm:$0xff]  }
 0x3fd   :  { %v2910_v22 = vrot.slane %v2893_v42, %v6949_v37  ;;  %v2918_v60 = vrot.slane %v2893_v42, %v6946_v36  ;;  %v2906_v63 = vrot.slane %v2893_v42, %v6939_v27  ;;  %v2914_v21 = vrot.slane %v2893_v42, %v6942_v23 }
 0x3fe   :  { %v2926_v3 = vrot.slane %v2893_v42, %v7022_v2  ;;  %v2934_v0 = vrot.slane %v2893_v42, %v7075_v59  ;;  %v2922_v55 = vrot.slane %v2893_v42, %v7019_v1  ;;  %v2930_v38 = vrot.slane %v2893_v42, %v7066_v53  ;;  %v6135_v2 = vld [vmem:[#allocation11 + $0x4e0] ss:$16 sps:$4 sm:$0xff]   ;;  %v6143_v53 = vld [vmem:[#allocation11 + $0x4c4] ss:$16 sps:$4 sm:$0xff]  }
 0x3ff   :  { %v2944_v62 = vadd.f32 %v2910_v22, %v2895_v41  ;;  %v2946_v8 = vadd.f32 %v2918_v60, %v2897_v43  ;;  %v2943_v56 = vadd.f32 %v2906_v63, %v2894_v44  ;;  %v2945_v61 = vadd.f32 %v2914_v21, %v2896_v45  ;;  %v6138_v59 = vld [vmem:[#allocation11 + $0x6e0] ss:$16 sps:$4 sm:$0xff]   ;;  %v6185_v43 = vld [vmem:[#allocation11 + $0x5e4] ss:$16 sps:$4 sm:$0xff]  }
 0x400   :  { %v2948_v26 = vadd.f32 %v2926_v3, %v2899_v49  ;;  %v2950_v11 = vadd.f32 %v2934_v0, %v2901_v52  ;;  %v7159_v9 = vadd.f32 %v2922_v55, %v2898_v57  ;;  %v7161_v7 = vadd.f32 %v2930_v38, %v2900_v16  ;;  %v6177_v41 = vld [vmem:[#allocation11 + $0x400] ss:$16 sps:$4 sm:$0xff]   ;;  %v6188_v44 = vld [vmem:[#allocation11 + $0x7e4] ss:$16 sps:$4 sm:$0xff]  }
 0x401   :  { %v7163_v19 = vpack.c.bf16 %v2944_v62, %v2944_v62  ;;  %v7165_v5 = vpack.c.bf16 %v2946_v8, %v2946_v8  ;;  %v7167_v4 = vpack.c.bf16 %v2943_v56, %v2943_v56  ;;  %v7169_v1 = vpack.c.bf16 %v2945_v61, %v2945_v61  ;;  %v6180_v42 = vld [vmem:[#allocation11 + $0x600] ss:$16 sps:$4 sm:$0xff]   ;;  %v6191_v52 = vld [vmem:[#allocation11 + $0x5c4] ss:$16 sps:$4 sm:$0xff]  }
 0x402   :  { %v7175_v48 = vpack.c.bf16 %v2948_v26, %v2948_v26  ;;  %v7177_v13 = vpack.c.bf16 %v2950_v11, %v2950_v11  ;;  %v6183_v45 = vld [vmem:[#allocation11 + $0x5e0] ss:$16 sps:$4 sm:$0xff]   ;;  %v6194_v57 = vld [vmem:[#allocation11 + $0x7c4] ss:$16 sps:$4 sm:$0xff]  }
 0x403   :  { %4549 = vmatprep.mubr.bf16.mxu0 %v7163_v19  ;;  %4590 = vmatprep.mubr.bf16.mxu1 %v7165_v5  ;;  %v6186_v49 = vld [vmem:[#allocation11 + $0x7e0] ss:$16 sps:$4 sm:$0xff]   ;;  %v6197_v60 = vld [vmem:[#allocation11 + $0x5a4] ss:$16 sps:$4 sm:$0xff]  }
 0x404   :  { %4550 = vmatmul.mubr.bf16.vlgmr.msra.gmra.mxu0 %v7167_v4  ;;  %4591 = vmatmul.mubr.bf16.vlgmr.msra.gmra.mxu1 %v7169_v1  ;;  %v6189_v16 = vld [vmem:[#allocation11 + $0x5c0] ss:$16 sps:$4 sm:$0xff]   ;;  %v6200_v63 = vld [vmem:[#allocation11 + $0x7a4] ss:$16 sps:$4 sm:$0xff]  }
 0x405   :  { %4600 = vmatpush1.bf16.msra.mxu0 %v6135_v2  ;;  %4641 = vmatpush1.bf16.msra.mxu1 %v6138_v59  ;;  %v6192_v22 = vld [vmem:[#allocation11 + $0x7c0] ss:$16 sps:$4 sm:$0xff]   ;;  %v6203_v0 = vld [vmem:[#allocation11 + $0x584] ss:$16 sps:$4 sm:$0xff]  }
 0x406   :  { %4631 = vmatprep.mubr.bf16.mxu0 %v7175_v48  ;;  %4672 = vmatprep.mubr.bf16.mxu1 %v7177_v13  ;;  %v6195_v21 = vld [vmem:[#allocation11 + $0x5a0] ss:$16 sps:$4 sm:$0xff]   ;;  %v6206_v55 = vld [vmem:[#allocation11 + $0x784] ss:$16 sps:$4 sm:$0xff]  }
 0x407   :  { %4601 = vmatprep.subr.bf16.mxu0 %v6143_v53  ;;  %4642 = vmatprep.subr.bf16.mxu1 %v6146_v10  ;;  %v6198_v3 = vld [vmem:[#allocation11 + $0x7a0] ss:$16 sps:$4 sm:$0xff]   ;;  %v6209_v8 = vld [vmem:[#allocation11 + $0x564] ss:$16 sps:$4 sm:$0xff]  }
 0x408   :  { %v6201_v38 = vld [vmem:[#allocation11 + $0x580] ss:$16 sps:$4 sm:$0xff]   ;;  %v6212_v56 = vld [vmem:[#allocation11 + $0x764] ss:$16 sps:$4 sm:$0xff]  }
 0x409   :  { %4602 = vmatpush1.bf16.msra.mxu0 %v6141_v12  ;;  %4643 = vmatpush1.bf16.msra.mxu1 %v6144_v17  ;;  %v6204_v62 = vld [vmem:[#allocation11 + $0x780] ss:$16 sps:$4 sm:$0xff]   ;;  %v6215_v11 = vld [vmem:[#allocation11 + $0x544] ss:$16 sps:$4 sm:$0xff]  }
 0x40a   :  { %4603 = vmatprep.subr.bf16.mxu0 %v6149_v6  ;;  %4644 = vmatprep.subr.bf16.mxu1 %v6152_v47  ;;  %v6207_v61 = vld [vmem:[#allocation11 + $0x560] ss:$16 sps:$4 sm:$0xff]   ;;  %v6218_v2 = vld [vmem:[#allocation11 + $0x744] ss:$16 sps:$4 sm:$0xff]  }
 0x40b   :  { %v6210_v26 = vld [vmem:[#allocation11 + $0x760] ss:$16 sps:$4 sm:$0xff]   ;;  %v6221_v10 = vld [vmem:[#allocation11 + $0x524] ss:$16 sps:$4 sm:$0xff]  }
 0x40c   :  { %v6213_v59 = vld [vmem:[#allocation11 + $0x540] ss:$16 sps:$4 sm:$0xff]   ;;  %v6224_v12 = vld [vmem:[#allocation11 + $0x724] ss:$16 sps:$4 sm:$0xff]  }
 0x40d   :  { %4604 = vmatpush1.bf16.msra.mxu0 %v6147_v20  ;;  %4645 = vmatpush1.bf16.msra.mxu1 %v6150_v24  ;;  %v6216_v53 = vld [vmem:[#allocation11 + $0x740] ss:$16 sps:$4 sm:$0xff]   ;;  %v6227_v47 = vld [vmem:[#allocation11 + $0x504] ss:$16 sps:$4 sm:$0xff]  }
 0x40e   :  { %4605 = vmatprep.subr.bf16.mxu0 %v6155_v25  ;;  %4646 = vmatprep.subr.bf16.mxu1 %v6158_v28  ;;  %v6219_v17 = vld [vmem:[#allocation11 + $0x520] ss:$16 sps:$4 sm:$0xff]   ;;  %v6230_v20 = vld [vmem:[#allocation11 + $0x704] ss:$16 sps:$4 sm:$0xff]   ;;  %v6233_v28 = vld [vmem:[#allocation11 + $0xec] ss:$16 sps:$4 sm:$0xff]  }
 0x40f   :  { %v6222_v6 = vld [vmem:[#allocation11 + $0x720] ss:$16 sps:$4 sm:$0xff]  }
 0x410   :  { %v6225_v24 = vld [vmem:[#allocation11 + $0x500] ss:$16 sps:$4 sm:$0xff]  }
 0x411   :  { %4606 = vmatpush1.bf16.msra.mxu0 %v6153_v29  ;;  %4647 = vmatpush1.bf16.msra.mxu1 %v6156_v31  ;;  %v6228_v25 = vld [vmem:[#allocation11 + $0x700] ss:$16 sps:$4 sm:$0xff]   ;;  %v6236_v29 = vld [vmem:[#allocation11 + $0x2ec] ss:$16 sps:$4 sm:$0xff]   ;;  %v6231_v31 = vld [vmem:[#allocation11 + $0xe8] ss:$16 sps:$4 sm:$0xff]  }
 0x412   :  { %4607 = vmatprep.subr.bf16.mxu0 %v6161_v33  ;;  %4648 = vmatprep.subr.bf16.mxu1 %v6164_v34  ;;  %v7183_v33 = vpack.c.bf16 %v7159_v9, %v7159_v9  ;;  %v7187_v34 = vpack.c.bf16 %v7161_v7, %v7161_v7  ;;  %v6240_v9 = vld [vmem:[#allocation11 + $0x2c8] ss:$16 sps:$4 sm:$0xff]   ;;  %v6248_v7 = vld [vmem:[#allocation11 + $0x2ac] ss:$16 sps:$4 sm:$0xff]  }
 0x415   :  { %4608 = vmatpush1.bf16.msra.mxu0 %v6159_v35  ;;  %4649 = vmatpush1.bf16.msra.mxu1 %v6162_v32  ;;  %v6234_v35 = vld [vmem:[#allocation11 + $0x2e8] ss:$16 sps:$4 sm:$0xff]   ;;  %v6239_v32 = vld [vmem:[#allocation11 + $0xcc] ss:$16 sps:$4 sm:$0xff]  }
 0x416   :  { %4609 = vmatprep.subr.bf16.mxu0 %v6167_v15  ;;  %4650 = vmatprep.subr.bf16.mxu1 %v6170_v58  ;;  %v6242_v15 = vld [vmem:[#allocation11 + $0x2cc] ss:$16 sps:$4 sm:$0xff]   ;;  %v6237_v58 = vld [vmem:[#allocation11 + $0xc8] ss:$16 sps:$4 sm:$0xff]  }
 0x419   :  { %4610 = vmatpush1.bf16.msra.mxu0 %v6165_v18  ;;  %4651 = vmatpush1.bf16.msra.mxu1 %v6168_v30  ;;  %v6245_v18 = vld [vmem:[#allocation11 + $0xac] ss:$16 sps:$4 sm:$0xff]   ;;  %v6243_v30 = vld [vmem:[#allocation11 + $0xa8] ss:$16 sps:$4 sm:$0xff]  }
 0x41a   :  { %4611 = vmatprep.subr.bf16.mxu0 %v6173_v39  ;;  %4652 = vmatprep.subr.bf16.mxu1 %v6176_v54  ;;  %v6246_v39 = vld [vmem:[#allocation11 + $0x2a8] ss:$16 sps:$4 sm:$0xff]   ;;  %v6251_v54 = vld [vmem:[#allocation11 + $0x8c] ss:$16 sps:$4 sm:$0xff]  }
 0x41d   :  { %4612 = vmatpush1.bf16.msra.mxu0 %v6171_v50  ;;  %4653 = vmatpush1.bf16.msra.mxu1 %v6174_v51  ;;  %v6254_v50 = vld [vmem:[#allocation11 + $0x28c] ss:$16 sps:$4 sm:$0xff]   ;;  %v6249_v51 = vld [vmem:[#allocation11 + $0x88] ss:$16 sps:$4 sm:$0xff]  }
 0x41e   :  { %4613 = vmatprep.subr.bf16.mxu0 %v6179_v46  ;;  %4654 = vmatprep.subr.bf16.mxu1 %v6182_v40  ;;  %v6257_v46 = vld [vmem:[#allocation11 + $0x6c] ss:$16 sps:$4 sm:$0xff]   ;;  %v6255_v40 = vld [vmem:[#allocation11 + $0x68] ss:$16 sps:$4 sm:$0xff]  }
 0x421   :  { %4614 = vmatpush1.bf16.msra.mxu0 %v6177_v41  ;;  %4655 = vmatpush1.bf16.msra.mxu1 %v6180_v42  ;;  %v6258_v41 = vld [vmem:[#allocation11 + $0x268] ss:$16 sps:$4 sm:$0xff]   ;;  %v6263_v42 = vld [vmem:[#allocation11 + $0x4c] ss:$16 sps:$4 sm:$0xff]  }
 0x422   :  { %4615 = vmatprep.subr.bf16.mxu0 %v6185_v43  ;;  %4656 = vmatprep.subr.bf16.mxu1 %v6188_v44  ;;  %v6266_v43 = vld [vmem:[#allocation11 + $0x24c] ss:$16 sps:$4 sm:$0xff]   ;;  %v6261_v44 = vld [vmem:[#allocation11 + $0x48] ss:$16 sps:$4 sm:$0xff]  }
 0x425   :  { %4616 = vmatpush2.bf16.msra.mxu0 %v6183_v45  ;;  %4657 = vmatpush2.bf16.msra.mxu1 %v6186_v49  ;;  %v6264_v45 = vld [vmem:[#allocation11 + $0x248] ss:$16 sps:$4 sm:$0xff]   ;;  %v6269_v49 = vld [vmem:[#allocation11 + $0x2c] ss:$16 sps:$4 sm:$0xff]  }
 0x426   :  { %4617 = vmatprep.subr.bf16.mxu0 %v6191_v52  ;;  %4658 = vmatprep.subr.bf16.mxu1 %v6194_v57  ;;  %v6272_v52 = vld [vmem:[#allocation11 + $0x22c] ss:$16 sps:$4 sm:$0xff]   ;;  %v6267_v57 = vld [vmem:[#allocation11 + $0x28] ss:$16 sps:$4 sm:$0xff]  }
 0x429   :  { %4618 = vmatpush2.bf16.msra.mxu0 %v6189_v16  ;;  %4659 = vmatpush2.bf16.msra.mxu1 %v6192_v22  ;;  %v6270_v16 = vld [vmem:[#allocation11 + $0x228] ss:$16 sps:$4 sm:$0xff]   ;;  %v6275_v22 = vld [vmem:[#allocation11 + $0xc] ss:$16 sps:$4 sm:$0xff]  }
 0x42a   :  { %4619 = vmatprep.subr.bf16.mxu0 %v6197_v60  ;;  %4660 = vmatprep.subr.bf16.mxu1 %v6200_v63  ;;  %v6278_v60 = vld [vmem:[#allocation11 + $0x20c] ss:$16 sps:$4 sm:$0xff]   ;;  %v6273_v63 = vld [vmem:[#allocation11 + $0x8] ss:$16 sps:$4 sm:$0xff]  }
 0x42d   :  { %4620 = vmatpush2.bf16.msra.mxu0 %v6195_v21  ;;  %4661 = vmatpush2.bf16.msra.mxu1 %v6198_v3  ;;  %v6276_v21 = vld [vmem:[#allocation11 + $0x208] ss:$16 sps:$4 sm:$0xff]   ;;  %v6281_v3 = vld [vmem:[#allocation11 + $0x1ec] ss:$16 sps:$4 sm:$0xff]  }
 0x42e   :  { %4621 = vmatprep.subr.bf16.mxu0 %v6203_v0  ;;  %4662 = vmatprep.subr.bf16.mxu1 %v6206_v55  ;;  %v6284_v0 = vld [vmem:[#allocation11 + $0x3ec] ss:$16 sps:$4 sm:$0xff]   ;;  %v6279_v55 = vld [vmem:[#allocation11 + $0x1e8] ss:$16 sps:$4 sm:$0xff]  }
 0x431   :  { %4622 = vmatpush2.bf16.msra.mxu0 %v6201_v38  ;;  %4663 = vmatpush2.bf16.msra.mxu1 %v6204_v62  ;;  %v6282_v38 = vld [vmem:[#allocation11 + $0x3e8] ss:$16 sps:$4 sm:$0xff]   ;;  %v6287_v62 = vld [vmem:[#allocation11 + $0x1cc] ss:$16 sps:$4 sm:$0xff]  }
 0x432   :  { %4623 = vmatprep.subr.bf16.mxu0 %v6209_v8  ;;  %4664 = vmatprep.subr.bf16.mxu1 %v6212_v56  ;;  %v6290_v8 = vld [vmem:[#allocation11 + $0x3cc] ss:$16 sps:$4 sm:$0xff]   ;;  %v6285_v56 = vld [vmem:[#allocation11 + $0x1c8] ss:$16 sps:$4 sm:$0xff]  }
 0x435   :  { %4624 = vmatpush2.bf16.msra.mxu0 %v6207_v61  ;;  %4665 = vmatpush2.bf16.msra.mxu1 %v6210_v26  ;;  %v6288_v61 = vld [vmem:[#allocation11 + $0x3c8] ss:$16 sps:$4 sm:$0xff]   ;;  %v6293_v26 = vld [vmem:[#allocation11 + $0x1ac] ss:$16 sps:$4 sm:$0xff]  }
 0x436   :  { %4625 = vmatprep.subr.bf16.mxu0 %v6215_v11  ;;  %4666 = vmatprep.subr.bf16.mxu1 %v6218_v2  ;;  %v6296_v11 = vld [vmem:[#allocation11 + $0x3ac] ss:$16 sps:$4 sm:$0xff]   ;;  %v6291_v2 = vld [vmem:[#allocation11 + $0x1a8] ss:$16 sps:$4 sm:$0xff]  }
 0x439   :  { %4626 = vmatpush2.bf16.msra.mxu0 %v6213_v59  ;;  %4667 = vmatpush2.bf16.msra.mxu1 %v6216_v53  ;;  %v6294_v59 = vld [vmem:[#allocation11 + $0x3a8] ss:$16 sps:$4 sm:$0xff]   ;;  %v6299_v53 = vld [vmem:[#allocation11 + $0x18c] ss:$16 sps:$4 sm:$0xff]  }
 0x43a   :  { %4627 = vmatprep.subr.bf16.mxu0 %v6221_v10  ;;  %4668 = vmatprep.subr.bf16.mxu1 %v6224_v12  ;;  %v6302_v10 = vld [vmem:[#allocation11 + $0x38c] ss:$16 sps:$4 sm:$0xff]   ;;  %v6297_v12 = vld [vmem:[#allocation11 + $0x188] ss:$16 sps:$4 sm:$0xff]  }
 0x43d   :  { %4628 = vmatpush2.bf16.msra.mxu0 %v6219_v17  ;;  %4669 = vmatpush2.bf16.msra.mxu1 %v6222_v6  ;;  %v6300_v17 = vld [vmem:[#allocation11 + $0x388] ss:$16 sps:$4 sm:$0xff]   ;;  %v6305_v6 = vld [vmem:[#allocation11 + $0x16c] ss:$16 sps:$4 sm:$0xff]  }
 0x43e   :  { %4629 = vmatprep.subr.bf16.mxu0 %v6227_v47  ;;  %4670 = vmatprep.subr.bf16.mxu1 %v6230_v20  ;;  %v6308_v47 = vld [vmem:[#allocation11 + $0x36c] ss:$16 sps:$4 sm:$0xff]   ;;  %v6303_v20 = vld [vmem:[#allocation11 + $0x168] ss:$16 sps:$4 sm:$0xff]  }
 0x441   :  { %4630 = vmatpush2.bf16.msra.mxu0 %v6225_v24  ;;  %4671 = vmatpush2.bf16.msra.mxu1 %v6228_v25  ;;  %v6306_v24 = vld [vmem:[#allocation11 + $0x368] ss:$16 sps:$4 sm:$0xff]   ;;  %v6311_v25 = vld [vmem:[#allocation11 + $0x14c] ss:$16 sps:$4 sm:$0xff]  }
 0x442   :  { %4681 = vmatprep.subr.bf16.mxu0 %v6233_v28  ;;  %4722 = vmatprep.subr.bf16.mxu1 %v6236_v29  ;;  %v6314_v28 = vld [vmem:[#allocation11 + $0x34c] ss:$16 sps:$4 sm:$0xff]   ;;  %v6309_v29 = vld [vmem:[#allocation11 + $0x148] ss:$16 sps:$4 sm:$0xff]  }
 0x444   :  { %4632 = vmatmul.mubr.bf16.vlgmr.msra.gmra.mxu0 %v7183_v33  ;;  %4673 = vmatmul.mubr.bf16.vlgmr.msra.gmra.mxu1 %v7187_v34 }
 0x445   :  { %4682 = vmatpush1.bf16.msra.mxu0 %v6231_v31  ;;  %4713 = vmatprep.mubr.bf16.mxu0 %v7163_v19  ;;  %v6252_v19 = vld [vmem:[#allocation11 + $0x288] ss:$16 sps:$4 sm:$0xff]  }
 0x446   :  { %4723 = vmatpush1.bf16.msra.mxu1 %v6234_v35  ;;  %4754 = vmatprep.mubr.bf16.mxu1 %v7165_v5  ;;  %v6260_v5 = vld [vmem:[#allocation11 + $0x26c] ss:$16 sps:$4 sm:$0xff]   ;;  %v6312_v31 = vld [vmem:[#allocation11 + $0x348] ss:$16 sps:$4 sm:$0xff]  }
 0x447   :  { %4683 = vmatprep.subr.bf16.mxu0 %v6239_v32  ;;  %4724 = vmatprep.subr.bf16.mxu1 %v6242_v15  ;;  %v6317_v35 = vld [vmem:[#allocation11 + $0x12c] ss:$16 sps:$4 sm:$0xff]   ;;  %v6315_v15 = vld [vmem:[#allocation11 + $0x128] ss:$16 sps:$4 sm:$0xff]  }
 0x448   :  { %v6320_v32 = vld [vmem:[#allocation11 + $0x32c] ss:$16 sps:$4 sm:$0xff]  }
 0x449   :  { %4684 = vmatpush1.bf16.msra.mxu0 %v6237_v58  ;;  %v6318_v58 = vld [vmem:[#allocation11 + $0x328] ss:$16 sps:$4 sm:$0xff]  }
 0x44a   :  { %4725 = vmatpush1.bf16.msra.mxu1 %v6240_v9  ;;  %4685 = vmatprep.subr.bf16.mxu0 %v6245_v18  ;;  %v6323_v9 = vld [vmem:[#allocation11 + $0x10c] ss:$16 sps:$4 sm:$0xff]  }
 0x44b   :  { %4726 = vmatprep.subr.bf16.mxu1 %v6248_v7  ;;  %v6326_v18 = vld [vmem:[#allocation11 + $0x30c] ss:$16 sps:$4 sm:$0xff]   ;;  %v6321_v7 = vld [vmem:[#allocation11 + $0x108] ss:$16 sps:$4 sm:$0xff]  }
 0x44d   :  { %4686 = vmatpush1.bf16.msra.mxu0 %v6243_v30  ;;  %v6324_v30 = vld [vmem:[#allocation11 + $0x308] ss:$16 sps:$4 sm:$0xff]  }
 0x44e   :  { %4727 = vmatpush1.bf16.msra.mxu1 %v6246_v39  ;;  %4687 = vmatprep.subr.bf16.mxu0 %v6251_v54  ;;  %v6329_v39 = vld [vmem:[#allocation11 + $0x4ec] ss:$16 sps:$4 sm:$0xff]  }
 0x44f   :  { %4728 = vmatprep.subr.bf16.mxu1 %v6254_v50  ;;  %v6332_v54 = vld [vmem:[#allocation11 + $0x6ec] ss:$16 sps:$4 sm:$0xff]   ;;  %v6327_v50 = vld [vmem:[#allocation11 + $0x4e8] ss:$16 sps:$4 sm:$0xff]  }
 0x451   :  { %4688 = vmatpush1.bf16.msra.mxu0 %v6249_v51  ;;  %v6330_v51 = vld [vmem:[#allocation11 + $0x6e8] ss:$16 sps:$4 sm:$0xff]  }
 0x452   :  { %4729 = vmatpush1.bf16.msra.mxu1 %v6252_v19  ;;  %4689 = vmatprep.subr.bf16.mxu0 %v6257_v46  ;;  %v6335_v19 = vld [vmem:[#allocation11 + $0x4cc] ss:$16 sps:$4 sm:$0xff]  }
 0x453   :  { %4730 = vmatprep.subr.bf16.mxu1 %v6260_v5  ;;  %v6338_v46 = vld [vmem:[#allocation11 + $0x6cc] ss:$16 sps:$4 sm:$0xff]   ;;  %v6333_v5 = vld [vmem:[#allocation11 + $0x4c8] ss:$16 sps:$4 sm:$0xff]  }
 0x455   :  { %4690 = vmatpush1.bf16.msra.mxu0 %v6255_v40  ;;  %v6336_v40 = vld [vmem:[#allocation11 + $0x6c8] ss:$16 sps:$4 sm:$0xff]  }
 0x456   :  { %4731 = vmatpush1.bf16.msra.mxu1 %v6258_v41  ;;  %4691 = vmatprep.subr.bf16.mxu0 %v6263_v42  ;;  %v6341_v41 = vld [vmem:[#allocation11 + $0x4ac] ss:$16 sps:$4 sm:$0xff]  }
 0x457   :  { %4732 = vmatprep.subr.bf16.mxu1 %v6266_v43  ;;  %v6344_v42 = vld [vmem:[#allocation11 + $0x6ac] ss:$16 sps:$4 sm:$0xff]   ;;  %v6339_v43 = vld [vmem:[#allocation11 + $0x4a8] ss:$16 sps:$4 sm:$0xff]  }
 0x459   :  { %4692 = vmatpush1.bf16.msra.mxu0 %v6261_v44  ;;  %v6347_v44 = vld [vmem:[#allocation11 + $0x48c] ss:$16 sps:$4 sm:$0xff]  }
 0x45a   :  { %4733 = vmatpush1.bf16.msra.mxu1 %v6264_v45  ;;  %4693 = vmatprep.subr.bf16.mxu0 %v6269_v49  ;;  %v6345_v45 = vld [vmem:[#allocation11 + $0x488] ss:$16 sps:$4 sm:$0xff]   ;;  %v6353_v49 = vld [vmem:[#allocation11 + $0x46c] ss:$16 sps:$4 sm:$0xff]  }
 0x45b   :  { %4734 = vmatprep.subr.bf16.mxu1 %v6272_v52  ;;  %v6356_v52 = vld [vmem:[#allocation11 + $0x66c] ss:$16 sps:$4 sm:$0xff]  }
 0x45d   :  { %4694 = vmatpush1.bf16.msra.mxu0 %v6267_v57  ;;  %v6354_v57 = vld [vmem:[#allocation11 + $0x668] ss:$16 sps:$4 sm:$0xff]  }
 0x45e   :  { %4735 = vmatpush1.bf16.msra.mxu1 %v6270_v16  ;;  %4695 = vmatprep.subr.bf16.mxu0 %v6275_v22  ;;  %v6359_v16 = vld [vmem:[#allocation11 + $0x44c] ss:$16 sps:$4 sm:$0xff]  }
 0x45f   :  { %4736 = vmatprep.subr.bf16.mxu1 %v6278_v60  ;;  %v6362_v22 = vld [vmem:[#allocation11 + $0x64c] ss:$16 sps:$4 sm:$0xff]   ;;  %v6357_v60 = vld [vmem:[#allocation11 + $0x448] ss:$16 sps:$4 sm:$0xff]  }
 0x461   :  { %4696 = vmatpush1.bf16.msra.mxu0 %v6273_v63  ;;  %v6360_v63 = vld [vmem:[#allocation11 + $0x648] ss:$16 sps:$4 sm:$0xff]  }
 0x462   :  { %4737 = vmatpush1.bf16.msra.mxu1 %v6276_v21  ;;  %4697 = vmatprep.subr.bf16.mxu0 %v6281_v3  ;;  %v6365_v21 = vld [vmem:[#allocation11 + $0x42c] ss:$16 sps:$4 sm:$0xff]  }
 0x463   :  { %4738 = vmatprep.subr.bf16.mxu1 %v6284_v0  ;;  %v6368_v3 = vld [vmem:[#allocation11 + $0x62c] ss:$16 sps:$4 sm:$0xff]   ;;  %v6363_v0 = vld [vmem:[#allocation11 + $0x428] ss:$16 sps:$4 sm:$0xff]  }
 0x465   :  { %4698 = vmatpush2.bf16.msra.mxu0 %v6279_v55  ;;  %v6366_v55 = vld [vmem:[#allocation11 + $0x628] ss:$16 sps:$4 sm:$0xff]  }
 0x466   :  { %4739 = vmatpush2.bf16.msra.mxu1 %v6282_v38  ;;  %4699 = vmatprep.subr.bf16.mxu0 %v6287_v62  ;;  %v6371_v38 = vld [vmem:[#allocation11 + $0x40c] ss:$16 sps:$4 sm:$0xff]  }
 0x467   :  { %4740 = vmatprep.subr.bf16.mxu1 %v6290_v8  ;;  %v6374_v62 = vld [vmem:[#allocation11 + $0x60c] ss:$16 sps:$4 sm:$0xff]   ;;  %v6369_v8 = vld [vmem:[#allocation11 + $0x408] ss:$16 sps:$4 sm:$0xff]  }
 0x469   :  { %4700 = vmatpush2.bf16.msra.mxu0 %v6285_v56  ;;  %v6372_v56 = vld [vmem:[#allocation11 + $0x608] ss:$16 sps:$4 sm:$0xff]  }
 0x46a   :  { %4741 = vmatpush2.bf16.msra.mxu1 %v6288_v61  ;;  %4701 = vmatprep.subr.bf16.mxu0 %v6293_v26  ;;  %v6377_v61 = vld [vmem:[#allocation11 + $0x5ec] ss:$16 sps:$4 sm:$0xff]  }
 0x46b   :  { %4742 = vmatprep.subr.bf16.mxu1 %v6296_v11  ;;  %v6380_v26 = vld [vmem:[#allocation11 + $0x7ec] ss:$16 sps:$4 sm:$0xff]   ;;  %v6375_v11 = vld [vmem:[#allocation11 + $0x5e8] ss:$16 sps:$4 sm:$0xff]  }
 0x46d   :  { %4702 = vmatpush2.bf16.msra.mxu0 %v6291_v2  ;;  %v6378_v2 = vld [vmem:[#allocation11 + $0x7e8] ss:$16 sps:$4 sm:$0xff]  }
 0x46e   :  { %4743 = vmatpush2.bf16.msra.mxu1 %v6294_v59  ;;  %4703 = vmatprep.subr.bf16.mxu0 %v6299_v53  ;;  %v6383_v59 = vld [vmem:[#allocation11 + $0x5cc] ss:$16 sps:$4 sm:$0xff]  }
 0x46f   :  { %4744 = vmatprep.subr.bf16.mxu1 %v6302_v10  ;;  %v6386_v53 = vld [vmem:[#allocation11 + $0x7cc] ss:$16 sps:$4 sm:$0xff]   ;;  %v6381_v10 = vld [vmem:[#allocation11 + $0x5c8] ss:$16 sps:$4 sm:$0xff]  }
 0x471   :  { %4704 = vmatpush2.bf16.msra.mxu0 %v6297_v12  ;;  %v6384_v12 = vld [vmem:[#allocation11 + $0x7c8] ss:$16 sps:$4 sm:$0xff]  }
 0x472   :  { %4745 = vmatpush2.bf16.msra.mxu1 %v6300_v17  ;;  %4705 = vmatprep.subr.bf16.mxu0 %v6305_v6  ;;  %v6389_v17 = vld [vmem:[#allocation11 + $0x5ac] ss:$16 sps:$4 sm:$0xff]  }
 0x473   :  { %4746 = vmatprep.subr.bf16.mxu1 %v6308_v47  ;;  %v6392_v6 = vld [vmem:[#allocation11 + $0x7ac] ss:$16 sps:$4 sm:$0xff]   ;;  %v6387_v47 = vld [vmem:[#allocation11 + $0x5a8] ss:$16 sps:$4 sm:$0xff]  }
 0x475   :  { %4706 = vmatpush2.bf16.msra.mxu0 %v6303_v20  ;;  %v6390_v20 = vld [vmem:[#allocation11 + $0x7a8] ss:$16 sps:$4 sm:$0xff]  }
 0x476   :  { %4747 = vmatpush2.bf16.msra.mxu1 %v6306_v24  ;;  %4707 = vmatprep.subr.bf16.mxu0 %v6311_v25  ;;  %v6395_v24 = vld [vmem:[#allocation11 + $0x58c] ss:$16 sps:$4 sm:$0xff]  }
 0x477   :  { %4748 = vmatprep.subr.bf16.mxu1 %v6314_v28  ;;  %v6398_v25 = vld [vmem:[#allocation11 + $0x78c] ss:$16 sps:$4 sm:$0xff]   ;;  %v6393_v28 = vld [vmem:[#allocation11 + $0x588] ss:$16 sps:$4 sm:$0xff]  }
 0x479   :  { %4708 = vmatpush2.bf16.msra.mxu0 %v6309_v29  ;;  %v6396_v29 = vld [vmem:[#allocation11 + $0x788] ss:$16 sps:$4 sm:$0xff]  }
 0x47a   :  { %4749 = vmatpush2.bf16.msra.mxu1 %v6312_v31  ;;  %4709 = vmatprep.subr.bf16.mxu0 %v6317_v35  ;;  %v6401_v31 = vld [vmem:[#allocation11 + $0x56c] ss:$16 sps:$4 sm:$0xff]  }
 0x47b   :  { %4750 = vmatprep.subr.bf16.mxu1 %v6320_v32  ;;  %v6404_v35 = vld [vmem:[#allocation11 + $0x76c] ss:$16 sps:$4 sm:$0xff]   ;;  %v6399_v32 = vld [vmem:[#allocation11 + $0x568] ss:$16 sps:$4 sm:$0xff]  }
 0x47d   :  { %4710 = vmatpush2.bf16.msra.mxu0 %v6315_v15  ;;  %v6402_v15 = vld [vmem:[#allocation11 + $0x768] ss:$16 sps:$4 sm:$0xff]  }
 0x47e   :  { %4751 = vmatpush2.bf16.msra.mxu1 %v6318_v58  ;;  %4711 = vmatprep.subr.bf16.mxu0 %v6323_v9  ;;  %v6407_v58 = vld [vmem:[#allocation11 + $0x54c] ss:$16 sps:$4 sm:$0xff]  }
 0x47f   :  { %4752 = vmatprep.subr.bf16.mxu1 %v6326_v18  ;;  %v6410_v9 = vld [vmem:[#allocation11 + $0x74c] ss:$16 sps:$4 sm:$0xff]   ;;  %v6405_v18 = vld [vmem:[#allocation11 + $0x548] ss:$16 sps:$4 sm:$0xff]  }
 0x481   :  { %4712 = vmatpush2.bf16.msra.mxu0 %v6321_v7  ;;  %v6408_v7 = vld [vmem:[#allocation11 + $0x748] ss:$16 sps:$4 sm:$0xff]  }
 0x482   :  { %4753 = vmatpush2.bf16.msra.mxu1 %v6324_v30  ;;  %4763 = vmatprep.subr.bf16.mxu0 %v6329_v39  ;;  %v6413_v30 = vld [vmem:[#allocation11 + $0x52c] ss:$16 sps:$4 sm:$0xff]  }
 0x483   :  { %4804 = vmatprep.subr.bf16.mxu1 %v6332_v54  ;;  %v6416_v39 = vld [vmem:[#allocation11 + $0x72c] ss:$16 sps:$4 sm:$0xff]   ;;  %v6411_v54 = vld [vmem:[#allocation11 + $0x528] ss:$16 sps:$4 sm:$0xff]  }
 0x484   :  { %4714 = vmatmul.mubr.bf16.vlgmr.msra.gmra.mxu0 %v7167_v4  ;;  %v6342_v4 = vld [vmem:[#allocation11 + $0x6a8] ss:$16 sps:$4 sm:$0xff]  }
 0x485   :  { %4755 = vmatmul.mubr.bf16.vlgmr.msra.gmra.mxu1 %v7169_v1  ;;  %4764 = vmatpush1.bf16.msra.mxu0 %v6327_v50  ;;  %v6350_v1 = vld [vmem:[#allocation11 + $0x68c] ss:$16 sps:$4 sm:$0xff]   ;;  %v6414_v50 = vld [vmem:[#allocation11 + $0x728] ss:$16 sps:$4 sm:$0xff]  }
 0x486   :  { %4795 = vmatprep.mubr.bf16.mxu0 %v7175_v48  ;;  %4805 = vmatpush1.bf16.msra.mxu1 %v6330_v51  ;;  %v6348_v48 = vld [vmem:[#allocation11 + $0x688] ss:$16 sps:$4 sm:$0xff]   ;;  %v6419_v51 = vld [vmem:[#allocation11 + $0x50c] ss:$16 sps:$4 sm:$0xff]  }
 0x487   :  { %4836 = vmatprep.mubr.bf16.mxu1 %v7177_v13  ;;  %4765 = vmatprep.subr.bf16.mxu0 %v6335_v19  ;;  %v6351_v13 = vld [vmem:[#allocation11 + $0x468] ss:$16 sps:$4 sm:$0xff]   ;;  %v6422_v19 = vld [vmem:[#allocation11 + $0x70c] ss:$16 sps:$4 sm:$0xff]  }
 0x488   :  { %4806 = vmatprep.subr.bf16.mxu1 %v6338_v46  ;;  %v6417_v46 = vld [vmem:[#allocation11 + $0x508] ss:$16 sps:$4 sm:$0xff]  }
 0x489   :  { %4766 = vmatpush1.bf16.msra.mxu0 %v6333_v5  ;;  %v6420_v5 = vld [vmem:[#allocation11 + $0x708] ss:$16 sps:$4 sm:$0xff]  }
 0x48a   :  { %4807 = vmatpush1.bf16.msra.mxu1 %v6336_v40  ;;  %4767 = vmatprep.subr.bf16.mxu0 %v6341_v41  ;;  %v7197_v40 = vld [vmem:[#allocation13] sm:$0xf] }
 0x48b   :  { %4808 = vmatprep.subr.bf16.mxu1 %v6344_v42  ;;  %v3220_v41 = vrot.slane %v7197_v40, %v6939_v27  ;;  %v3224_v42 = vrot.slane %v7197_v40, %v6949_v37 }
 0x48d   :  { %4768 = vmatpush1.bf16.msra.mxu0 %v6339_v43 }
 0x48e   :  { %4809 = vmatpush1.bf16.msra.mxu1 %v6342_v4  ;;  %4769 = vmatprep.subr.bf16.mxu0 %v6347_v44 }
 0x48f   :  { %4810 = vmatprep.subr.bf16.mxu1 %v6350_v1 }
 0x491   :  { %4770 = vmatpush1.bf16.msra.mxu0 %v6345_v45 }
 0x492   :  { %4811 = vmatpush1.bf16.msra.mxu1 %v6348_v48  ;;  %4771 = vmatprep.subr.bf16.mxu0 %v6353_v49 }
 0x493   :  { %4812 = vmatprep.subr.bf16.mxu1 %v6356_v52 }
 0x495   :  { %4772 = vmatpush1.bf16.msra.mxu0 %v6351_v13 }
 0x496   :  { %4813 = vmatpush1.bf16.msra.mxu1 %v6354_v57  ;;  %4773 = vmatprep.subr.bf16.mxu0 %v6359_v16 }
 0x497   :  { %4814 = vmatprep.subr.bf16.mxu1 %v6362_v22 }
 0x499   :  { %4774 = vmatpush1.bf16.msra.mxu0 %v6357_v60 }
 0x49a   :  { %4815 = vmatpush1.bf16.msra.mxu1 %v6360_v63  ;;  %4775 = vmatprep.subr.bf16.mxu0 %v6365_v21 }
 0x49b   :  { %4816 = vmatprep.subr.bf16.mxu1 %v6368_v3 }
 0x49d   :  { %4776 = vmatpush1.bf16.msra.mxu0 %v6363_v0 }
 0x49e   :  { %4817 = vmatpush1.bf16.msra.mxu1 %v6366_v55  ;;  %4777 = vmatprep.subr.bf16.mxu0 %v6371_v38 }
 0x49f   :  { %4818 = vmatprep.subr.bf16.mxu1 %v6374_v62 }
 0x4a1   :  { %4778 = vmatpush1.bf16.msra.mxu0 %v6369_v8 }
 0x4a2   :  { %4819 = vmatpush1.bf16.msra.mxu1 %v6372_v56  ;;  %4779 = vmatprep.subr.bf16.mxu0 %v6377_v61  ;;  %v6423_v61 = vld [vmem:[#allocation14 + $0x78] sm:$0xff]  }
 0x4a3   :  { %4820 = vmatprep.subr.bf16.mxu1 %v6380_v26  ;;  %v6424_v26 = vld [vmem:[#allocation14 + $0xf8] sm:$0xff]  }
 0x4a5   :  { %4780 = vmatpush2.bf16.msra.mxu0 %v6375_v11  ;;  %v6425_v11 = vld [vmem:[#allocation14 + $0x38] sm:$0xff]  }
 0x4a6   :  { %4821 = vmatpush2.bf16.msra.mxu1 %v6378_v2  ;;  %4781 = vmatprep.subr.bf16.mxu0 %v6383_v59  ;;  %v6426_v2 = vld [vmem:[#allocation14 + $0xb8] sm:$0xff]   ;;  %v6427_v59 = vld [vmem:[#allocation14 + $0x70] sm:$0xff]  }
 0x4a7   :  { %4822 = vmatprep.subr.bf16.mxu1 %v6386_v53  ;;  %v6428_v53 = vld [vmem:[#allocation14 + $0xf0] sm:$0xff]  }
 0x4a9   :  { %4782 = vmatpush2.bf16.msra.mxu0 %v6381_v10  ;;  %v6429_v10 = vld [vmem:[#allocation14 + $0x30] sm:$0xff]  }
 0x4aa   :  { %4823 = vmatpush2.bf16.msra.mxu1 %v6384_v12  ;;  %4783 = vmatprep.subr.bf16.mxu0 %v6389_v17  ;;  %v6430_v12 = vld [vmem:[#allocation14 + $0xb0] sm:$0xff]  }
 0x4ab   :  { %4824 = vmatprep.subr.bf16.mxu1 %v6392_v6 }
 0x4ad   :  { %4784 = vmatpush2.bf16.msra.mxu0 %v6387_v47  ;;  %v6431_v47 = vld [vmem:[#allocation14 + $0x68] sm:$0xff]  }
 0x4ae   :  { %4825 = vmatpush2.bf16.msra.mxu1 %v6390_v20  ;;  %4785 = vmatprep.subr.bf16.mxu0 %v6395_v24  ;;  %v6432_v20 = vld [vmem:[#allocation14 + $0xe8] sm:$0xff]  }
 0x4af   :  { %4826 = vmatprep.subr.bf16.mxu1 %v6398_v25  ;;  %v6433_v25 = vld [vmem:[#allocation14 + $0x28] sm:$0xff]  }
 0x4b1   :  { %4786 = vmatpush2.bf16.msra.mxu0 %v6393_v28  ;;  %v6434_v28 = vld [vmem:[#allocation14 + $0xa8] sm:$0xff]  }
 0x4b2   :  { %4827 = vmatpush2.bf16.msra.mxu1 %v6396_v29  ;;  %4787 = vmatprep.subr.bf16.mxu0 %v6401_v31 }
 0x4b3   :  { %4828 = vmatprep.subr.bf16.mxu1 %v6404_v35 }
 0x4b5   :  { %4788 = vmatpush2.bf16.msra.mxu0 %v6399_v32  ;;  %v6435_v32 = vld [vmem:[#allocation14 + $0x60] sm:$0xff]  }
 0x4b6   :  { %4829 = vmatpush2.bf16.msra.mxu1 %v6402_v15  ;;  %4789 = vmatprep.subr.bf16.mxu0 %v6407_v58  ;;  %v6436_v15 = vld [vmem:[#allocation14 + $0xe0] sm:$0xff]  }
 0x4b7   :  { %4830 = vmatprep.subr.bf16.mxu1 %v6410_v9  ;;  %v6437_v9 = vld [vmem:[#allocation14 + $0x20] sm:$0xff]  }
 0x4b9   :  { %4790 = vmatpush2.bf16.msra.mxu0 %v6405_v18  ;;  %v6438_v18 = vld [vmem:[#allocation14 + $0xa0] sm:$0xff]  }
 0x4ba   :  { %4831 = vmatpush2.bf16.msra.mxu1 %v6408_v7  ;;  %4791 = vmatprep.subr.bf16.mxu0 %v6413_v30  ;;  %v6439_v30 = vld [vmem:[#allocation14 + $0x58] sm:$0xff]  }
 0x4bb   :  { %4832 = vmatprep.subr.bf16.mxu1 %v6416_v39  ;;  %v6440_v39 = vld [vmem:[#allocation14 + $0xd8] sm:$0xff]  }
 0x4bd   :  { %4792 = vmatpush2.bf16.msra.mxu0 %v6411_v54  ;;  %v6441_v54 = vld [vmem:[#allocation14 + $0x18] sm:$0xff]  }
 0x4be   :  { %4833 = vmatpush2.bf16.msra.mxu1 %v6414_v50  ;;  %4793 = vmatprep.subr.bf16.mxu0 %v6419_v51  ;;  %v6442_v50 = vld [vmem:[#allocation14 + $0x98] sm:$0xff]   ;;  %v6443_v51 = vld [vmem:[#allocation14 + $0x50] sm:$0xff]  }
 0x4bf   :  { %4834 = vmatprep.subr.bf16.mxu1 %v6422_v19  ;;  %v6444_v19 = vld [vmem:[#allocation14 + $0xd0] sm:$0xff]  }
 0x4c1   :  { %4794 = vmatpush2.bf16.msra.mxu0 %v6417_v46  ;;  %v6445_v46 = vld [vmem:[#allocation14 + $0x10] sm:$0xff]  }
 0x4c2   :  { %4835 = vmatpush2.bf16.msra.mxu1 %v6420_v5  ;;  %5964 = vmatprep.subr.bf16.mxu0 %v6423_v61  ;;  %v6446_v5 = vld [vmem:[#allocation14 + $0x90] sm:$0xff]  }
 0x4c3   :  { %5986 = vmatprep.subr.bf16.mxu1 %v6424_v26 }
 0x4c4   :  { %4796 = vmatmul.mubr.bf16.vlgmr.msra.gmra.mxu0 %v7183_v33  ;;  %v4551_v43 = vpop.f32.mrf.mxu0  ;;  %v4592_v4 = vpop.f32.mrf.mxu1 }
 0x4c5   :  { %4837 = vmatmul.mubr.bf16.vlgmr.msra.gmra.mxu1 %v7187_v34  ;;  %v4552_v44 = vadd.f32 %v4551_v43, %v3220_v41  ;;  %5965 = vmatpush3.bf16.msra.mxu0 %v6425_v11  ;;  %v6447_v41 = vld [vmem:[#allocation14 + $0x48] sm:$0xff]  }
 0x4c6   :  { %v4553_v1 = vpop.f32.mrf.mxu0  ;;  %v4594_v45 = vpop.f32.mrf.mxu1  ;;  %5987 = vmatpush3.bf16.msra.mxu1 %v6426_v2  ;;  %5966 = vmatprep.subr.bf16.mxu0 %v6427_v59  ;;  %v6449_v43 = vld [vmem:[#allocation14 + $0x8] sm:$0xff]  }
 0x4c7   :  { %v4593_v48 = vadd.f32 %v4592_v4, %v4552_v44  ;;  %v4554_v49 = vadd.f32 %v4553_v1, %v3224_v42  ;;  %5988 = vmatprep.subr.bf16.mxu1 %v6428_v53  ;;  %v6448_v42 = vld [vmem:[#allocation14 + $0xc8] sm:$0xff]   ;;  %v6451_v44 = vld [vmem:[#allocation14 + $0x40] sm:$0xff]  }
 0x4c8   :  { %v4555_v52 = vpop.f32.mrf.mxu0  ;;  %v4596_v13 = vpop.f32.mrf.mxu1  ;;  %v6450_v4 = vld [vmem:[#allocation14 + $0x88] sm:$0xff]   ;;  %v6452_v1 = vld [vmem:[#allocation14 + $0xc0] sm:$0xff]  }
 0x4c9   :  { %v4595_v57 = vadd.f32 %v4594_v45, %v4554_v49  ;;  %5967 = vmatpush3.bf16.msra.mxu0 %v6429_v10  ;;  %v6453_v45 = vld [vmem:[#allocation14] sm:$0xff]  }
 0x4ca   :  { %v4556_v16 = vpop.f32.mrf.mxu0  ;;  %v4597_v22 = vpop.f32.mrf.mxu1  ;;  %5989 = vmatpush3.bf16.msra.mxu1 %v6430_v12  ;;  %5968 = vmatprep.subr.bf16.mxu0 %v6431_v47 }
 0x4cb   :  { %5990 = vmatprep.subr.bf16.mxu1 %v6432_v20 }
 0x4cd   :  { %5969 = vmatpush3.bf16.msra.mxu0 %v6433_v25 }
 0x4ce   :  { %5991 = vmatpush3.bf16.msra.mxu1 %v6434_v28  ;;  %5970 = vmatprep.subr.bf16.mxu0 %v6435_v32 }
 0x4cf   :  { %5992 = vmatprep.subr.bf16.mxu1 %v6436_v15 }
 0x4d1   :  { %5971 = vmatpush3.bf16.msra.mxu0 %v6437_v9 }
 0x4d2   :  { %5993 = vmatpush3.bf16.msra.mxu1 %v6438_v18  ;;  %5972 = vmatprep.subr.bf16.mxu0 %v6439_v30 }
 0x4d3   :  { %5994 = vmatprep.subr.bf16.mxu1 %v6440_v39 }
 0x4d5   :  { %5973 = vmatpush3.bf16.msra.mxu0 %v6441_v54 }
 0x4d6   :  { %5995 = vmatpush3.bf16.msra.mxu1 %v6442_v50  ;;  %5974 = vmatprep.subr.bf16.mxu0 %v6443_v51 }
 0x4d7   :  { %5996 = vmatprep.subr.bf16.mxu1 %v6444_v19 }
 0x4d9   :  { %5975 = vmatpush3.bf16.msra.mxu0 %v6445_v46 }
 0x4da   :  { %5997 = vmatpush3.bf16.msra.mxu1 %v6446_v5  ;;  %5976 = vmatprep.subr.bf16.mxu0 %v6447_v41 }
 0x4db   :  { %5998 = vmatprep.subr.bf16.mxu1 %v6448_v42 }
 0x4dd   :  { %5977 = vmatpush3.bf16.msra.mxu0 %v6449_v43 }
 0x4de   :  { %5999 = vmatpush3.bf16.msra.mxu1 %v6450_v4  ;;  %5978 = vmatprep.subr.bf16.mxu0 %v6451_v44 }
 0x4df   :  { %6000 = vmatprep.subr.bf16.mxu1 %v6452_v1 }
 0x4e1   :  { %5979 = vmatpush3.bf16.msra.mxu0 %v6453_v45 }
 0x504   :  { %v4633_v60 = vpop.f32.mrf.mxu0  ;;  %v4674_v63 = vpop.f32.mrf.mxu1 }
 0x505   :  { %v4634_v21 = vadd.f32 %v4633_v60, %v4593_v48  ;;  %v6454_v48 = vld [vmem:[#allocation14 + $0x80] sm:$0xff]  }
 0x506   :  { %v4635_v3 = vpop.f32.mrf.mxu0  ;;  %v4676_v0 = vpop.f32.mrf.mxu1  ;;  %6001 = vmatpush3.bf16.msra.mxu1 %v6454_v48 }
 0x507   :  { %v7205_v33 = vadd.f32 %v4674_v63, %v4634_v21  ;;  %v4636_v55 = vadd.f32 %v4635_v3, %v4595_v57 }
 0x508   :  { %v4637_v38 = vpop.f32.mrf.mxu0  ;;  %v4678_v34 = vpop.f32.mrf.mxu1 }
 0x509   :  { %v7207_v62 = vadd.f32 %v4676_v0, %v4636_v55  ;;  %v7221_v52 = vmax.f32 %v7205_v33, 0.0  ;;  %v3228_v34 = vrot.slane %v7197_v40, %v6942_v23 }
 0x50a   :  { %v4638_v8 = vpop.f32.mrf.mxu0  ;;  %v4679_v56 = vpop.f32.mrf.mxu1 }
 0x50b   :  { %v7218_v49 = vmax.f32 %v7207_v62, 0.0  ;;  %v4851_v57 = vrot.slane %v7221_v52, 4  ;;  %v3232_v62 = vrot.slane %v7197_v40, %v6946_v36 }
 0x50d   :  { %v4857_v13 = vrot.slane %v7218_v49, 4  ;;  %v4852_v22 = vadd.f32 %v4851_v57, %v7221_v52 }
 0x50f   :  { %v4858_v16 = vadd.f32 %v4857_v13, %v7218_v49  ;;  %v4853_v63 = vrot.slane %v4852_v22, 2 }
 0x511   :  { %v4859_v60 = vrot.slane %v4858_v16, 2  ;;  %v4854_v3 = vadd.f32 %v4853_v63, %v4852_v22 }
 0x513   :  { %v4860_v21 = vadd.f32 %v4859_v60, %v4858_v16  ;;  %v4855_v55 = vrot.slane %v4854_v3, 1 }
 0x515   :  { %v4861_v0 = vrot.slane %v4860_v21, 1  ;;  %v4856_v33 = vadd.f32 %v4855_v55, %v4854_v3 }
 0x517   :  { %v4862_v38 = vadd.f32 %v4861_v0, %v4860_v21  ;;  %v7234_v61 = vmul.f32 0.125, %v4856_v33 }
 0x519   :  { %v7231_v8 = vmul.f32 0.125, %v4862_v38  ;;  %v4879_v53 = vsub.f32 %v7221_v52, %v7234_v61 }
 0x51b   :  { %v4880_v11 = vsub.f32 %v7218_v49, %v7231_v8 }
 0x51d   :  { %v4884_v20 = vmul.f32 %v4880_v11, %v4880_v11 }
 0x544   :  { %v7209_v17 = vpop.f32.mrf.mxu0 }
 0x545   :  { %v7211_v6 = vpop.f32.mrf.mxu1  ;;  %v4716_v56 = vadd.f32 %v7209_v17, %v3228_v34 }
 0x546   :  { %v7213_v24 = vpop.f32.mrf.mxu0 }
 0x547   :  { %v7215_v29 = vpop.f32.mrf.mxu1  ;;  %v4718_v26 = vadd.f32 %v7213_v24, %v3232_v62  ;;  %v4757_v2 = vadd.f32 %v7211_v6, %v4716_v56  ;;  %v4883_v24 = vmul.f32 %v4879_v53, %v4879_v53 }
 0x548   :  { %v4719_v31 = vpop.f32.mrf.mxu0 }
 0x549   :  { %v4760_v35 = vpop.f32.mrf.mxu1  ;;  %v4759_v10 = vadd.f32 %v7215_v29, %v4718_v26 }
 0x54a   :  { %v4720_v58 = vpop.f32.mrf.mxu0 }
 0x54b   :  { %v4761_v7 = vpop.f32.mrf.mxu1  ;;  %v4893_v58 = vrot.slane %v4884_v20, 4 }
 0x54c   :  { %v4887_v7 = vrot.slane %v4883_v24, 4 }
 0x54d   :  { %v4894_v54 = vadd.f32 %v4893_v58, %v4884_v20 }
 0x54e   :  { %v4888_v19 = vadd.f32 %v4887_v7, %v4883_v24 }
 0x54f   :  { %v4895_v41 = vrot.slane %v4894_v54, 2 }
 0x550   :  { %v4889_v4 = vrot.slane %v4888_v19, 2 }
 0x551   :  { %v4896_v45 = vadd.f32 %v4895_v41, %v4894_v54 }
 0x552   :  { %v4890_v57 = vadd.f32 %v4889_v4, %v4888_v19 }
 0x553   :  { %v4897_v60 = vrot.slane %v4896_v45, 1 }
 0x554   :  { %v4891_v3 = vrot.slane %v4890_v57, 1 }
 0x555   :  { %v4898_v38 = vadd.f32 %v4897_v60, %v4896_v45 }
 0x556   :  { %v4892_v62 = vadd.f32 %v4891_v3, %v4890_v57 }
 0x557   :  { %v4912_v11 = vmul.f32 0.125, %v4898_v38 }
 0x558   :  { %v4911_v53 = vmul.f32 0.125, %v4892_v62 }
 0x584   :  { %v4797_v59 = vpop.f32.mrf.mxu0 }
 0x585   :  { %v4798_v40 = vadd.f32 %v4797_v59, %v4757_v2  ;;  %v4838_v12 = vpop.f32.mrf.mxu1 }
 0x586   :  { %v4799_v47 = vpop.f32.mrf.mxu0 }
 0x587   :  { %v4839_v17 = vadd.f32 %v4838_v12, %v4798_v40  ;;  %v4800_v25 = vadd.f32 %v4799_v47, %v4759_v10  ;;  %v4840_v28 = vpop.f32.mrf.mxu1  ;;  %v4916_v12 = vadd.f32 1e-05, %v4912_v11 }
 0x588   :  { %v4801_v31 = vpop.f32.mrf.mxu0 }
 0x589   :  { %v7243_v35 = vmax.f32 %v4839_v17, 0.0  ;;  %v4841_v32 = vadd.f32 %v4840_v28, %v4800_v25  ;;  %v4842_v15 = vpop.f32.mrf.mxu1  ;;  %v4915_v17 = vadd.f32 1e-05, %v4911_v53  ;;  %6479 = vrsqrt.f32 %v4916_v12 }
 0x58a   :  { %v4802_v6 = vpop.f32.mrf.mxu0 }
 0x58b   :  { %v4863_v9 = vrot.slane %v7243_v35, 4  ;;  %v7246_v18 = vmax.f32 %v4841_v32, 0.0  ;;  %v4843_v29 = vpop.f32.mrf.mxu1  ;;  %6481 = vrsqrt.f32 %v4915_v17 }
 0x58d   :  { %v4864_v30 = vadd.f32 %v4863_v9, %v7243_v35  ;;  %v4869_v39 = vrot.slane %v7246_v18, 4 }
 0x58f   :  { %v4865_v50 = vrot.slane %v4864_v30, 2  ;;  %v4870_v51 = vadd.f32 %v4869_v39, %v7246_v18 }
 0x591   :  { %v4866_v46 = vadd.f32 %v4865_v50, %v4864_v30  ;;  %v4871_v5 = vrot.slane %v4870_v51, 2  ;;  %v4849_v50 = vld [vmem:[%s7295_s13] sm:$0xf] }
 0x593   :  { %v4867_v42 = vrot.slane %v4866_v46, 1  ;;  %v4872_v43 = vadd.f32 %v4871_v5, %v4870_v51 }
 0x595   :  { %v4868_v44 = vadd.f32 %v4867_v42, %v4866_v46  ;;  %v4873_v1 = vrot.slane %v4872_v43, 1 }
 0x596   :  { %v6480_v15 = vpop.eup %6479 }
 0x597   :  { %v4877_v48 = vmul.f32 0.125, %v4868_v44  ;;  %v4874_v13 = vadd.f32 %v4873_v1, %v4872_v43 }
 0x598   :  { %v6482_v6 = vpop.eup %6481 }
 0x599   :  { %v4881_v16 = vsub.f32 %v7243_v35, %v4877_v48  ;;  %v4878_v22 = vmul.f32 0.125, %v4874_v13  ;;  %v4927_v9 = vcombine.low %v6482_v6, %v6480_v15 }
 0x59b   :  { %v4885_v63 = vmul.f32 %v4881_v16, %v4881_v16  ;;  %v4882_v21 = vsub.f32 %v7246_v18, %v4878_v22  ;;  %v4935_v30 = vrot.slane %v4927_v9, %v6934_v14 }
 0x59d   :  { %v4899_v0 = vrot.slane %v4885_v63, 4  ;;  %v4886_v55 = vmul.f32 %v4882_v21, %v4882_v21 }
 0x59f   :  { %v4900_v34 = vadd.f32 %v4899_v0, %v4885_v63  ;;  %v4905_v33 = vrot.slane %v4886_v55, 4  ;;  %v4850_v63 = vld [vmem:[%s7296_s14] sm:$0xf]  ;;  %s6762_s14 = smov [#allocation20]  }
 0x5a0   :  { %s5392_s9 = sshll.u32 %s6762_s14, 4  ;;  %s5393_s9 = int_to_ptr.vmem [resolvable:$true] %s5392_s9 }
 0x5a1   :  { %v4901_v56 = vrot.slane %v4900_v34, 2  ;;  %v4906_v26 = vadd.f32 %v4905_v33, %v4886_v55  ;;  %s6707_s21 = scalar_lea.vmem %s5393_s9, 128  ;;  %p6712_p0 = scmp.lt.s32.totalorder %s5393_s9, %s5393_s9 }
 0x5a2   :  { %p6708_p13 = scmp.ne.s32.totalorder %s5393_s9, %s6707_s21  ;;  %p6713_p1 = scmp.lt.s32.totalorder %s6707_s21, %s6707_s21 }
 0x5a3   :  { %v4902_v2 = vadd.f32 %v4901_v56, %v4900_v34  ;;  %v4907_v59 = vrot.slane %v4906_v26, 2 }
 0x5a4   :  { %p6714_p2 = por %p6713_p1, %p6712_p0 }
 0x5a5   :  { %v4903_v10 = vrot.slane %v4902_v2, 1  ;;  %v4908_v40 = vadd.f32 %v4907_v59, %v4906_v26 }
 0x5a6   :  { %p6715_p3 = pnand %p6714_p2, %p6708_p13 }
 0x5a7   :  { %v4904_v47 = vadd.f32 %v4903_v10, %v4902_v2  ;;  %v4909_v20 = vrot.slane %v4908_v40, 1 }
 0x5a9   :  { %v4913_v25 = vmul.f32 0.125, %v4904_v47  ;;  %v4910_v28 = vadd.f32 %v4909_v20, %v4908_v40 }
 0x5ab   :  { %v4917_v31 = vadd.f32 1e-05, %v4913_v25  ;;  %v4914_v24 = vmul.f32 0.125, %v4910_v28 }
 0x5ad   :  { %v4918_v32 = vadd.f32 1e-05, %v4914_v24  ;;  %6483 = vrsqrt.f32 %v4917_v31 }
 0x5af   :  { %6485 = vrsqrt.f32 %v4918_v32 }
 0x5ba   :  { %v6484_v58 = vpop.eup %6483 }
 0x5bc   :  { %v6486_v29 = vpop.eup %6485 }
 0x5bd   :  { %v4928_v7 = vcombine.low %v6484_v58, %v6486_v29 }
 0x5bf   :  { %v4942_v39 = vrot.slane %v4928_v7, %v6934_v14 }
 0x5c1   :  { %v4943_v54 = vcombine.low %v4935_v30, %v4942_v39 }
 0x5c3   :  { %v4950_v51 = vrot.slane %v4943_v54, %v6934_v14 }
 0x5c5   :  { %v4952_v19 = vmul.f32 %v4950_v51, %v4849_v50 }
 0x5c7   :  { %v4965_v46 = vrot.slane %v4952_v19, %v6942_v23  ;;  %v4969_v5 = vrot.slane %v4952_v19, %v6946_v36  ;;  %v4957_v41 = vrot.slane %v4952_v19, %v6939_v27  ;;  %v4961_v42 = vrot.slane %v4952_v19, %v6949_v37 }
 0x5c9   :  { %v4976_v43 = vmul.f32 %v4965_v46, %v4877_v48  ;;  %v4977_v4 = vmul.f32 %v4969_v5, %v4878_v22  ;;  %v4974_v44 = vmul.f32 %v4957_v41, %v7234_v61  ;;  %v4975_v1 = vmul.f32 %v4961_v42, %v7231_v8 }
 0x5ca   :  { %v5009_v48 = vmul.f32 %v4961_v42, %v7218_v49  ;;  %v5011_v61 = vmul.f32 %v4969_v5, %v7246_v18  ;;  %v5008_v8 = vmul.f32 %v4957_v41, %v7221_v52  ;;  %v5010_v22 = vmul.f32 %v4965_v46, %v7243_v35  ;;  %v5931_v35 = vld [vmem:[#allocation16] ss:$0 sm:$0xff] }
 0x5cb   :  { %v4983_v45 = vcombine.low %v4976_v43, %v4977_v4  ;;  %v4982_v13 = vcombine.low %v4974_v44, %v4975_v1 }
 0x5cd   :  { %v4997_v57 = vrot.slane %v4983_v45, %v6934_v14  ;;  %v4990_v16 = vrot.slane %v4982_v13, %v6934_v14 }
 0x5cf   :  { %v4998_v60 = vcombine.low %v4990_v16, %v4997_v57 }
 0x5d1   :  { %v5005_v21 = vrot.slane %v4998_v60, %v6934_v14 }
 0x5d3   :  { %v5007_v3 = vsub.f32 %v4850_v63, %v5005_v21 }
 0x5d5   :  { %v5020_v0 = vrot.slane %v5007_v3, %v6949_v37  ;;  %v5028_v55 = vrot.slane %v5007_v3, %v6946_v36  ;;  %v5016_v38 = vrot.slane %v5007_v3, %v6939_v27  ;;  %v5024_v34 = vrot.slane %v5007_v3, %v6942_v23 }
 0x5d7   :  { %v5034_v33 = vadd.f32 %v5020_v0, %v5009_v48  ;;  %v5036_v62 = vadd.f32 %v5028_v55, %v5011_v61  ;;  %v5033_v14 = vadd.f32 %v5016_v38, %v5008_v8  ;;  %v5035_v56 = vadd.f32 %v5024_v34, %v5010_v22 }
 0x5d9   :  { %v5038_v26 = vpack.c.bf16 %v5034_v33, %v5034_v33  ;;  %v5040_v49 = vpack.c.bf16 %v5036_v62, %v5036_v62  ;;  %v5037_v11 = vpack.c.bf16 %v5033_v14, %v5033_v14  ;;  %v5039_v18 = vpack.c.bf16 %v5035_v56, %v5035_v56 }
 0x5db   :  { %5336 = vmatprep.mubr.bf16.mxu0 %v5038_v26  ;;  %5376 = vmatprep.mubr.bf16.mxu1 %v5040_v49 }
 0x5dc   :  { %5337 = vmatmul.mubr.bf16.vlgmr.msra.gmra.mxu0 %v5037_v11  ;;  %5377 = vmatmul.mubr.bf16.vlgmr.msra.gmra.mxu1 %v5039_v18 }
 0x69c   :  { %v5980_v52 = vpop.f32.mrf.mxu0  ;;  %v6002_v37 = vpop.f32.mrf.mxu1 }
 0x69e   :  { %v5981_v36 = vpop.f32.mrf.mxu0  ;;  %v6003_v2 = vpop.f32.mrf.mxu1 }
 0x69f   :  { %v5982_v27 = vadd.f32 %v5981_v36, %v5980_v52  ;;  %v6004_v10 = vadd.f32 %v6003_v2, %v6002_v37 }
 0x6a0   :  { %v5983_v59 = vpop.f32.mrf.mxu0  ;;  %v6005_v23 = vpop.f32.mrf.mxu1 }
 0x6a1   :  { %v5339_v53 = vadd.f32 %v5982_v27, %v5931_v35 }
 0x6a2   :  { %v5984_v40 = vpop.f32.mrf.mxu0  ;;  %v6006_v12 = vpop.f32.mrf.mxu1 }
 0x6a3   :  { %v5379_v47 = vadd.f32 %v6004_v10, %v5339_v53 }
 0x6a5   :  { %v5384_v20 = vmax.f32 %v5379_v47, 0.0 }
 0x6a7   :  { %5385 = vst [vmem:[#allocation20] sm:$0xff] %v5384_v20 }
 0x6a8   :  { %6718 = shalt.err (!%p6715_p3)
}
 0x6a9   :  { %5395 = dma.vmem_to_hbm [thread:$0]  %s5393_s9, 128, %s7297_s15, [#allocation4]  }
 0x6aa   :  { %6739 = dma.done.wait [#allocation4], 128  }
 0x6ab   :  { %6740 = vsyncadd [#allocation4], 4294967168 }
 0x6ac   :  { %5399 = vsyncpa [#allocation3], 1 }
 0x6ad   :  { %5400 = vsyncpa [#allocation6], 1 }
 0x6ae   :  { %5401 = vsyncpa [#allocation9], 1 }
 0x6af   :  { %5402 = vsyncpa [#allocation12], 1 }
 0x6b0   :  { %5403 = vsyncpa [#allocation15], 1 }
 0x6b1   :  { %5404 = vsyncpa [#allocation18], 1 }
 0x6b2   :  { %5405 = vsyncpa [#allocation4], 1 }

</bundles_post_ra>
